<compile_context>
chip_gen: v7x
topology: tpu7x:2x2x1
jax: 0.10.0
libtpu: 0.0.40
codegen_flags: <defaults>
</compile_context>

<pallas_src>
import jax
import jax.numpy as jnp
from jax.experimental import pallas as pl
from jax.experimental.pallas import tpu as pltpu

_NEG_SLOPE = 0.2      # LeakyReLU(0.2), matching the PyTorch module
_OUT_PAD = 128        # final layer padded from 1 -> 128 lanes (lane-dense out)


def _leaky_relu(x):
    return jnp.where(x >= 0, x, _NEG_SLOPE * x)


def _disc_kernel(x_ref, w1_ref, b1_ref, w2_ref, b2_ref, w3_ref, b3_ref,
                 w4_ref, b4_ref, o_ref):
    # One batch tile through the whole MLP.  Matmuls run on the MXU with bf16
    # operands + f32 accumulation; LeakyReLU is f32 VPU; sigmoid's exp and
    # reciprocal run on the EUP.
    x = x_ref[...].astype(jnp.bfloat16)

    h = jnp.dot(x, w1_ref[...].astype(jnp.bfloat16),
                preferred_element_type=jnp.float32) + b1_ref[...]
    h = _leaky_relu(h)
    h = jnp.dot(h.astype(jnp.bfloat16), w2_ref[...].astype(jnp.bfloat16),
                preferred_element_type=jnp.float32) + b2_ref[...]
    h = _leaky_relu(h)
    h = jnp.dot(h.astype(jnp.bfloat16), w3_ref[...].astype(jnp.bfloat16),
                preferred_element_type=jnp.float32) + b3_ref[...]
    h = _leaky_relu(h)
    # Final layer is zero-padded to 128 output columns -> full-width stores.
    h = jnp.dot(h.astype(jnp.bfloat16), w4_ref[...].astype(jnp.bfloat16),
                preferred_element_type=jnp.float32) + b4_ref[...]
    # sigmoid(h) = 1 / (1 + exp(-h)); exp + approximate reciprocal on the EUP.
    o_ref[...] = pl.reciprocal(1.0 + jnp.exp(-h), approx=True).astype(o_ref.dtype)


def _round_up(x, m):
    return (x + m - 1) // m * m


def discriminator_forward(img, params):
    """Pallas forward of the LSGAN Discriminator.

    img: (B, C, H, W).  params: [(w1,b1),(w2,b2),(w3,b3),(w4,b4)] with
    w_i shaped (in, out) and b_i shaped (out,), in f32 or (preferably) bf16.
    Returns (B, 1) float32.
    """
    (w1, b1), (w2, b2), (w3, b3), (w4, b4) = params
    B = img.shape[0]
    d_in = w1.shape[0]
    h1, h2, h3 = w1.shape[1], w2.shape[1], w3.shape[1]

    # Keep x in the caller's dtype (no extra HBM pass); the kernel casts to
    # bf16 right before the first dot.  If the producer can hand bf16, the x
    # DMA is halved for free.
    x = img.reshape(B, -1)
    assert x.shape[1] == d_in

    # ---- batch tiling: guarantee grid >= 2 whenever B allows it, so the
    # "parallel" axis shards across both TensorCores on dual-TC chips. ----
    try:
        kind = jax.devices()[0].device_kind.lower()
    except Exception:  # pragma: no cover
        kind = ""
    tb_cap = 256 if "v5" in kind else 512        # keep smaller tiles on v5e
    TB = min(tb_cap, _round_up(max(-(-B // 2), 1), 8))
    B_pad = _round_up(B, TB)
    if B_pad != B:
        x = jnp.pad(x, ((0, B_pad - B), (0, 0)))  # zero rows, sliced off later
    grid = (B_pad // TB,)

    # ---- wrapper-side layout plumbing (no dtype change on the big weights;
    # only reshape biases and pad the tiny last layer to 128 lanes). ----
    b1r = b1.reshape(1, -1)
    b2r = b2.reshape(1, -1)
    b3r = b3.reshape(1, -1)
    w4p = jnp.zeros((h3, _OUT_PAD), w4.dtype).at[:, :1].set(w4)
    b4p = jnp.zeros((1, _OUT_PAD), b4.dtype).at[:, :1].set(b4.reshape(1, -1))

    # ---- VMEM budget derived from actual footprint (double-buffered blocks
    # + headroom for f32 activations / compiler scratch); stays well under
    # v7x's 64 MiB physical VMEM. ----
    weight_bytes = sum(int(a.size) * a.dtype.itemsize
                       for a in (w1, b1r, w2, b2r, w3, b3r, w4p, b4p))
    io_bytes = TB * d_in * x.dtype.itemsize + TB * _OUT_PAD * 4
    vmem_limit = 2 * (weight_bytes + io_bytes) + (12 << 20)
    vmem_limit = int(min(max(vmem_limit, 16 << 20), 56 << 20))

    flops = 2 * B_pad * (d_in * h1 + h1 * h2 + h2 * h3 + h3 * _OUT_PAD)
    bytes_accessed = (int(x.size) * x.dtype.itemsize
                      + (B_pad // TB) * weight_bytes
                      + B_pad * _OUT_PAD * 4)

    out = pl.pallas_call(
        _disc_kernel,
        out_shape=jax.ShapeDtypeStruct((B_pad, _OUT_PAD), jnp.float32),
        grid_spec=pltpu.PrefetchScalarGridSpec(
            num_scalar_prefetch=0,
            grid=grid,
            in_specs=[
                pl.BlockSpec((TB, d_in), lambda i: (i, 0)),      # x tile
                pl.BlockSpec((d_in, h1), lambda i: (0, 0)),      # W1 (resident)
                pl.BlockSpec((1, h1), lambda i: (0, 0)),         # b1
                pl.BlockSpec((h1, h2), lambda i: (0, 0)),        # W2
                pl.BlockSpec((1, h2), lambda i: (0, 0)),         # b2
                pl.BlockSpec((h2, h3), lambda i: (0, 0)),        # W3
                pl.BlockSpec((1, h3), lambda i: (0, 0)),         # b3
                pl.BlockSpec((h3, _OUT_PAD), lambda i: (0, 0)),  # W4 (padded)
                pl.BlockSpec((1, _OUT_PAD), lambda i: (0, 0)),   # b4 (padded)
            ],
            out_specs=pl.BlockSpec((TB, _OUT_PAD), lambda i: (i, 0)),
        ),
        compiler_params=pltpu.CompilerParams(
            dimension_semantics=("parallel",),
            vmem_limit_bytes=vmem_limit,
        ),
        cost_estimate=pl.CostEstimate(
            flops=flops,
            transcendentals=2 * B_pad * _OUT_PAD,   # exp + approx reciprocal
            bytes_accessed=bytes_accessed,
        ),
    )(x, w1, b1r, w2, b2r, w3, b3r, w4p, b4p)

    return out[:B, :1]


if __name__ == "__main__":
    key = jax.random.PRNGKey(0)
    keys = jax.random.split(key, 9)

    image_size, input_channel, batch = 32, 1, 2
    d_in = input_channel * image_size * image_size  # 1024

    def init_linear(kw, kb, fan_in, fan_out):
        bound = 1.0 / float(jnp.sqrt(jnp.float32(fan_in)))
        w = jax.random.uniform(kw, (fan_in, fan_out), jnp.float32, -bound, bound)
        b = jax.random.uniform(kb, (fan_out,), jnp.float32, -bound, bound)
        return w, b

    params_f32 = [
        init_linear(keys[0], keys[1], d_in, 1024),
        init_linear(keys[2], keys[3], 1024, 512),
        init_linear(keys[4], keys[5], 512, 256),
        init_linear(keys[6], keys[7], 256, 1),
    ]
    # Store the params persistently in bf16 (as a training loop would) so the
    # kernel DMAs half the weight bytes and the in-kernel bf16 cast is a no-op.
    params_bf16 = [(w.astype(jnp.bfloat16), b.astype(jnp.bfloat16))
                   for (w, b) in params_f32]

    img = jax.random.normal(
        keys[8], (batch, input_channel, image_size, image_size), jnp.float32)

    out = discriminator_forward(img, params_bf16)
    out = jax.block_until_ready(out)

    # Pure-JAX f32 reference mirroring the PyTorch module's forward.
    def ref_forward(img, params):
        h = img.reshape(img.shape[0], -1)
        for w, b in params[:-1]:
            h = h @ w + b
            h = jnp.where(h >= 0, h, _NEG_SLOPE * h)
        w, b = params[-1]
        return jax.nn.sigmoid(h @ w + b)

    ref = ref_forward(img, params_f32)
    assert out.shape == (batch, 1), out.shape
    # bf16 MXU operands -> compare against the f32 reference at bf16 tolerance.
    assert jnp.allclose(out, ref, rtol=2e-2, atol=2e-2), (out, ref)

    print("KERNEL_OK")
</pallas_src>

<mosaic_0001>
module attributes {stable_mosaic.version = 11 : i64} {
  func.func @_disc_kernel(%arg0: i32, %arg1: memref<8x1024xf32, #tpu.memory_space<vmem>>, %arg2: memref<1024x1024xbf16, #tpu.memory_space<vmem>>, %arg3: memref<1x1024xbf16, #tpu.memory_space<vmem>>, %arg4: memref<1024x512xbf16, #tpu.memory_space<vmem>>, %arg5: memref<1x512xbf16, #tpu.memory_space<vmem>>, %arg6: memref<512x256xbf16, #tpu.memory_space<vmem>>, %arg7: memref<1x256xbf16, #tpu.memory_space<vmem>>, %arg8: memref<256x128xbf16, #tpu.memory_space<vmem>>, %arg9: memref<1x128xbf16, #tpu.memory_space<vmem>>, %arg10: memref<8x128xf32, #tpu.memory_space<vmem>>) attributes {dimension_semantics = [#tpu.dimension_semantics<parallel>], iteration_bounds = array<i64: 1>, scalar_prefetch = 0 : i64, scratch_operands = 0 : i64, tpu.core_type = #tpu.core_type<tc>, window_params = [{transform_indices = @transform_0, window_bounds = array<i64: 8, 1024>}, {pipeline_mode = #tpu.pipeline_mode<synchronous>, transform_indices = @transform_1, window_bounds = array<i64: 1024, 1024>}, {pipeline_mode = #tpu.pipeline_mode<synchronous>, transform_indices = @transform_2, window_bounds = array<i64: 1, 1024>}, {pipeline_mode = #tpu.pipeline_mode<synchronous>, transform_indices = @transform_3, window_bounds = array<i64: 1024, 512>}, {pipeline_mode = #tpu.pipeline_mode<synchronous>, transform_indices = @transform_4, window_bounds = array<i64: 1, 512>}, {pipeline_mode = #tpu.pipeline_mode<synchronous>, transform_indices = @transform_5, window_bounds = array<i64: 512, 256>}, {pipeline_mode = #tpu.pipeline_mode<synchronous>, transform_indices = @transform_6, window_bounds = array<i64: 1, 256>}, {pipeline_mode = #tpu.pipeline_mode<synchronous>, transform_indices = @transform_7, window_bounds = array<i64: 256, 128>}, {pipeline_mode = #tpu.pipeline_mode<synchronous>, transform_indices = @transform_8, window_bounds = array<i64: 1, 128>}, {transform_indices = @transform_9, window_bounds = array<i64: 8, 128>}]} {
    %c0 = arith.constant 0 : index
    %c0_0 = arith.constant 0 : index
    %0 = vector.load %arg1[%c0, %c0_0] : memref<8x1024xf32, #tpu.memory_space<vmem>>, vector<8x1024xf32>
    %1 = arith.truncf %0 : vector<8x1024xf32> to vector<8x1024xbf16>
    %c0_1 = arith.constant 0 : index
    %c0_2 = arith.constant 0 : index
    %2 = vector.load %arg2[%c0_1, %c0_2] : memref<1024x1024xbf16, #tpu.memory_space<vmem>>, vector<1024x1024xbf16>
    %cst = arith.constant dense<0.000000e+00> : vector<8x1024xf32>
    %3 = tpu.matmul %1, %2, %cst {dimension_numbers = #tpu.dot_dimension_numbers<[1], [0], [0], [1], [0, 0, 1, 1], [], []>} : vector<8x1024xbf16>, vector<1024x1024xbf16>, vector<8x1024xf32> -> vector<8x1024xf32>
    %c0_3 = arith.constant 0 : index
    %c0_4 = arith.constant 0 : index
    %4 = vector.load %arg3[%c0_3, %c0_4] : memref<1x1024xbf16, #tpu.memory_space<vmem>>, vector<1x1024xbf16>
    %5 = arith.extf %4 : vector<1x1024xbf16> to vector<1x1024xf32>
    %6 = vector.broadcast %5 : vector<1x1024xf32> to vector<8x1024xf32>
    %7 = arith.addf %3, %6 : vector<8x1024xf32>
    %cst_5 = arith.constant 0.000000e+00 : f32
    %8 = vector.broadcast %cst_5 : f32 to vector<8x1024xf32>
    %9 = arith.cmpf oge, %7, %8 : vector<8x1024xf32>
    %cst_6 = arith.constant 2.000000e-01 : f32
    %10 = vector.broadcast %cst_6 : f32 to vector<8x1024xf32>
    %11 = arith.mulf %10, %7 : vector<8x1024xf32>
    %12 = arith.select %9, %7, %11 : vector<8x1024xi1>, vector<8x1024xf32>
    %13 = arith.truncf %12 : vector<8x1024xf32> to vector<8x1024xbf16>
    %c0_7 = arith.constant 0 : index
    %c0_8 = arith.constant 0 : index
    %14 = vector.load %arg4[%c0_7, %c0_8] : memref<1024x512xbf16, #tpu.memory_space<vmem>>, vector<1024x512xbf16>
    %cst_9 = arith.constant dense<0.000000e+00> : vector<8x512xf32>
    %15 = tpu.matmul %13, %14, %cst_9 {dimension_numbers = #tpu.dot_dimension_numbers<[1], [0], [0], [1], [0, 0, 1, 1], [], []>} : vector<8x1024xbf16>, vector<1024x512xbf16>, vector<8x512xf32> -> vector<8x512xf32>
    %c0_10 = arith.constant 0 : index
    %c0_11 = arith.constant 0 : index
    %16 = vector.load %arg5[%c0_10, %c0_11] : memref<1x512xbf16, #tpu.memory_space<vmem>>, vector<1x512xbf16>
    %17 = arith.extf %16 : vector<1x512xbf16> to vector<1x512xf32>
    %18 = vector.broadcast %17 : vector<1x512xf32> to vector<8x512xf32>
    %19 = arith.addf %15, %18 : vector<8x512xf32>
    %cst_12 = arith.constant 0.000000e+00 : f32
    %20 = vector.broadcast %cst_12 : f32 to vector<8x512xf32>
    %21 = arith.cmpf oge, %19, %20 : vector<8x512xf32>
    %cst_13 = arith.constant 2.000000e-01 : f32
    %22 = vector.broadcast %cst_13 : f32 to vector<8x512xf32>
    %23 = arith.mulf %22, %19 : vector<8x512xf32>
    %24 = arith.select %21, %19, %23 : vector<8x512xi1>, vector<8x512xf32>
    %25 = arith.truncf %24 : vector<8x512xf32> to vector<8x512xbf16>
    %c0_14 = arith.constant 0 : index
    %c0_15 = arith.constant 0 : index
    %26 = vector.load %arg6[%c0_14, %c0_15] : memref<512x256xbf16, #tpu.memory_space<vmem>>, vector<512x256xbf16>
    %cst_16 = arith.constant dense<0.000000e+00> : vector<8x256xf32>
    %27 = tpu.matmul %25, %26, %cst_16 {dimension_numbers = #tpu.dot_dimension_numbers<[1], [0], [0], [1], [0, 0, 1, 1], [], []>} : vector<8x512xbf16>, vector<512x256xbf16>, vector<8x256xf32> -> vector<8x256xf32>
    %c0_17 = arith.constant 0 : index
    %c0_18 = arith.constant 0 : index
    %28 = vector.load %arg7[%c0_17, %c0_18] : memref<1x256xbf16, #tpu.memory_space<vmem>>, vector<1x256xbf16>
    %29 = arith.extf %28 : vector<1x256xbf16> to vector<1x256xf32>
    %30 = vector.broadcast %29 : vector<1x256xf32> to vector<8x256xf32>
    %31 = arith.addf %27, %30 : vector<8x256xf32>
    %cst_19 = arith.constant 0.000000e+00 : f32
    %32 = vector.broadcast %cst_19 : f32 to vector<8x256xf32>
    %33 = arith.cmpf oge, %31, %32 : vector<8x256xf32>
    %cst_20 = arith.constant 2.000000e-01 : f32
    %34 = vector.broadcast %cst_20 : f32 to vector<8x256xf32>
    %35 = arith.mulf %34, %31 : vector<8x256xf32>
    %36 = arith.select %33, %31, %35 : vector<8x256xi1>, vector<8x256xf32>
    %37 = arith.truncf %36 : vector<8x256xf32> to vector<8x256xbf16>
    %c0_21 = arith.constant 0 : index
    %c0_22 = arith.constant 0 : index
    %38 = vector.load %arg8[%c0_21, %c0_22] : memref<256x128xbf16, #tpu.memory_space<vmem>>, vector<256x128xbf16>
    %cst_23 = arith.constant dense<0.000000e+00> : vector<8x128xf32>
    %39 = tpu.matmul %37, %38, %cst_23 {dimension_numbers = #tpu.dot_dimension_numbers<[1], [0], [0], [1], [0, 0, 1, 1], [], []>} : vector<8x256xbf16>, vector<256x128xbf16>, vector<8x128xf32> -> vector<8x128xf32>
    %c0_24 = arith.constant 0 : index
    %c0_25 = arith.constant 0 : index
    %40 = vector.load %arg9[%c0_24, %c0_25] : memref<1x128xbf16, #tpu.memory_space<vmem>>, vector<1x128xbf16>
    %41 = arith.extf %40 : vector<1x128xbf16> to vector<1x128xf32>
    %42 = vector.broadcast %41 : vector<1x128xf32> to vector<8x128xf32>
    %43 = arith.addf %39, %42 : vector<8x128xf32>
    %cst_26 = arith.constant 0.000000e+00 : f32
    %44 = vector.broadcast %cst_26 : f32 to vector<8x128xf32>
    %45 = arith.subf %44, %43 : vector<8x128xf32>
    %46 = math.exp %45 : vector<8x128xf32>
    %cst_27 = arith.constant 1.000000e+00 : f32
    %47 = vector.broadcast %cst_27 : f32 to vector<8x128xf32>
    %48 = arith.addf %47, %46 : vector<8x128xf32>
    %49 = tpu.reciprocal %48 {approx = true} : vector<8x128xf32> -> vector<8x128xf32>
    %c0_28 = arith.constant 0 : index
    %c0_29 = arith.constant 0 : index
    %50 = vector.load %arg10[%c0_28, %c0_29] : memref<8x128xf32, #tpu.memory_space<vmem>>, vector<8x128xf32>
    tpu.vector_store %arg10[%c0_28, %c0_29], %49 {strides = array<i32>} : memref<8x128xf32, #tpu.memory_space<vmem>>, vector<8x128xf32>,
    return
  }
  func.func @transform_0(%arg0: i32) -> (i32, i32) {
    %c0_i32 = arith.constant 0 : i32
    %c0_i32_0 = arith.constant 0 : i32
    return %arg0, %c0_i32 : i32, i32
  }
  func.func @transform_1(%arg0: i32) -> (i32, i32) {
    %c0_i32 = arith.constant 0 : i32
    %c0_i32_0 = arith.constant 0 : i32
    %c0_i32_1 = arith.constant 0 : i32
    return %c0_i32, %c0_i32_0 : i32, i32
  }
  func.func @transform_2(%arg0: i32) -> (i32, i32) {
    %c0_i32 = arith.constant 0 : i32
    %c0_i32_0 = arith.constant 0 : i32
    %c0_i32_1 = arith.constant 0 : i32
    return %c0_i32, %c0_i32_0 : i32, i32
  }
  func.func @transform_3(%arg0: i32) -> (i32, i32) {
    %c0_i32 = arith.constant 0 : i32
    %c0_i32_0 = arith.constant 0 : i32
    %c0_i32_1 = arith.constant 0 : i32
    return %c0_i32, %c0_i32_0 : i32, i32
  }
  func.func @transform_4(%arg0: i32) -> (i32, i32) {
    %c0_i32 = arith.constant 0 : i32
    %c0_i32_0 = arith.constant 0 : i32
    %c0_i32_1 = arith.constant 0 : i32
    return %c0_i32, %c0_i32_0 : i32, i32
  }
  func.func @transform_5(%arg0: i32) -> (i32, i32) {
    %c0_i32 = arith.constant 0 : i32
    %c0_i32_0 = arith.constant 0 : i32
    %c0_i32_1 = arith.constant 0 : i32
    return %c0_i32, %c0_i32_0 : i32, i32
  }
  func.func @transform_6(%arg0: i32) -> (i32, i32) {
    %c0_i32 = arith.constant 0 : i32
    %c0_i32_0 = arith.constant 0 : i32
    %c0_i32_1 = arith.constant 0 : i32
    return %c0_i32, %c0_i32_0 : i32, i32
  }
  func.func @transform_7(%arg0: i32) -> (i32, i32) {
    %c0_i32 = arith.constant 0 : i32
    %c0_i32_0 = arith.constant 0 : i32
    %c0_i32_1 = arith.constant 0 : i32
    return %c0_i32, %c0_i32_0 : i32, i32
  }
  func.func @transform_8(%arg0: i32) -> (i32, i32) {
    %c0_i32 = arith.constant 0 : i32
    %c0_i32_0 = arith.constant 0 : i32
    %c0_i32_1 = arith.constant 0 : i32
    return %c0_i32, %c0_i32_0 : i32, i32
  }
  func.func @transform_9(%arg0: i32) -> (i32, i32) {
    %c0_i32 = arith.constant 0 : i32
    %c0_i32_0 = arith.constant 0 : i32
    return %arg0, %c0_i32 : i32, i32
  }
}

</mosaic_0001>

<bundles_post_ra>
// kernel: tpu_custom_call.1
= control target key start
LH: loop header
LB: loop body
LE: loop exit
PB: predicated region body
PF: predicated region fallthrough
CT: control target
= control target key end

     0   :  { %14 = vsyncpa [#allocation3], 0  ;;  %s8665_s0 = inlined_call_operand.hbm [shape: f32[8,1024], index: 0, kind: input, shape index: {}]   ;;  %s8666_s1 = inlined_call_operand.hbm [shape: bf16[1024,1024], index: 1, kind: input, shape index: {}]   ;;  %s8667_s2 = inlined_call_operand.hbm [shape: bf16[1,1024], index: 2, kind: input, shape index: {}]   ;;  %s8668_s3 = inlined_call_operand.hbm [shape: bf16[1024,512], index: 3, kind: input, shape index: {}]   ;;  %s8669_s4 = inlined_call_operand.hbm [shape: bf16[1,512], index: 4, kind: input, shape index: {}]   ;;  %s8670_s5 = inlined_call_operand.hbm [shape: bf16[512,256], index: 5, kind: input, shape index: {}]   ;;  %s8671_s6 = inlined_call_operand.hbm [shape: bf16[1,256], index: 6, kind: input, shape index: {}]   ;;  %s8672_s7 = inlined_call_operand.hbm [shape: bf16[256,128], index: 7, kind: input, shape index: {}]   ;;  %s8673_s8 = inlined_call_operand.hbm [shape: bf16[1,128], index: 8, kind: input, shape index: {}]   ;;  %s8674_s9 = inlined_call_operand.hbm [shape: f32[8,128], index: 9, kind: output, shape index: {}]  }
   0x1   :  { %15 = vsyncpa [#allocation6], 0 }
   0x2   :  { %16 = vsyncpa [#allocation9], 0 }
   0x3   :  { %17 = vsyncpa [#allocation12], 0 }
   0x4   :  { %18 = vsyncpa [#allocation15], 0 }
   0x5   :  { %19 = vsyncpa [#allocation4], 0  ;;  %s8321_s30 = smov [#allocation5]   ;;  %s8089_s13 = scalar_lea.hbm %s8666_s1, 65536 }
   0x6   :  { %s35_s10 = sshll.u32 %s8321_s30, 4  ;;  %p8090_p0 = scmp.ne.s32.totalorder %s8666_s1, %s8089_s13  ;;  %s36_s10 = int_to_ptr.vmem [resolvable:$true] %s35_s10 }
   0x7   :  { %p8093_p1 = scmp.lt.u32.totalorder %s8089_s13, %s8666_s1 }
   0x9   :  { %p8095_p2 = pnand %p8093_p1, %p8090_p0 }
   0xb   :  { %8098 = shalt.err (!%p8095_p2)
}
   0xc   :  { %s8099_s18 = scalar_lea.vmem %s36_s10, 65536  ;;  %p8104_p4 = scmp.lt.s32.totalorder %s36_s10, %s36_s10 }
   0xd   :  { %p8100_p3 = scmp.ne.s32.totalorder %s36_s10, %s8099_s18  ;;  %p8105_p5 = scmp.lt.s32.totalorder %s8099_s18, %s8099_s18 }
   0xf   :  { %p8106_p6 = por %p8105_p5, %p8104_p4 }
  0x11   :  { %p8107_p7 = pnand %p8106_p6, %p8100_p3 }
  0x13   :  { %8110 = shalt.err (!%p8107_p7)
}
  0x14   :  { %s8322_s19 = smov 512   ;;  %s8323_s20 = smov 32  }
  0x15   :  { %41 = dma.hbm_to_vmem [thread:$0]  %s8666_s1, 65536, %s36_s10, [#allocation6], %s8322_s19, %s8322_s19, %s8323_s20  }
  0x16   :  { %s8324_s23 = smov [#allocation8]   ;;  %s8111_s27 = scalar_lea.hbm %s8668_s3, 32768 }
  0x17   :  { %s57_s24 = sshll.u32 %s8324_s23, 4  ;;  %p8112_p8 = scmp.ne.s32.totalorder %s8668_s3, %s8111_s27  ;;  %s58_s24 = int_to_ptr.vmem [resolvable:$true] %s57_s24 }
  0x18   :  { %p8115_p9 = scmp.lt.u32.totalorder %s8111_s27, %s8668_s3 }
  0x1a   :  { %p8117_p10 = pnand %p8115_p9, %p8112_p8 }
  0x1c   :  { %8120 = shalt.err (!%p8117_p10)
}
  0x1d   :  { %s8121_s12 = scalar_lea.vmem %s58_s24, 32768  ;;  %p8126_p12 = scmp.lt.s32.totalorder %s58_s24, %s58_s24 }
  0x1e   :  { %p8122_p11 = scmp.ne.s32.totalorder %s58_s24, %s8121_s12  ;;  %p8127_p13 = scmp.lt.s32.totalorder %s8121_s12, %s8121_s12 }
  0x20   :  { %p8128_p0 = por %p8127_p13, %p8126_p12 }
  0x22   :  { %p8129_p1 = pnand %p8128_p0, %p8122_p11 }
  0x24   :  { %8132 = shalt.err (!%p8129_p1)
}
  0x25   :  { %s8325_s1 = smov 256   ;;  %s8326_s10 = smov 16  }
  0x26   :  { %63 = dma.hbm_to_vmem [thread:$0]  %s8668_s3, 32768, %s58_s24, [#allocation9], %s8325_s1, %s8325_s1, %s8326_s10  }
  0x27   :  { %s8327_s15 = smov [#allocation11]   ;;  %s8133_s19 = scalar_lea.hbm %s8670_s5, 8192 }
  0x28   :  { %s79_s16 = sshll.u32 %s8327_s15, 4  ;;  %p8134_p2 = scmp.ne.s32.totalorder %s8670_s5, %s8133_s19  ;;  %s80_s16 = int_to_ptr.vmem [resolvable:$true] %s79_s16 }
  0x29   :  { %p8137_p3 = scmp.lt.u32.totalorder %s8133_s19, %s8670_s5 }
  0x2b   :  { %p8139_p4 = pnand %p8137_p3, %p8134_p2 }
  0x2d   :  { %8142 = shalt.err (!%p8139_p4)
}
  0x2e   :  { %s8143_s25 = scalar_lea.vmem %s80_s16, 8192  ;;  %p8148_p6 = scmp.lt.s32.totalorder %s80_s16, %s80_s16 }
  0x2f   :  { %p8144_p5 = scmp.ne.s32.totalorder %s80_s16, %s8143_s25  ;;  %p8149_p7 = scmp.lt.s32.totalorder %s8143_s25, %s8143_s25 }
  0x31   :  { %p8150_p8 = por %p8149_p7, %p8148_p6 }
  0x33   :  { %p8151_p9 = pnand %p8150_p8, %p8144_p5 }
  0x35   :  { %8154 = shalt.err (!%p8151_p9)
}
  0x36   :  { %s8328_s3 = smov 128   ;;  %s8329_s24 = smov 8  }
  0x37   :  { %85 = dma.hbm_to_vmem [thread:$0]  %s8670_s5, 8192, %s80_s16, [#allocation12], %s8328_s3, %s8328_s3, %s8329_s24  }
  0x38   :  { %s8330_s28 = smov [#allocation14]   ;;  %s8155_s12 = scalar_lea.hbm %s8672_s7, 2048 }
  0x39   :  { %s101_s29 = sshll.u32 %s8330_s28, 4  ;;  %p8156_p10 = scmp.ne.s32.totalorder %s8672_s7, %s8155_s12  ;;  %s102_s29 = int_to_ptr.vmem [resolvable:$true] %s101_s29 }
  0x3a   :  { %p8159_p11 = scmp.lt.u32.totalorder %s8155_s12, %s8672_s7 }
  0x3c   :  { %p8161_p12 = pnand %p8159_p11, %p8156_p10 }
  0x3e   :  { %8164 = shalt.err (!%p8161_p12)
}
  0x3f   :  { %s8165_s15 = scalar_lea.vmem %s102_s29, 2048  ;;  %p8170_p0 = scmp.lt.s32.totalorder %s102_s29, %s102_s29 }
  0x40   :  { %p8166_p13 = scmp.ne.s32.totalorder %s102_s29, %s8165_s15  ;;  %p8171_p1 = scmp.lt.s32.totalorder %s8165_s15, %s8165_s15 }
  0x42   :  { %p8172_p2 = por %p8171_p1, %p8170_p0 }
  0x44   :  { %p8173_p3 = pnand %p8172_p2, %p8166_p13 }
  0x46   :  { %8176 = shalt.err (!%p8173_p3)
}
  0x47   :  { %s8331_s5 = smov 64   ;;  %s8332_s16 = smov 4  }
  0x48   :  { %107 = dma.hbm_to_vmem [thread:$0]  %s8672_s7, 2048, %s102_s29, [#allocation15], %s8331_s5, %s8331_s5, %s8332_s16  }
  0x49   :  { %s8333_s19 = smov [#allocation2]   ;;  %s8334_s21 = smov [#allocation7]  }
  0x4a   :  { %s26_s20 = sshll.u32 %s8333_s19, 4  ;;  %s48_s22 = sshll.u32 %s8334_s21, 4  ;;  %s27_s20 = int_to_ptr.vmem [resolvable:$true] %s26_s20  ;;  %s49_s22 = int_to_ptr.vmem [resolvable:$true] %s48_s22 }
  0x4b   :  { %s8177_s3 = scalar_lea.hbm %s8665_s0, 1024 }
  0x4c   :  { %p8178_p4 = scmp.ne.s32.totalorder %s8665_s0, %s8177_s3  ;;  %p8181_p5 = scmp.lt.u32.totalorder %s8177_s3, %s8665_s0 }
  0x4e   :  { %p8183_p6 = pnand %p8181_p5, %p8178_p4 }
  0x50   :  { %8186 = shalt.err (!%p8183_p6)
}
  0x51   :  { %s8187_s7 = scalar_lea.vmem %s27_s20, 1024  ;;  %p8192_p8 = scmp.lt.s32.totalorder %s27_s20, %s27_s20 }
  0x52   :  { %p8188_p7 = scmp.ne.s32.totalorder %s27_s20, %s8187_s7  ;;  %p8193_p9 = scmp.lt.s32.totalorder %s8187_s7, %s8187_s7 }
  0x54   :  { %p8194_p10 = por %p8193_p9, %p8192_p8 }
  0x56   :  { %p8195_p11 = pnand %p8194_p10, %p8188_p7 }
  0x58   :  { %8198 = shalt.err (!%p8195_p11)
}
  0x59   :  { %29 = dma.hbm_to_vmem [thread:$0]  %s8665_s0, 1024, %s27_s20, [#allocation3]  }
  0x5a   :  { %s8199_s1 = scalar_lea.hbm %s8667_s2, 128 }
  0x5b   :  { %p8200_p12 = scmp.ne.s32.totalorder %s8667_s2, %s8199_s1  ;;  %p8203_p13 = scmp.lt.u32.totalorder %s8199_s1, %s8667_s2 }
  0x5d   :  { %p8205_p0 = pnand %p8203_p13, %p8200_p12 }
  0x5f   :  { %8208 = shalt.err (!%p8205_p0)
}
  0x60   :  { %s8209_s5 = scalar_lea.vmem %s49_s22, 128  ;;  %p8214_p2 = scmp.lt.s32.totalorder %s49_s22, %s49_s22 }
  0x61   :  { %p8210_p1 = scmp.ne.s32.totalorder %s49_s22, %s8209_s5  ;;  %p8215_p3 = scmp.lt.s32.totalorder %s8209_s5, %s8209_s5 }
  0x63   :  { %p8216_p4 = por %p8215_p3, %p8214_p2 }
  0x65   :  { %p8217_p5 = pnand %p8216_p4, %p8210_p1 }
  0x67   :  { %8220 = shalt.err (!%p8217_p5)
}
  0x68   :  { %51 = dma.hbm_to_vmem [thread:$0]  %s8667_s2, 128, %s49_s22, [#allocation6]  }
  0x69   :  { %s8335_s17 = smov [#allocation10]   ;;  %s8336_s19 = smov [#allocation13]  }
  0x6a   :  { %s70_s18 = sshll.u32 %s8335_s17, 4  ;;  %s92_s20 = sshll.u32 %s8336_s19, 4  ;;  %s71_s18 = int_to_ptr.vmem [resolvable:$true] %s70_s18  ;;  %s93_s20 = int_to_ptr.vmem [resolvable:$true] %s92_s20 }
  0x6b   :  { %s8221_s25 = scalar_lea.hbm %s8669_s4, 64 }
  0x6c   :  { %p8222_p6 = scmp.ne.s32.totalorder %s8669_s4, %s8221_s25  ;;  %p8225_p7 = scmp.lt.u32.totalorder %s8221_s25, %s8669_s4 }
  0x6e   :  { %p8227_p8 = pnand %p8225_p7, %p8222_p6 }
  0x70   :  { %8230 = shalt.err (!%p8227_p8)
}
  0x71   :  { %s8231_s2 = scalar_lea.vmem %s71_s18, 64  ;;  %p8236_p10 = scmp.lt.s32.totalorder %s71_s18, %s71_s18 }
  0x72   :  { %p8232_p9 = scmp.ne.s32.totalorder %s71_s18, %s8231_s2  ;;  %p8237_p11 = scmp.lt.s32.totalorder %s8231_s2, %s8231_s2 }
  0x74   :  { %p8238_p12 = por %p8237_p11, %p8236_p10 }
  0x76   :  { %p8239_p13 = pnand %p8238_p12, %p8232_p9 }
  0x78   :  { %8242 = shalt.err (!%p8239_p13)
}
  0x79   :  { %73 = dma.hbm_to_vmem [thread:$0]  %s8669_s4, 64, %s71_s18, [#allocation9]  }
  0x7a   :  { %s8243_s30 = scalar_lea.hbm %s8671_s6, 32 }
  0x7b   :  { %p8244_p0 = scmp.ne.s32.totalorder %s8671_s6, %s8243_s30  ;;  %p8247_p1 = scmp.lt.u32.totalorder %s8243_s30, %s8671_s6 }
  0x7d   :  { %p8249_p2 = pnand %p8247_p1, %p8244_p0 }
  0x7f   :  { %8252 = shalt.err (!%p8249_p2)
}
  0x80   :  { %s8253_s13 = scalar_lea.vmem %s93_s20, 32  ;;  %p8258_p4 = scmp.lt.s32.totalorder %s93_s20, %s93_s20 }
  0x81   :  { %p8254_p3 = scmp.ne.s32.totalorder %s93_s20, %s8253_s13  ;;  %p8259_p5 = scmp.lt.s32.totalorder %s8253_s13, %s8253_s13 }
  0x83   :  { %p8260_p6 = por %p8259_p5, %p8258_p4 }
  0x85   :  { %p8261_p7 = pnand %p8260_p6, %p8254_p3 }
  0x87   :  { %8264 = shalt.err (!%p8261_p7)
}
  0x88   :  { %95 = dma.hbm_to_vmem [thread:$0]  %s8671_s6, 32, %s93_s20, [#allocation12]  }
  0x89   :  { %s8337_s15 = smov [#allocation16]   ;;  %s8265_s17 = scalar_lea.hbm %s8673_s8, 16 }
  0x8a   :  { %s114_s5 = sshll.u32 %s8337_s15, 4  ;;  %p8266_p8 = scmp.ne.s32.totalorder %s8673_s8, %s8265_s17  ;;  %s115_s5 = int_to_ptr.vmem [resolvable:$true] %s114_s5 }
  0x8b   :  { %p8269_p9 = scmp.lt.u32.totalorder %s8265_s17, %s8673_s8 }
  0x8d   :  { %p8271_p10 = pnand %p8269_p9, %p8266_p8 }
  0x8f   :  { %8274 = shalt.err (!%p8271_p10)
}
  0x90   :  { %s8275_s25 = scalar_lea.vmem %s115_s5, 16  ;;  %s8279_s6 = scalar_lea.vmem %s115_s5, 32 }
  0x91   :  { %p8276_p11 = scmp.ne.s32.totalorder %s115_s5, %s8275_s25  ;;  %p8280_p12 = scmp.lt.s32.totalorder %s115_s5, %s115_s5 }
  0x92   :  { %p8281_p13 = scmp.lt.s32.totalorder %s8279_s6, %s8275_s25 }
  0x94   :  { %p8282_p0 = por %p8281_p13, %p8280_p12 }
  0x96   :  { %p8283_p1 = pnand %p8282_p0, %p8276_p11 }
  0x98   :  { %8286 = shalt.err (!%p8283_p1)
}
  0x99   :  { %117 = dma.hbm_to_vmem [thread:$0]  %s8673_s8, 16, %s115_s5, [#allocation15]  }
  0x9a   :  { %8309 = dma.done.wait [#allocation3], 1024  }
  0x9b   :  { %8310 = vsyncadd [#allocation3], 4294966272 }
  0x9c   :  { %8311 = dma.done.wait [#allocation6], 65664  }
  0x9d   :  { %8312 = vsyncadd [#allocation6], 4294901632 }
  0x9e   :  { %8313 = dma.done.wait [#allocation9], 32832  }
  0x9f   :  { %8314 = vsyncadd [#allocation9], 4294934464 }
  0xa0   :  { %8315 = dma.done.wait [#allocation12], 8224  }
  0xa1   :  { %8316 = vsyncadd [#allocation12], 4294959072 }
  0xa2   :  { %8317 = dma.done.wait [#allocation15], 2064  }
  0xa3   :  { %8318 = vsyncadd [#allocation15], 4294965232  ;;  %v162_v0 = vld [vmem:[#allocation5] sm:$0xff]  ;;  %v147_v53 = vld [vmem:[#allocation2 + $0x8] sm:$0xff]  ;;  %s8338_s8 = smov [#allocation17]  }
  0xa4   :  { %v166_v1 = vld [vmem:[#allocation5 + $0x20] sm:$0xff]  ;;  %v8497_v57 = vpack.c.bf16 %v147_v53, %v147_v53  ;;  %v149_v58 = vld [vmem:[#allocation2 + $0x18] sm:$0xff]  ;;  %s6599_s24 = sshll.u32 %s8338_s8, 4  ;;  %s6600_s24 = int_to_ptr.vmem [resolvable:$true] %s6599_s24 }
  0xa5   :  { %v290_v2 = vld [vmem:[#allocation5 + $0x400] sm:$0xff]  ;;  %v6613_v3 = vcombine.high %v162_v0, %v166_v1  ;;  %v6612_v5 = vcombine.low %v162_v0, %v166_v1  ;;  %v8499_v61 = vpack.c.bf16 %v149_v58, %v149_v58  ;;  %s8287_s26 = scalar_lea.vmem %s6600_s24, 128  ;;  %p8292_p3 = scmp.lt.s32.totalorder %s6600_s24, %s6600_s24 }
  0xa6   :  { %v294_v4 = vld [vmem:[#allocation5 + $0x420] sm:$0xff]  ;;  %3343 = vmatprep.mubr.bf16.mxu1 %v8497_v57  ;;  %p8288_p2 = scmp.ne.s32.totalorder %s6600_s24, %s8287_s26  ;;  %p8293_p4 = scmp.lt.s32.totalorder %s8287_s26, %s8287_s26 }
  0xa7   :  { %v170_v6 = vld [vmem:[#allocation5 + $0x40] sm:$0xff]  ;;  %v6741_v8 = vcombine.high %v290_v2, %v294_v4  ;;  %v6740_v9 = vcombine.low %v290_v2, %v294_v4  ;;  %3311 = vmatprep.subr.bf16.mxu1 %v6613_v3  ;;  %3384 = vmatprep.mubr.bf16.mxu0 %v8499_v61 }
  0xa8   :  { %v174_v7 = vld [vmem:[#allocation5 + $0x60] sm:$0xff]  ;;  %3312 = vmatpush1.bf16.msra.mxu1 %v6612_v5  ;;  %p8294_p5 = por %p8293_p4, %p8292_p3 }
  0xa9   :  { %v6621_v10 = vcombine.high %v170_v6, %v174_v7  ;;  %v298_v11 = vld [vmem:[#allocation5 + $0x440] sm:$0xff]  ;;  %3352 = vmatprep.subr.bf16.mxu0 %v6741_v8  ;;  %v6620_v18 = vcombine.low %v170_v6, %v174_v7 }
  0xaa   :  { %v302_v12 = vld [vmem:[#allocation5 + $0x460] sm:$0xff]  ;;  %3353 = vmatpush1.bf16.msra.mxu0 %v6740_v9  ;;  %p8295_p6 = pnand %p8294_p5, %p8288_p2 }
  0xab   :  { %v178_v13 = vld [vmem:[#allocation5 + $0x80] sm:$0xff]  ;;  %v6749_v14 = vcombine.high %v298_v11, %v302_v12  ;;  %3313 = vmatprep.subr.bf16.mxu1 %v6621_v10  ;;  %v6748_v19 = vcombine.low %v298_v11, %v302_v12 }
  0xac   :  { %v182_v15 = vld [vmem:[#allocation5 + $0xa0] sm:$0xff]  ;;  %3314 = vmatpush1.bf16.msra.mxu1 %v6620_v18 }
  0xad   :  { %v306_v16 = vld [vmem:[#allocation5 + $0x480] sm:$0xff]  ;;  %v6629_v20 = vcombine.high %v178_v13, %v182_v15  ;;  %3354 = vmatprep.subr.bf16.mxu0 %v6749_v14  ;;  %v6628_v26 = vcombine.low %v178_v13, %v182_v15 }
  0xae   :  { %v310_v17 = vld [vmem:[#allocation5 + $0x4a0] sm:$0xff]  ;;  %3355 = vmatpush1.bf16.msra.mxu0 %v6748_v19 }
  0xaf   :  { %v6757_v21 = vcombine.high %v306_v16, %v310_v17  ;;  %v186_v22 = vld [vmem:[#allocation5 + $0xc0] sm:$0xff]  ;;  %3315 = vmatprep.subr.bf16.mxu1 %v6629_v20  ;;  %v6756_v27 = vcombine.low %v306_v16, %v310_v17 }
  0xb0   :  { %v190_v23 = vld [vmem:[#allocation5 + $0xe0] sm:$0xff]  ;;  %3316 = vmatpush1.bf16.msra.mxu1 %v6628_v26 }
  0xb1   :  { %v314_v24 = vld [vmem:[#allocation5 + $0x4c0] sm:$0xff]  ;;  %v6637_v28 = vcombine.high %v186_v22, %v190_v23  ;;  %3356 = vmatprep.subr.bf16.mxu0 %v6757_v21  ;;  %v6636_v34 = vcombine.low %v186_v22, %v190_v23 }
  0xb2   :  { %v318_v25 = vld [vmem:[#allocation5 + $0x4e0] sm:$0xff]  ;;  %3357 = vmatpush1.bf16.msra.mxu0 %v6756_v27 }
  0xb3   :  { %v6765_v29 = vcombine.high %v314_v24, %v318_v25  ;;  %v194_v30 = vld [vmem:[#allocation5 + $0x100] sm:$0xff]  ;;  %3317 = vmatprep.subr.bf16.mxu1 %v6637_v28  ;;  %v6764_v35 = vcombine.low %v314_v24, %v318_v25 }
  0xb4   :  { %v198_v31 = vld [vmem:[#allocation5 + $0x120] sm:$0xff]  ;;  %3318 = vmatpush1.bf16.msra.mxu1 %v6636_v34 }
  0xb5   :  { %v322_v32 = vld [vmem:[#allocation5 + $0x500] sm:$0xff]  ;;  %v6645_v36 = vcombine.high %v194_v30, %v198_v31  ;;  %3358 = vmatprep.subr.bf16.mxu0 %v6765_v29  ;;  %v6644_v42 = vcombine.low %v194_v30, %v198_v31 }
  0xb6   :  { %v326_v33 = vld [vmem:[#allocation5 + $0x520] sm:$0xff]  ;;  %3359 = vmatpush1.bf16.msra.mxu0 %v6764_v35 }
  0xb7   :  { %v6773_v37 = vcombine.high %v322_v32, %v326_v33  ;;  %v202_v38 = vld [vmem:[#allocation5 + $0x140] sm:$0xff]  ;;  %3319 = vmatprep.subr.bf16.mxu1 %v6645_v36  ;;  %v6772_v43 = vcombine.low %v322_v32, %v326_v33 }
  0xb8   :  { %v206_v39 = vld [vmem:[#allocation5 + $0x160] sm:$0xff]  ;;  %3320 = vmatpush1.bf16.msra.mxu1 %v6644_v42 }
  0xb9   :  { %v330_v40 = vld [vmem:[#allocation5 + $0x540] sm:$0xff]  ;;  %v6653_v44 = vcombine.high %v202_v38, %v206_v39  ;;  %3360 = vmatprep.subr.bf16.mxu0 %v6773_v37  ;;  %v6652_v50 = vcombine.low %v202_v38, %v206_v39 }
  0xba   :  { %v334_v41 = vld [vmem:[#allocation5 + $0x560] sm:$0xff]  ;;  %3361 = vmatpush1.bf16.msra.mxu0 %v6772_v43 }
  0xbb   :  { %v6781_v45 = vcombine.high %v330_v40, %v334_v41  ;;  %v210_v46 = vld [vmem:[#allocation5 + $0x180] sm:$0xff]  ;;  %3321 = vmatprep.subr.bf16.mxu1 %v6653_v44  ;;  %v6780_v51 = vcombine.low %v330_v40, %v334_v41 }
  0xbc   :  { %v214_v47 = vld [vmem:[#allocation5 + $0x1a0] sm:$0xff]  ;;  %3322 = vmatpush1.bf16.msra.mxu1 %v6652_v50 }
  0xbd   :  { %v338_v48 = vld [vmem:[#allocation5 + $0x580] sm:$0xff]  ;;  %v6661_v52 = vcombine.high %v210_v46, %v214_v47  ;;  %3362 = vmatprep.subr.bf16.mxu0 %v6781_v45  ;;  %v6660_v62 = vcombine.low %v210_v46, %v214_v47 }
  0xbe   :  { %v342_v49 = vld [vmem:[#allocation5 + $0x5a0] sm:$0xff]  ;;  %3363 = vmatpush1.bf16.msra.mxu0 %v6780_v51 }
  0xbf   :  { %v6789_v54 = vcombine.high %v338_v48, %v342_v49  ;;  %v218_v55 = vld [vmem:[#allocation5 + $0x1c0] sm:$0xff]  ;;  %3323 = vmatprep.subr.bf16.mxu1 %v6661_v52  ;;  %v6788_v63 = vcombine.low %v338_v48, %v342_v49 }
  0xc0   :  { %v222_v56 = vld [vmem:[#allocation5 + $0x1e0] sm:$0xff]  ;;  %3324 = vmatpush1.bf16.msra.mxu1 %v6660_v62 }
  0xc1   :  { %v346_v59 = vld [vmem:[#allocation5 + $0x5c0] sm:$0xff]  ;;  %v6669_v0 = vcombine.high %v218_v55, %v222_v56  ;;  %3364 = vmatprep.subr.bf16.mxu0 %v6789_v54  ;;  %v6668_v6 = vcombine.low %v218_v55, %v222_v56 }
  0xc2   :  { %v350_v60 = vld [vmem:[#allocation5 + $0x5e0] sm:$0xff]  ;;  %3365 = vmatpush1.bf16.msra.mxu0 %v6788_v63 }
  0xc3   :  { %v6797_v1 = vcombine.high %v346_v59, %v350_v60  ;;  %v226_v2 = vld [vmem:[#allocation5 + $0x200] sm:$0xff]  ;;  %3325 = vmatprep.subr.bf16.mxu1 %v6669_v0  ;;  %v6796_v7 = vcombine.low %v346_v59, %v350_v60 }
  0xc4   :  { %v230_v3 = vld [vmem:[#allocation5 + $0x220] sm:$0xff]  ;;  %3326 = vmatpush1.bf16.msra.mxu1 %v6668_v6 }
  0xc5   :  { %v354_v4 = vld [vmem:[#allocation5 + $0x600] sm:$0xff]  ;;  %v6677_v8 = vcombine.high %v226_v2, %v230_v3  ;;  %3366 = vmatprep.subr.bf16.mxu0 %v6797_v1  ;;  %v6676_v14 = vcombine.low %v226_v2, %v230_v3 }
  0xc6   :  { %v358_v5 = vld [vmem:[#allocation5 + $0x620] sm:$0xff]  ;;  %3367 = vmatpush1.bf16.msra.mxu0 %v6796_v7 }
  0xc7   :  { %v6805_v9 = vcombine.high %v354_v4, %v358_v5  ;;  %v234_v10 = vld [vmem:[#allocation5 + $0x240] sm:$0xff]  ;;  %3327 = vmatprep.subr.bf16.mxu1 %v6677_v8  ;;  %v6804_v15 = vcombine.low %v354_v4, %v358_v5  ;;  %v163_v4 = vld [vmem:[#allocation5 + $0x8] sm:$0xff] }
  0xc8   :  { %v238_v11 = vld [vmem:[#allocation5 + $0x260] sm:$0xff]  ;;  %3328 = vmatpush1.bf16.msra.mxu1 %v6676_v14  ;;  %v167_v5 = vld [vmem:[#allocation5 + $0x28] sm:$0xff] }
  0xc9   :  { %v362_v12 = vld [vmem:[#allocation5 + $0x640] sm:$0xff]  ;;  %v6685_v16 = vcombine.high %v234_v10, %v238_v11  ;;  %3368 = vmatprep.subr.bf16.mxu0 %v6805_v9  ;;  %v6684_v22 = vcombine.low %v234_v10, %v238_v11  ;;  %v6615_v11 = vcombine.high %v163_v4, %v167_v5  ;;  %v171_v14 = vld [vmem:[#allocation5 + $0x48] sm:$0xff] }
  0xca   :  { %v366_v13 = vld [vmem:[#allocation5 + $0x660] sm:$0xff]  ;;  %3369 = vmatpush1.bf16.msra.mxu0 %v6804_v15  ;;  %v175_v15 = vld [vmem:[#allocation5 + $0x68] sm:$0xff] }
  0xcb   :  { %v6813_v17 = vcombine.high %v362_v12, %v366_v13  ;;  %v242_v18 = vld [vmem:[#allocation5 + $0x280] sm:$0xff]  ;;  %3329 = vmatprep.subr.bf16.mxu1 %v6685_v16  ;;  %v6812_v23 = vcombine.low %v362_v12, %v366_v13  ;;  %v148_v12 = vld [vmem:[#allocation2 + $0x10] sm:$0xff] }
  0xcc   :  { %v246_v19 = vld [vmem:[#allocation5 + $0x2a0] sm:$0xff]  ;;  %3330 = vmatpush1.bf16.msra.mxu1 %v6684_v22 }
  0xcd   :  { %v370_v20 = vld [vmem:[#allocation5 + $0x680] sm:$0xff]  ;;  %v6693_v24 = vcombine.high %v242_v18, %v246_v19  ;;  %3370 = vmatprep.subr.bf16.mxu0 %v6813_v17  ;;  %v6692_v30 = vcombine.low %v242_v18, %v246_v19  ;;  %v151_v19 = vld [vmem:[#allocation2 + $0x28] sm:$0xff] }
  0xce   :  { %v374_v21 = vld [vmem:[#allocation5 + $0x6a0] sm:$0xff]  ;;  %3371 = vmatpush1.bf16.msra.mxu0 %v6812_v23  ;;  %v6623_v23 = vcombine.high %v171_v14, %v175_v15 }
  0xcf   :  { %v6821_v25 = vcombine.high %v370_v20, %v374_v21  ;;  %v250_v26 = vld [vmem:[#allocation5 + $0x2c0] sm:$0xff]  ;;  %3331 = vmatprep.subr.bf16.mxu1 %v6693_v24  ;;  %v6820_v31 = vcombine.low %v370_v20, %v374_v21  ;;  %v6614_v20 = vcombine.low %v163_v4, %v167_v5  ;;  %v8505_v21 = vpack.c.bf16 %v148_v12, %v148_v12  ;;  %v219_v5 = vld [vmem:[#allocation5 + $0x1c8] sm:$0xff] }
  0xd0   :  { %v254_v27 = vld [vmem:[#allocation5 + $0x2e0] sm:$0xff]  ;;  %3332 = vmatpush1.bf16.msra.mxu1 %v6692_v30  ;;  %v6622_v30 = vcombine.low %v171_v14, %v175_v15  ;;  %v231_v15 = vld [vmem:[#allocation5 + $0x228] sm:$0xff] }
  0xd1   :  { %v378_v28 = vld [vmem:[#allocation5 + $0x6c0] sm:$0xff]  ;;  %v6701_v32 = vcombine.high %v250_v26, %v254_v27  ;;  %3372 = vmatprep.subr.bf16.mxu0 %v6821_v25  ;;  %v6700_v38 = vcombine.low %v250_v26, %v254_v27  ;;  %v179_v25 = vld [vmem:[#allocation5 + $0x88] sm:$0xff]  ;;  %v8507_v27 = vpack.c.bf16 %v151_v19, %v151_v19 }
  0xd2   :  { %v382_v29 = vld [vmem:[#allocation5 + $0x6e0] sm:$0xff]  ;;  %3373 = vmatpush1.bf16.msra.mxu0 %v6820_v31  ;;  %v183_v26 = vld [vmem:[#allocation5 + $0xa8] sm:$0xff] }
  0xd3   :  { %v6829_v33 = vcombine.high %v378_v28, %v382_v29  ;;  %v258_v34 = vld [vmem:[#allocation5 + $0x300] sm:$0xff]  ;;  %3333 = vmatprep.subr.bf16.mxu1 %v6701_v32  ;;  %v6828_v39 = vcombine.low %v378_v28, %v382_v29  ;;  %v6631_v32 = vcombine.high %v179_v25, %v183_v26 }
  0xd4   :  { %v262_v35 = vld [vmem:[#allocation5 + $0x320] sm:$0xff]  ;;  %3334 = vmatpush1.bf16.msra.mxu1 %v6700_v38  ;;  %v6630_v38 = vcombine.low %v179_v25, %v183_v26  ;;  %v239_v25 = vld [vmem:[#allocation5 + $0x268] sm:$0xff] }
  0xd5   :  { %v386_v36 = vld [vmem:[#allocation5 + $0x700] sm:$0xff]  ;;  %v6709_v40 = vcombine.high %v258_v34, %v262_v35  ;;  %3374 = vmatprep.subr.bf16.mxu0 %v6829_v33  ;;  %v6708_v46 = vcombine.low %v258_v34, %v262_v35  ;;  %v187_v35 = vld [vmem:[#allocation5 + $0xc8] sm:$0xff] }
  0xd6   :  { %v390_v37 = vld [vmem:[#allocation5 + $0x720] sm:$0xff]  ;;  %3375 = vmatpush1.bf16.msra.mxu0 %v6828_v39 }
  0xd7   :  { %v6837_v41 = vcombine.high %v386_v36, %v390_v37  ;;  %v266_v42 = vld [vmem:[#allocation5 + $0x340] sm:$0xff]  ;;  %3335 = vmatprep.subr.bf16.mxu1 %v6709_v40  ;;  %v6836_v47 = vcombine.low %v386_v36, %v390_v37  ;;  %v191_v37 = vld [vmem:[#allocation5 + $0xe8] sm:$0xff] }
  0xd8   :  { %v270_v43 = vld [vmem:[#allocation5 + $0x360] sm:$0xff]  ;;  %3336 = vmatpush1.bf16.msra.mxu1 %v6708_v46  ;;  %v6639_v40 = vcombine.high %v187_v35, %v191_v37  ;;  %v6638_v46 = vcombine.low %v187_v35, %v191_v37 }
  0xd9   :  { %v394_v44 = vld [vmem:[#allocation5 + $0x740] sm:$0xff]  ;;  %v6717_v48 = vcombine.high %v266_v42, %v270_v43  ;;  %3376 = vmatprep.subr.bf16.mxu0 %v6837_v41  ;;  %v6716_v54 = vcombine.low %v266_v42, %v270_v43  ;;  %v195_v43 = vld [vmem:[#allocation5 + $0x108] sm:$0xff] }
  0xda   :  { %v398_v45 = vld [vmem:[#allocation5 + $0x760] sm:$0xff]  ;;  %3377 = vmatpush1.bf16.msra.mxu0 %v6836_v47 }
  0xdb   :  { %v6845_v49 = vcombine.high %v394_v44, %v398_v45  ;;  %v274_v50 = vld [vmem:[#allocation5 + $0x380] sm:$0xff]  ;;  %3337 = vmatprep.subr.bf16.mxu1 %v6717_v48  ;;  %v6844_v55 = vcombine.low %v394_v44, %v398_v45  ;;  %v199_v45 = vld [vmem:[#allocation5 + $0x128] sm:$0xff] }
  0xdc   :  { %v278_v51 = vld [vmem:[#allocation5 + $0x3a0] sm:$0xff]  ;;  %3338 = vmatpush1.bf16.msra.mxu1 %v6716_v54  ;;  %v6647_v48 = vcombine.high %v195_v43, %v199_v45  ;;  %v6646_v54 = vcombine.low %v195_v43, %v199_v45 }
  0xdd   :  { %v402_v52 = vld [vmem:[#allocation5 + $0x780] sm:$0xff]  ;;  %v6725_v56 = vcombine.high %v274_v50, %v278_v51  ;;  %3378 = vmatprep.subr.bf16.mxu0 %v6845_v49  ;;  %v6724_v0 = vcombine.low %v274_v50, %v278_v51  ;;  %v203_v51 = vld [vmem:[#allocation5 + $0x148] sm:$0xff] }
  0xde   :  { %v406_v53 = vld [vmem:[#allocation5 + $0x7a0] sm:$0xff]  ;;  %3379 = vmatpush1.bf16.msra.mxu0 %v6844_v55 }
  0xdf   :  { %v6853_v58 = vcombine.high %v402_v52, %v406_v53  ;;  %v282_v59 = vld [vmem:[#allocation5 + $0x3c0] sm:$0xff]  ;;  %3339 = vmatprep.subr.bf16.mxu1 %v6725_v56  ;;  %v6852_v1 = vcombine.low %v402_v52, %v406_v53  ;;  %v207_v53 = vld [vmem:[#allocation5 + $0x168] sm:$0xff] }
  0xe0   :  { %v286_v60 = vld [vmem:[#allocation5 + $0x3e0] sm:$0xff]  ;;  %3340 = vmatpush1.bf16.msra.mxu1 %v6724_v0  ;;  %v6655_v56 = vcombine.high %v203_v51, %v207_v53  ;;  %v6654_v0 = vcombine.low %v203_v51, %v207_v53 }
  0xe1   :  { %v410_v62 = vld [vmem:[#allocation5 + $0x7c0] sm:$0xff]  ;;  %v6733_v2 = vcombine.high %v282_v59, %v286_v60  ;;  %3380 = vmatprep.subr.bf16.mxu0 %v6853_v58  ;;  %v6732_v8 = vcombine.low %v282_v59, %v286_v60  ;;  %v211_v60 = vld [vmem:[#allocation5 + $0x188] sm:$0xff] }
  0xe2   :  { %v414_v63 = vld [vmem:[#allocation5 + $0x7e0] sm:$0xff]  ;;  %3381 = vmatpush1.bf16.msra.mxu0 %v6852_v1 }
  0xe3   :  { %v6861_v3 = vcombine.high %v410_v62, %v414_v63  ;;  %v418_v6 = vld [vmem:[#allocation5 + $0x800] sm:$0xff]  ;;  %3341 = vmatprep.subr.bf16.mxu1 %v6733_v2  ;;  %v6860_v10 = vcombine.low %v410_v62, %v414_v63  ;;  %v215_v63 = vld [vmem:[#allocation5 + $0x1a8] sm:$0xff] }
  0xe4   :  { %v422_v7 = vld [vmem:[#allocation5 + $0x820] sm:$0xff]  ;;  %3342 = vmatpush1.bf16.msra.mxu1 %v6732_v8  ;;  %v6663_v2 = vcombine.high %v211_v60, %v215_v63  ;;  %v6662_v8 = vcombine.low %v211_v60, %v215_v63 }
  0xe5   :  { %v146_v9 = vld [vmem:[#allocation2] sm:$0xff]  ;;  %3382 = vmatprep.subr.bf16.mxu0 %v6861_v3  ;;  %v6869_v13 = vcombine.high %v418_v6, %v422_v7  ;;  %v6868_v22 = vcombine.low %v418_v6, %v422_v7  ;;  %3475 = vmatprep.subr.bf16.mxu1 %v6615_v11  ;;  %v223_v7 = vld [vmem:[#allocation5 + $0x1e8] sm:$0xff] }
  0xe6   :  { %v8503_v16 = vpack.c.bf16 %v146_v9, %v146_v9  ;;  %v426_v17 = vld [vmem:[#allocation5 + $0x840] sm:$0xff]  ;;  %3383 = vmatpush1.bf16.msra.mxu0 %v6860_v10  ;;  %v6671_v10 = vcombine.high %v219_v5, %v223_v7 }
  0xe7   :  { %v430_v18 = vld [vmem:[#allocation5 + $0x860] sm:$0xff]  ;;  %3393 = vmatprep.subr.bf16.mxu0 %v6869_v13  ;;  %v227_v13 = vld [vmem:[#allocation5 + $0x208] sm:$0xff] }
  0xe8   :  { %v6877_v24 = vcombine.high %v426_v17, %v430_v18  ;;  %3344 = vmatmul.mubr.bf16.vlgmr.msra.gmra.mrb[0].mxu1 %v8503_v16  ;;  %v434_v28 = vld [vmem:[#allocation5 + $0x880] sm:$0xff]  ;;  %v6876_v31 = vcombine.low %v426_v17, %v430_v18  ;;  %v6670_v17 = vcombine.low %v219_v5, %v223_v7  ;;  %v6679_v19 = vcombine.high %v227_v13, %v231_v15 }
  0xe9   :  { %v438_v29 = vld [vmem:[#allocation5 + $0x8a0] sm:$0xff]  ;;  %3385 = vmatmul.mubr.bf16.vlgmr.msra.gmra.mrb[0].mxu0 %v8505_v21  ;;  %3476 = vmatpush1.bf16.msra.mxu1 %v6614_v20  ;;  %v6678_v26 = vcombine.low %v227_v13, %v231_v15 }
  0xea   :  { %3394 = vmatpush1.bf16.msra.mxu0 %v6868_v22  ;;  %3477 = vmatprep.subr.bf16.mxu1 %v6623_v23  ;;  %v442_v33 = vld [vmem:[#allocation5 + $0x8c0] sm:$0xff]  ;;  %v6885_v36 = vcombine.high %v434_v28, %v438_v29  ;;  %v6884_v39 = vcombine.low %v434_v28, %v438_v29  ;;  %v235_v23 = vld [vmem:[#allocation5 + $0x248] sm:$0xff] }
  0xeb   :  { %v446_v34 = vld [vmem:[#allocation5 + $0x8e0] sm:$0xff]  ;;  %3395 = vmatprep.subr.bf16.mxu0 %v6877_v24  ;;  %3425 = vmatprep.mubr.bf16.mxu0 %v8507_v27  ;;  %v6687_v29 = vcombine.high %v235_v23, %v239_v25  ;;  %v6686_v35 = vcombine.low %v235_v23, %v239_v25 }
  0xec   :  { %3507 = vmatprep.mubr.bf16.mxu1 %v8497_v57  ;;  %v450_v41 = vld [vmem:[#allocation5 + $0x900] sm:$0xff]  ;;  %v6893_v44 = vcombine.high %v442_v33, %v446_v34  ;;  %v6892_v47 = vcombine.low %v442_v33, %v446_v34  ;;  %v247_v34 = vld [vmem:[#allocation5 + $0x2a8] sm:$0xff] }
  0xed   :  { %3478 = vmatpush1.bf16.msra.mxu1 %v6622_v30  ;;  %v454_v42 = vld [vmem:[#allocation5 + $0x920] sm:$0xff] }
  0xee   :  { %3396 = vmatpush1.bf16.msra.mxu0 %v6876_v31  ;;  %3479 = vmatprep.subr.bf16.mxu1 %v6631_v32  ;;  %v458_v49 = vld [vmem:[#allocation5 + $0x940] sm:$0xff]  ;;  %v6901_v52 = vcombine.high %v450_v41, %v454_v42  ;;  %v6900_v55 = vcombine.low %v450_v41, %v454_v42  ;;  %v243_v32 = vld [vmem:[#allocation5 + $0x288] sm:$0xff] }
  0xef   :  { %3397 = vmatprep.subr.bf16.mxu0 %v6885_v36  ;;  %v462_v50 = vld [vmem:[#allocation5 + $0x960] sm:$0xff]  ;;  %v6695_v37 = vcombine.high %v243_v32, %v247_v34  ;;  %v255_v42 = vld [vmem:[#allocation5 + $0x2e8] sm:$0xff]  ;;  %v6694_v43 = vcombine.low %v243_v32, %v247_v34 }
  0xf0   :  { %v466_v58 = vld [vmem:[#allocation5 + $0x980] sm:$0xff]  ;;  %v6909_v62 = vcombine.high %v458_v49, %v462_v50  ;;  %v6908_v1 = vcombine.low %v458_v49, %v462_v50  ;;  %v263_v50 = vld [vmem:[#allocation5 + $0x328] sm:$0xff] }
  0xf1   :  { %3480 = vmatpush1.bf16.msra.mxu1 %v6630_v38  ;;  %v470_v59 = vld [vmem:[#allocation5 + $0x9a0] sm:$0xff] }
  0xf2   :  { %3398 = vmatpush1.bf16.msra.mxu0 %v6884_v39  ;;  %3481 = vmatprep.subr.bf16.mxu1 %v6639_v40  ;;  %v474_v3 = vld [vmem:[#allocation5 + $0x9c0] sm:$0xff]  ;;  %v6917_v6 = vcombine.high %v466_v58, %v470_v59  ;;  %v6916_v9 = vcombine.low %v466_v58, %v470_v59  ;;  %v251_v40 = vld [vmem:[#allocation5 + $0x2c8] sm:$0xff] }
  0xf3   :  { %3399 = vmatprep.subr.bf16.mxu0 %v6893_v44  ;;  %v478_v4 = vld [vmem:[#allocation5 + $0x9e0] sm:$0xff]  ;;  %v6703_v45 = vcombine.high %v251_v40, %v255_v42  ;;  %v6702_v51 = vcombine.low %v251_v40, %v255_v42  ;;  %v271_v59 = vld [vmem:[#allocation5 + $0x368] sm:$0xff] }
  0xf4   :  { %v482_v11 = vld [vmem:[#allocation5 + $0xa00] sm:$0xff]  ;;  %v6925_v14 = vcombine.high %v474_v3, %v478_v4  ;;  %v6924_v18 = vcombine.low %v474_v3, %v478_v4  ;;  %v279_v4 = vld [vmem:[#allocation5 + $0x3a8] sm:$0xff] }
  0xf5   :  { %3482 = vmatpush1.bf16.msra.mxu1 %v6638_v46  ;;  %v486_v12 = vld [vmem:[#allocation5 + $0xa20] sm:$0xff]  ;;  %v307_v40 = vld [vmem:[#allocation5 + $0x488] sm:$0xff] }
  0xf6   :  { %3400 = vmatpush1.bf16.msra.mxu0 %v6892_v47  ;;  %3483 = vmatprep.subr.bf16.mxu1 %v6647_v48  ;;  %v490_v20 = vld [vmem:[#allocation5 + $0xa40] sm:$0xff]  ;;  %v6933_v24 = vcombine.high %v482_v11, %v486_v12  ;;  %v6932_v28 = vcombine.low %v482_v11, %v486_v12  ;;  %v259_v48 = vld [vmem:[#allocation5 + $0x308] sm:$0xff] }
  0xf7   :  { %3401 = vmatprep.subr.bf16.mxu0 %v6901_v52  ;;  %v494_v22 = vld [vmem:[#allocation5 + $0xa60] sm:$0xff]  ;;  %v6711_v53 = vcombine.high %v259_v48, %v263_v50  ;;  %v6710_v60 = vcombine.low %v259_v48, %v263_v50  ;;  %v287_v12 = vld [vmem:[#allocation5 + $0x3e8] sm:$0xff] }
  0xf8   :  { %v498_v30 = vld [vmem:[#allocation5 + $0xa80] sm:$0xff]  ;;  %v6941_v33 = vcombine.high %v490_v20, %v494_v22  ;;  %v6940_v36 = vcombine.low %v490_v20, %v494_v22  ;;  %v295_v22 = vld [vmem:[#allocation5 + $0x428] sm:$0xff] }
  0xf9   :  { %3484 = vmatpush1.bf16.msra.mxu1 %v6646_v54  ;;  %v502_v31 = vld [vmem:[#allocation5 + $0xaa0] sm:$0xff]  ;;  %v311_v42 = vld [vmem:[#allocation5 + $0x4a8] sm:$0xff] }
  0xfa   :  { %3402 = vmatpush1.bf16.msra.mxu0 %v6900_v55  ;;  %3485 = vmatprep.subr.bf16.mxu1 %v6655_v56  ;;  %v506_v38 = vld [vmem:[#allocation5 + $0xac0] sm:$0xff]  ;;  %v6949_v41 = vcombine.high %v498_v30, %v502_v31  ;;  %v6948_v44 = vcombine.low %v498_v30, %v502_v31  ;;  %v267_v56 = vld [vmem:[#allocation5 + $0x348] sm:$0xff] }
  0xfb   :  { %3403 = vmatprep.subr.bf16.mxu0 %v6909_v62  ;;  %v510_v39 = vld [vmem:[#allocation5 + $0xae0] sm:$0xff]  ;;  %v6719_v63 = vcombine.high %v267_v56, %v271_v59  ;;  %v6718_v5 = vcombine.low %v267_v56, %v271_v59  ;;  %v299_v30 = vld [vmem:[#allocation5 + $0x448] sm:$0xff] }
  0xfc   :  { %v514_v46 = vld [vmem:[#allocation5 + $0xb00] sm:$0xff]  ;;  %v6957_v49 = vcombine.high %v506_v38, %v510_v39  ;;  %v6956_v52 = vcombine.low %v506_v38, %v510_v39  ;;  %v303_v31 = vld [vmem:[#allocation5 + $0x468] sm:$0xff] }
  0xfd   :  { %3486 = vmatpush1.bf16.msra.mxu1 %v6654_v0  ;;  %v518_v47 = vld [vmem:[#allocation5 + $0xb20] sm:$0xff] }
  0xfe   :  { %3404 = vmatpush1.bf16.msra.mxu0 %v6908_v1  ;;  %3487 = vmatprep.subr.bf16.mxu1 %v6663_v2  ;;  %v522_v54 = vld [vmem:[#allocation5 + $0xb40] sm:$0xff]  ;;  %v6965_v58 = vcombine.high %v514_v46, %v518_v47  ;;  %v6964_v62 = vcombine.low %v514_v46, %v518_v47  ;;  %v275_v2 = vld [vmem:[#allocation5 + $0x388] sm:$0xff]  ;;  %v6759_v46 = vcombine.high %v307_v40, %v311_v42 }
  0xff   :  { %3405 = vmatprep.subr.bf16.mxu0 %v6917_v6  ;;  %v526_v55 = vld [vmem:[#allocation5 + $0xb60] sm:$0xff]  ;;  %v6727_v7 = vcombine.high %v275_v2, %v279_v4  ;;  %v6726_v13 = vcombine.low %v275_v2, %v279_v4 }
 0x100   :  { %v530_v0 = vld [vmem:[#allocation5 + $0xb80] sm:$0xff]  ;;  %v6973_v3 = vcombine.high %v522_v54, %v526_v55  ;;  %v6972_v6 = vcombine.low %v522_v54, %v526_v55 }
 0x101   :  { %3488 = vmatpush1.bf16.msra.mxu1 %v6662_v8  ;;  %v534_v1 = vld [vmem:[#allocation5 + $0xba0] sm:$0xff] }
 0x102   :  { %3406 = vmatpush1.bf16.msra.mxu0 %v6916_v9  ;;  %3489 = vmatprep.subr.bf16.mxu1 %v6671_v10  ;;  %v538_v8 = vld [vmem:[#allocation5 + $0xbc0] sm:$0xff]  ;;  %v283_v10 = vld [vmem:[#allocation5 + $0x3c8] sm:$0xff]  ;;  %v6981_v11 = vcombine.high %v530_v0, %v534_v1 }
 0x103   :  { %3407 = vmatprep.subr.bf16.mxu0 %v6925_v14  ;;  %v542_v9 = vld [vmem:[#allocation5 + $0xbe0] sm:$0xff]  ;;  %v6980_v14 = vcombine.low %v530_v0, %v534_v1  ;;  %v6735_v15 = vcombine.high %v283_v10, %v287_v12 }
 0x104   :  { %v6989_v20 = vcombine.high %v538_v8, %v542_v9  ;;  %v150_v23 = vld [vmem:[#allocation2 + $0x20] sm:$0xff]  ;;  %v6988_v25 = vcombine.low %v538_v8, %v542_v9 }
 0x105   :  { %3490 = vmatpush1.bf16.msra.mxu1 %v6670_v17  ;;  %v546_v17 = vld [vmem:[#allocation5 + $0xc00] sm:$0xff] }
 0x106   :  { %3408 = vmatpush1.bf16.msra.mxu0 %v6924_v18  ;;  %3491 = vmatprep.subr.bf16.mxu1 %v6679_v19  ;;  %v550_v18 = vld [vmem:[#allocation5 + $0xc20] sm:$0xff]  ;;  %v291_v19 = vld [vmem:[#allocation5 + $0x408] sm:$0xff] }
 0x107   :  { %3409 = vmatprep.subr.bf16.mxu0 %v6933_v24  ;;  %v6734_v24 = vcombine.low %v283_v10, %v287_v12  ;;  %v6997_v32 = vcombine.high %v546_v17, %v550_v18  ;;  %v6742_v34 = vcombine.low %v291_v19, %v295_v22  ;;  %v562_v38 = vld [vmem:[#allocation5 + $0xc80] sm:$0xff]  ;;  %v339_v12 = vld [vmem:[#allocation5 + $0x588] sm:$0xff] }
 0x108   :  { %v566_v39 = vld [vmem:[#allocation5 + $0xca0] sm:$0xff] }
 0x109   :  { %3492 = vmatpush1.bf16.msra.mxu1 %v6678_v26  ;;  %v6743_v26 = vcombine.high %v291_v19, %v295_v22  ;;  %v570_v47 = vld [vmem:[#allocation5 + $0xcc0] sm:$0xff]  ;;  %v7013_v50 = vcombine.high %v562_v38, %v566_v39 }
 0x10a   :  { %3410 = vmatpush1.bf16.msra.mxu0 %v6932_v28  ;;  %3493 = vmatprep.subr.bf16.mxu1 %v6687_v29  ;;  %v554_v28 = vld [vmem:[#allocation5 + $0xc40] sm:$0xff] }
 0x10b   :  { %3411 = vmatprep.subr.bf16.mxu0 %v6941_v33  ;;  %v558_v29 = vld [vmem:[#allocation5 + $0xc60] sm:$0xff]  ;;  %v153_v33 = vld [vmem:[#allocation2 + $0x38] sm:$0xff] }
 0x10c   :  { %v574_v48 = vld [vmem:[#allocation5 + $0xce0] sm:$0xff] }
 0x10d   :  { %3494 = vmatpush1.bf16.msra.mxu1 %v6686_v35  ;;  %v8513_v35 = vpack.c.bf16 %v150_v23, %v150_v23  ;;  %v578_v55 = vld [vmem:[#allocation5 + $0xd00] sm:$0xff]  ;;  %v7021_v59 = vcombine.high %v570_v47, %v574_v48  ;;  %v351_v23 = vld [vmem:[#allocation5 + $0x5e8] sm:$0xff] }
 0x10e   :  { %3412 = vmatpush1.bf16.msra.mxu0 %v6940_v36  ;;  %3495 = vmatprep.subr.bf16.mxu1 %v6695_v37  ;;  %v6996_v36 = vcombine.low %v546_v17, %v550_v18  ;;  %v6751_v37 = vcombine.high %v299_v30, %v303_v31  ;;  %v582_v56 = vld [vmem:[#allocation5 + $0xd20] sm:$0xff] }
 0x10f   :  { %3413 = vmatprep.subr.bf16.mxu0 %v6949_v41  ;;  %v7005_v41 = vcombine.high %v554_v28, %v558_v29  ;;  %v586_v1 = vld [vmem:[#allocation5 + $0xd40] sm:$0xff]  ;;  %v7029_v4 = vcombine.high %v578_v55, %v582_v56 }
 0x110   :  { %v590_v2 = vld [vmem:[#allocation5 + $0xd60] sm:$0xff] }
 0x111   :  { %3496 = vmatpush1.bf16.msra.mxu1 %v6694_v43  ;;  %v8515_v43 = vpack.c.bf16 %v153_v33, %v153_v33  ;;  %v594_v9 = vld [vmem:[#allocation5 + $0xd80] sm:$0xff] }
 0x112   :  { %3414 = vmatpush1.bf16.msra.mxu0 %v6948_v44  ;;  %3497 = vmatprep.subr.bf16.mxu1 %v6703_v45  ;;  %v6750_v44 = vcombine.low %v299_v30, %v303_v31  ;;  %v7004_v45 = vcombine.low %v554_v28, %v558_v29  ;;  %v598_v10 = vld [vmem:[#allocation5 + $0xda0] sm:$0xff]  ;;  %v355_v30 = vld [vmem:[#allocation5 + $0x608] sm:$0xff] }
 0x113   :  { %3415 = vmatprep.subr.bf16.mxu0 %v6957_v49  ;;  %v315_v49 = vld [vmem:[#allocation5 + $0x4c8] sm:$0xff]  ;;  %v602_v18 = vld [vmem:[#allocation5 + $0xdc0] sm:$0xff]  ;;  %v7045_v22 = vcombine.high %v594_v9, %v598_v10 }
 0x114   :  { %v606_v19 = vld [vmem:[#allocation5 + $0xde0] sm:$0xff] }
 0x115   :  { %3498 = vmatpush1.bf16.msra.mxu1 %v6702_v51  ;;  %v319_v51 = vld [vmem:[#allocation5 + $0x4e8] sm:$0xff]  ;;  %v610_v28 = vld [vmem:[#allocation5 + $0xe00] sm:$0xff]  ;;  %v7053_v31 = vcombine.high %v602_v18, %v606_v19 }
 0x116   :  { %3416 = vmatpush1.bf16.msra.mxu0 %v6956_v52  ;;  %3499 = vmatprep.subr.bf16.mxu1 %v6711_v53  ;;  %v6758_v52 = vcombine.low %v307_v40, %v311_v42  ;;  %v7012_v53 = vcombine.low %v562_v38, %v566_v39  ;;  %v6767_v54 = vcombine.high %v315_v49, %v319_v51  ;;  %v614_v29 = vld [vmem:[#allocation5 + $0xe20] sm:$0xff]  ;;  %v363_v39 = vld [vmem:[#allocation5 + $0x648] sm:$0xff] }
 0x117   :  { %3417 = vmatprep.subr.bf16.mxu0 %v6965_v58  ;;  %v323_v58 = vld [vmem:[#allocation5 + $0x508] sm:$0xff]  ;;  %v622_v38 = vld [vmem:[#allocation5 + $0xe60] sm:$0xff]  ;;  %v7061_v40 = vcombine.high %v610_v28, %v614_v29 }
 0x119   :  { %3500 = vmatpush1.bf16.msra.mxu1 %v6710_v60  ;;  %v327_v60 = vld [vmem:[#allocation5 + $0x528] sm:$0xff] }
 0x11a   :  { %3418 = vmatpush1.bf16.msra.mxu0 %v6964_v62  ;;  %3501 = vmatprep.subr.bf16.mxu1 %v6719_v63  ;;  %v6766_v62 = vcombine.low %v315_v49, %v319_v51  ;;  %v7020_v63 = vcombine.low %v570_v47, %v574_v48  ;;  %v6775_v0 = vcombine.high %v323_v58, %v327_v60  ;;  %v630_v47 = vld [vmem:[#allocation5 + $0xea0] sm:$0xff]  ;;  %v371_v48 = vld [vmem:[#allocation5 + $0x688] sm:$0xff] }
 0x11b   :  { %3419 = vmatprep.subr.bf16.mxu0 %v6973_v3  ;;  %v331_v3 = vld [vmem:[#allocation5 + $0x548] sm:$0xff] }
 0x11d   :  { %3502 = vmatpush1.bf16.msra.mxu1 %v6718_v5  ;;  %v335_v5 = vld [vmem:[#allocation5 + $0x568] sm:$0xff] }
 0x11e   :  { %3420 = vmatpush1.bf16.msra.mxu0 %v6972_v6  ;;  %3503 = vmatprep.subr.bf16.mxu1 %v6727_v7  ;;  %v6774_v6 = vcombine.low %v323_v58, %v327_v60  ;;  %v7028_v7 = vcombine.low %v578_v55, %v582_v56  ;;  %v6783_v8 = vcombine.high %v331_v3, %v335_v5  ;;  %v638_v55 = vld [vmem:[#allocation5 + $0xee0] sm:$0xff]  ;;  %v379_v56 = vld [vmem:[#allocation5 + $0x6c8] sm:$0xff] }
 0x11f   :  { %3421 = vmatprep.subr.bf16.mxu0 %v6981_v11  ;;  %v7037_v11 = vcombine.high %v586_v1, %v590_v2 }
 0x121   :  { %3504 = vmatpush1.bf16.msra.mxu1 %v6726_v13  ;;  %v343_v13 = vld [vmem:[#allocation5 + $0x5a8] sm:$0xff] }
 0x122   :  { %3422 = vmatpush1.bf16.msra.mxu0 %v6980_v14  ;;  %3505 = vmatprep.subr.bf16.mxu1 %v6735_v15  ;;  %v6782_v14 = vcombine.low %v331_v3, %v335_v5  ;;  %v7036_v15 = vcombine.low %v586_v1, %v590_v2  ;;  %v6791_v17 = vcombine.high %v339_v12, %v343_v13  ;;  %v646_v1 = vld [vmem:[#allocation5 + $0xf20] sm:$0xff]  ;;  %v387_v2 = vld [vmem:[#allocation5 + $0x708] sm:$0xff] }
 0x123   :  { %3423 = vmatprep.subr.bf16.mxu0 %v6989_v20  ;;  %v347_v20 = vld [vmem:[#allocation5 + $0x5c8] sm:$0xff] }
 0x124   :  { %v6798_v33 = vcombine.low %v347_v20, %v351_v23 }
 0x125   :  { %3506 = vmatpush1.bf16.msra.mxu1 %v6734_v24  ;;  %v6790_v24 = vcombine.low %v339_v12, %v343_v13  ;;  %v399_v12 = vld [vmem:[#allocation5 + $0x768] sm:$0xff] }
 0x126   :  { %3424 = vmatpush1.bf16.msra.mxu0 %v6988_v25  ;;  %3516 = vmatprep.subr.bf16.mxu1 %v6743_v26  ;;  %v7044_v25 = vcombine.low %v594_v9, %v598_v10  ;;  %v6799_v26 = vcombine.high %v347_v20, %v351_v23  ;;  %v654_v9 = vld [vmem:[#allocation5 + $0xf60] sm:$0xff]  ;;  %v395_v10 = vld [vmem:[#allocation5 + $0x748] sm:$0xff] }
 0x127   :  { %3434 = vmatprep.subr.bf16.mxu0 %v6997_v32  ;;  %v359_v32 = vld [vmem:[#allocation5 + $0x628] sm:$0xff]  ;;  %v6846_v23 = vcombine.low %v395_v10, %v399_v12 }
 0x128   :  { %3508 = vmatmul.mubr.bf16.vlgmr.msra.gmra.mrb[4].mxu1 %v8503_v16  ;;  %v6806_v42 = vcombine.low %v355_v30, %v359_v32 }
 0x129   :  { %3426 = vmatmul.mubr.bf16.vlgmr.msra.gmra.mrb[0].mxu0 %v8513_v35  ;;  %3517 = vmatpush1.bf16.msra.mxu1 %v6742_v34  ;;  %v7052_v34 = vcombine.low %v602_v18, %v606_v19  ;;  %v662_v18 = vld [vmem:[#allocation5 + $0xfa0] sm:$0xff]  ;;  %v403_v19 = vld [vmem:[#allocation5 + $0x788] sm:$0xff] }
 0x12a   :  { %3435 = vmatpush1.bf16.msra.mxu0 %v6996_v36  ;;  %3518 = vmatprep.subr.bf16.mxu1 %v6751_v37  ;;  %v6807_v36 = vcombine.high %v355_v30, %v359_v32  ;;  %v618_v37 = vld [vmem:[#allocation5 + $0xe40] sm:$0xff] }
 0x12b   :  { %3436 = vmatprep.subr.bf16.mxu0 %v7005_v41  ;;  %3466 = vmatprep.mubr.bf16.mxu0 %v8515_v43  ;;  %v367_v41 = vld [vmem:[#allocation5 + $0x668] sm:$0xff]  ;;  %v7069_v49 = vcombine.high %v618_v37, %v622_v38 }
 0x12c   :  { %3548 = vmatprep.mubr.bf16.mxu1 %v8499_v61  ;;  %v6814_v51 = vcombine.low %v363_v39, %v367_v41 }
 0x12d   :  { %3519 = vmatpush1.bf16.msra.mxu1 %v6750_v44  ;;  %v7060_v44 = vcombine.low %v610_v28, %v614_v29  ;;  %v670_v28 = vld [vmem:[#allocation5 + $0xfe0] sm:$0xff]  ;;  %v411_v29 = vld [vmem:[#allocation5 + $0x7c8] sm:$0xff] }
 0x12e   :  { %3437 = vmatpush1.bf16.msra.mxu0 %v7004_v45  ;;  %3520 = vmatprep.subr.bf16.mxu1 %v6759_v46  ;;  %v6815_v45 = vcombine.high %v363_v39, %v367_v41  ;;  %v626_v46 = vld [vmem:[#allocation5 + $0xe80] sm:$0xff]  ;;  %v152_v41 = vld [vmem:[#allocation2 + $0x30] sm:$0xff] }
 0x12f   :  { %3438 = vmatprep.subr.bf16.mxu0 %v7013_v50  ;;  %v375_v50 = vld [vmem:[#allocation5 + $0x6a8] sm:$0xff]  ;;  %v7077_v58 = vcombine.high %v626_v46, %v630_v47 }
 0x130   :  { %v6822_v60 = vcombine.low %v371_v48, %v375_v50 }
 0x131   :  { %3521 = vmatpush1.bf16.msra.mxu1 %v6758_v52  ;;  %v7068_v52 = vcombine.low %v618_v37, %v622_v38  ;;  %v423_v37 = vld [vmem:[#allocation5 + $0x828] sm:$0xff]  ;;  %v164_v38 = vld [vmem:[#allocation5 + $0x10] sm:$0xff] }
 0x132   :  { %3439 = vmatpush1.bf16.msra.mxu0 %v7012_v53  ;;  %3522 = vmatprep.subr.bf16.mxu1 %v6767_v54  ;;  %v6823_v53 = vcombine.high %v371_v48, %v375_v50  ;;  %v634_v54 = vld [vmem:[#allocation5 + $0xec0] sm:$0xff]  ;;  %v172_v48 = vld [vmem:[#allocation5 + $0x50] sm:$0xff] }
 0x133   :  { %3440 = vmatprep.subr.bf16.mxu0 %v7021_v59  ;;  %v383_v59 = vld [vmem:[#allocation5 + $0x6e8] sm:$0xff]  ;;  %v7085_v3 = vcombine.high %v634_v54, %v638_v55  ;;  %v176_v50 = vld [vmem:[#allocation5 + $0x70] sm:$0xff] }
 0x134   :  { %v6830_v5 = vcombine.low %v379_v56, %v383_v59 }
 0x135   :  { %3523 = vmatpush1.bf16.msra.mxu1 %v6766_v62  ;;  %v7076_v62 = vcombine.low %v626_v46, %v630_v47  ;;  %v427_v46 = vld [vmem:[#allocation5 + $0x848] sm:$0xff] }
 0x136   :  { %3441 = vmatpush1.bf16.msra.mxu0 %v7020_v63  ;;  %3524 = vmatprep.subr.bf16.mxu1 %v6775_v0  ;;  %v6831_v63 = vcombine.high %v379_v56, %v383_v59  ;;  %v642_v0 = vld [vmem:[#allocation5 + $0xf00] sm:$0xff]  ;;  %v431_v47 = vld [vmem:[#allocation5 + $0x868] sm:$0xff]  ;;  %v6625_v59 = vcombine.high %v172_v48, %v176_v50 }
 0x137   :  { %3442 = vmatprep.subr.bf16.mxu0 %v7029_v4  ;;  %v391_v4 = vld [vmem:[#allocation5 + $0x728] sm:$0xff] }
 0x138   :  { %v6838_v13 = vcombine.low %v387_v2, %v391_v4  ;;  %v439_v56 = vld [vmem:[#allocation5 + $0x8a8] sm:$0xff] }
 0x139   :  { %3525 = vmatpush1.bf16.msra.mxu1 %v6774_v6  ;;  %v7084_v6 = vcombine.low %v634_v54, %v638_v55  ;;  %v6879_v54 = vcombine.high %v427_v46, %v431_v47  ;;  %v435_v55 = vld [vmem:[#allocation5 + $0x888] sm:$0xff] }
 0x13a   :  { %3443 = vmatpush1.bf16.msra.mxu0 %v7028_v7  ;;  %3526 = vmatprep.subr.bf16.mxu1 %v6783_v8  ;;  %v6839_v7 = vcombine.high %v387_v2, %v391_v4  ;;  %v650_v8 = vld [vmem:[#allocation5 + $0xf40] sm:$0xff]  ;;  %v447_v2 = vld [vmem:[#allocation5 + $0x8e8] sm:$0xff] }
 0x13b   :  { %3444 = vmatprep.subr.bf16.mxu0 %v7037_v11  ;;  %v7093_v11 = vcombine.high %v642_v0, %v646_v1  ;;  %v7101_v20 = vcombine.high %v650_v8, %v654_v9 }
 0x13d   :  { %3527 = vmatpush1.bf16.msra.mxu1 %v6782_v14  ;;  %v7092_v14 = vcombine.low %v642_v0, %v646_v1  ;;  %v6887_v0 = vcombine.high %v435_v55, %v439_v56  ;;  %v443_v1 = vld [vmem:[#allocation5 + $0x8c8] sm:$0xff] }
 0x13e   :  { %3445 = vmatpush1.bf16.msra.mxu0 %v7036_v15  ;;  %3528 = vmatprep.subr.bf16.mxu1 %v6791_v17  ;;  %v6847_v15 = vcombine.high %v395_v10, %v399_v12  ;;  %v658_v17 = vld [vmem:[#allocation5 + $0xf80] sm:$0xff]  ;;  %v455_v10 = vld [vmem:[#allocation5 + $0x928] sm:$0xff] }
 0x13f   :  { %3446 = vmatprep.subr.bf16.mxu0 %v7045_v22  ;;  %v407_v22 = vld [vmem:[#allocation5 + $0x7a8] sm:$0xff]  ;;  %v7109_v30 = vcombine.high %v658_v17, %v662_v18 }
 0x140   :  { %v6854_v32 = vcombine.low %v403_v19, %v407_v22 }
 0x141   :  { %3529 = vmatpush1.bf16.msra.mxu1 %v6790_v24  ;;  %v7100_v24 = vcombine.low %v650_v8, %v654_v9  ;;  %v6895_v8 = vcombine.high %v443_v1, %v447_v2  ;;  %v451_v9 = vld [vmem:[#allocation5 + $0x908] sm:$0xff] }
 0x142   :  { %3447 = vmatpush1.bf16.msra.mxu0 %v7044_v25  ;;  %3530 = vmatprep.subr.bf16.mxu1 %v6799_v26  ;;  %v6855_v25 = vcombine.high %v403_v19, %v407_v22  ;;  %v666_v26 = vld [vmem:[#allocation5 + $0xfc0] sm:$0xff]  ;;  %v463_v19 = vld [vmem:[#allocation5 + $0x968] sm:$0xff] }
 0x143   :  { %3448 = vmatprep.subr.bf16.mxu0 %v7053_v31  ;;  %v415_v31 = vld [vmem:[#allocation5 + $0x7e8] sm:$0xff]  ;;  %v7117_v39 = vcombine.high %v666_v26, %v670_v28 }
 0x145   :  { %3531 = vmatpush1.bf16.msra.mxu1 %v6798_v33  ;;  %v7108_v33 = vcombine.low %v658_v17, %v662_v18  ;;  %v6903_v17 = vcombine.high %v451_v9, %v455_v10  ;;  %v459_v18 = vld [vmem:[#allocation5 + $0x948] sm:$0xff] }
 0x146   :  { %3449 = vmatpush1.bf16.msra.mxu0 %v7052_v34  ;;  %3532 = vmatprep.subr.bf16.mxu1 %v6807_v36  ;;  %v6863_v34 = vcombine.high %v411_v29, %v415_v31  ;;  %v419_v36 = vld [vmem:[#allocation5 + $0x808] sm:$0xff] }
 0x147   :  { %3450 = vmatprep.subr.bf16.mxu0 %v7061_v40  ;;  %v168_v40 = vld [vmem:[#allocation5 + $0x30] sm:$0xff] }
 0x149   :  { %3533 = vmatpush1.bf16.msra.mxu1 %v6806_v42  ;;  %v6862_v42 = vcombine.low %v411_v29, %v415_v31  ;;  %v471_v29 = vld [vmem:[#allocation5 + $0x9a8] sm:$0xff] }
 0x14a   :  { %3451 = vmatpush1.bf16.msra.mxu0 %v7060_v44  ;;  %3534 = vmatprep.subr.bf16.mxu1 %v6815_v45  ;;  %v7116_v44 = vcombine.low %v666_v26, %v670_v28  ;;  %v6871_v45 = vcombine.high %v419_v36, %v423_v37  ;;  %v6911_v26 = vcombine.high %v459_v18, %v463_v19  ;;  %v467_v28 = vld [vmem:[#allocation5 + $0x988] sm:$0xff] }
 0x14b   :  { %3452 = vmatprep.subr.bf16.mxu0 %v7069_v49  ;;  %v6617_v49 = vcombine.high %v164_v38, %v168_v40 }
 0x14d   :  { %3535 = vmatpush1.bf16.msra.mxu1 %v6814_v51  ;;  %v8521_v51 = vpack.c.bf16 %v152_v41, %v152_v41  ;;  %v224_v41 = vld [vmem:[#allocation5 + $0x1f0] sm:$0xff] }
 0x14e   :  { %3453 = vmatpush1.bf16.msra.mxu0 %v7068_v52  ;;  %3536 = vmatprep.subr.bf16.mxu1 %v6823_v53  ;;  %v6870_v52 = vcombine.low %v419_v36, %v423_v37  ;;  %v6616_v53 = vcombine.low %v164_v38, %v168_v40  ;;  %v6919_v36 = vcombine.high %v467_v28, %v471_v29  ;;  %v475_v37 = vld [vmem:[#allocation5 + $0x9c8] sm:$0xff] }
 0x14f   :  { %3454 = vmatprep.subr.bf16.mxu0 %v7077_v58  ;;  %v180_v58 = vld [vmem:[#allocation5 + $0x90] sm:$0xff]  ;;  %v479_v38 = vld [vmem:[#allocation5 + $0x9e8] sm:$0xff] }
 0x151   :  { %3537 = vmatpush1.bf16.msra.mxu1 %v6822_v60  ;;  %v184_v60 = vld [vmem:[#allocation5 + $0xb0] sm:$0xff] }
 0x152   :  { %3455 = vmatpush1.bf16.msra.mxu0 %v7076_v62  ;;  %3538 = vmatprep.subr.bf16.mxu1 %v6831_v63  ;;  %v6878_v62 = vcombine.low %v427_v46, %v431_v47  ;;  %v6624_v63 = vcombine.low %v172_v48, %v176_v50  ;;  %v6633_v4 = vcombine.high %v180_v58, %v184_v60  ;;  %v483_v46 = vld [vmem:[#allocation5 + $0xa08] sm:$0xff]  ;;  %v228_v48 = vld [vmem:[#allocation5 + $0x210] sm:$0xff] }
 0x153   :  { %3456 = vmatprep.subr.bf16.mxu0 %v7085_v3  ;;  %v188_v3 = vld [vmem:[#allocation5 + $0xd0] sm:$0xff]  ;;  %v487_v47 = vld [vmem:[#allocation5 + $0xa28] sm:$0xff] }
 0x154   :  { %v232_v50 = vld [vmem:[#allocation5 + $0x230] sm:$0xff] }
 0x155   :  { %3539 = vmatpush1.bf16.msra.mxu1 %v6830_v5  ;;  %v192_v5 = vld [vmem:[#allocation5 + $0xf0] sm:$0xff] }
 0x156   :  { %3457 = vmatpush1.bf16.msra.mxu0 %v7084_v6  ;;  %3540 = vmatprep.subr.bf16.mxu1 %v6839_v7  ;;  %v6886_v6 = vcombine.low %v435_v55, %v439_v56  ;;  %v6632_v7 = vcombine.low %v180_v58, %v184_v60  ;;  %v6641_v12 = vcombine.high %v188_v3, %v192_v5  ;;  %v491_v55 = vld [vmem:[#allocation5 + $0xa48] sm:$0xff]  ;;  %v236_v58 = vld [vmem:[#allocation5 + $0x250] sm:$0xff] }
 0x157   :  { %3458 = vmatprep.subr.bf16.mxu0 %v7093_v11  ;;  %v196_v11 = vld [vmem:[#allocation5 + $0x110] sm:$0xff]  ;;  %v495_v56 = vld [vmem:[#allocation5 + $0xa68] sm:$0xff] }
 0x158   :  { %v240_v60 = vld [vmem:[#allocation5 + $0x270] sm:$0xff] }
 0x159   :  { %3541 = vmatpush1.bf16.msra.mxu1 %v6838_v13  ;;  %v200_v13 = vld [vmem:[#allocation5 + $0x130] sm:$0xff] }
 0x15a   :  { %3459 = vmatpush1.bf16.msra.mxu0 %v7092_v14  ;;  %3542 = vmatprep.subr.bf16.mxu1 %v6847_v15  ;;  %v6894_v14 = vcombine.low %v443_v1, %v447_v2  ;;  %v6640_v15 = vcombine.low %v188_v3, %v192_v5  ;;  %v6649_v22 = vcombine.high %v196_v11, %v200_v13  ;;  %v499_v1 = vld [vmem:[#allocation5 + $0xa88] sm:$0xff]  ;;  %v244_v3 = vld [vmem:[#allocation5 + $0x290] sm:$0xff] }
 0x15b   :  { %3460 = vmatprep.subr.bf16.mxu0 %v7101_v20  ;;  %v204_v20 = vld [vmem:[#allocation5 + $0x150] sm:$0xff]  ;;  %v503_v2 = vld [vmem:[#allocation5 + $0xaa8] sm:$0xff] }
 0x15c   :  { %v248_v5 = vld [vmem:[#allocation5 + $0x2b0] sm:$0xff] }
 0x15d   :  { %3543 = vmatpush1.bf16.msra.mxu1 %v6846_v23  ;;  %v208_v23 = vld [vmem:[#allocation5 + $0x170] sm:$0xff] }
 0x15e   :  { %3461 = vmatpush1.bf16.msra.mxu0 %v7100_v24  ;;  %3544 = vmatprep.subr.bf16.mxu1 %v6855_v25  ;;  %v6902_v24 = vcombine.low %v451_v9, %v455_v10  ;;  %v6648_v25 = vcombine.low %v196_v11, %v200_v13  ;;  %v6657_v31 = vcombine.high %v204_v20, %v208_v23  ;;  %v507_v9 = vld [vmem:[#allocation5 + $0xac8] sm:$0xff]  ;;  %v252_v11 = vld [vmem:[#allocation5 + $0x2d0] sm:$0xff] }
 0x15f   :  { %3462 = vmatprep.subr.bf16.mxu0 %v7109_v30  ;;  %v212_v30 = vld [vmem:[#allocation5 + $0x190] sm:$0xff]  ;;  %v511_v10 = vld [vmem:[#allocation5 + $0xae8] sm:$0xff] }
 0x160   :  { %v256_v13 = vld [vmem:[#allocation5 + $0x2f0] sm:$0xff] }
 0x161   :  { %3545 = vmatpush1.bf16.msra.mxu1 %v6854_v32  ;;  %v216_v32 = vld [vmem:[#allocation5 + $0x1b0] sm:$0xff] }
 0x162   :  { %3463 = vmatpush1.bf16.msra.mxu0 %v7108_v33  ;;  %3546 = vmatprep.subr.bf16.mxu1 %v6863_v34  ;;  %v6910_v33 = vcombine.low %v459_v18, %v463_v19  ;;  %v6656_v34 = vcombine.low %v204_v20, %v208_v23  ;;  %v6665_v40 = vcombine.high %v212_v30, %v216_v32  ;;  %v515_v18 = vld [vmem:[#allocation5 + $0xb08] sm:$0xff]  ;;  %v260_v20 = vld [vmem:[#allocation5 + $0x310] sm:$0xff] }
 0x163   :  { %3464 = vmatprep.subr.bf16.mxu0 %v7117_v39  ;;  %v220_v39 = vld [vmem:[#allocation5 + $0x1d0] sm:$0xff]  ;;  %v519_v19 = vld [vmem:[#allocation5 + $0xb28] sm:$0xff] }
 0x164   :  { %v264_v23 = vld [vmem:[#allocation5 + $0x330] sm:$0xff] }
 0x165   :  { %3547 = vmatpush1.bf16.msra.mxu1 %v6862_v42  ;;  %v6918_v42 = vcombine.low %v467_v28, %v471_v29  ;;  %v523_v28 = vld [vmem:[#allocation5 + $0xb48] sm:$0xff] }
 0x166   :  { %3465 = vmatpush1.bf16.msra.mxu0 %v7116_v44  ;;  %3557 = vmatprep.subr.bf16.mxu1 %v6871_v45  ;;  %v6664_v44 = vcombine.low %v212_v30, %v216_v32  ;;  %v6927_v45 = vcombine.high %v475_v37, %v479_v38  ;;  %v527_v29 = vld [vmem:[#allocation5 + $0xb68] sm:$0xff]  ;;  %v268_v30 = vld [vmem:[#allocation5 + $0x350] sm:$0xff] }
 0x167   :  { %3639 = vmatprep.subr.bf16.mxu0 %v6617_v49  ;;  %v6673_v49 = vcombine.high %v220_v39, %v224_v41  ;;  %v272_v32 = vld [vmem:[#allocation5 + $0x370] sm:$0xff] }
 0x168   :  { %3549 = vmatmul.mubr.bf16.vlgmr.msra.gmra.mrb[4].mxu1 %v8505_v21 }
 0x169   :  { %3467 = vmatmul.mubr.bf16.vlgmr.msra.gmra.mrb[0].mxu0 %v8521_v51  ;;  %3558 = vmatpush1.bf16.msra.mxu1 %v6870_v52  ;;  %v6926_v52 = vcombine.low %v475_v37, %v479_v38  ;;  %v531_v37 = vld [vmem:[#allocation5 + $0xb88] sm:$0xff] }
 0x16a   :  { %3640 = vmatpush1.bf16.msra.mxu0 %v6616_v53  ;;  %3559 = vmatprep.subr.bf16.mxu1 %v6879_v54  ;;  %v6672_v53 = vcombine.low %v220_v39, %v224_v41  ;;  %v6935_v54 = vcombine.high %v483_v46, %v487_v47  ;;  %v535_v38 = vld [vmem:[#allocation5 + $0xba8] sm:$0xff]  ;;  %v276_v39 = vld [vmem:[#allocation5 + $0x390] sm:$0xff] }
 0x16b   :  { %3641 = vmatprep.subr.bf16.mxu0 %v6625_v59  ;;  %3589 = vmatprep.mubr.bf16.mxu1 %v8507_v27  ;;  %v6681_v59 = vcombine.high %v228_v48, %v232_v50  ;;  %v280_v41 = vld [vmem:[#allocation5 + $0x3b0] sm:$0xff] }
 0x16c   :  { %3671 = vmatprep.mubr.bf16.mxu0 %v8497_v57 }
 0x16d   :  { %3560 = vmatpush1.bf16.msra.mxu1 %v6878_v62  ;;  %v6934_v62 = vcombine.low %v483_v46, %v487_v47  ;;  %v6729_v46 = vcombine.high %v276_v39, %v280_v41  ;;  %v539_v47 = vld [vmem:[#allocation5 + $0xbc8] sm:$0xff] }
 0x16e   :  { %3642 = vmatpush1.bf16.msra.mxu0 %v6624_v63  ;;  %3561 = vmatprep.subr.bf16.mxu1 %v6887_v0  ;;  %v6680_v63 = vcombine.low %v228_v48, %v232_v50  ;;  %v6943_v0 = vcombine.high %v491_v55, %v495_v56  ;;  %v543_v48 = vld [vmem:[#allocation5 + $0xbe8] sm:$0xff]  ;;  %v288_v50 = vld [vmem:[#allocation5 + $0x3f0] sm:$0xff] }
 0x16f   :  { %3643 = vmatprep.subr.bf16.mxu0 %v6633_v4  ;;  %v6689_v4 = vcombine.high %v236_v58, %v240_v60 }
 0x171   :  { %3562 = vmatpush1.bf16.msra.mxu1 %v6886_v6  ;;  %v6942_v6 = vcombine.low %v491_v55, %v495_v56  ;;  %v547_v56 = vld [vmem:[#allocation5 + $0xc08] sm:$0xff] }
 0x172   :  { %3644 = vmatpush1.bf16.msra.mxu0 %v6632_v7  ;;  %3563 = vmatprep.subr.bf16.mxu1 %v6895_v8  ;;  %v6688_v7 = vcombine.low %v236_v58, %v240_v60  ;;  %v6951_v8 = vcombine.high %v499_v1, %v503_v2  ;;  %v551_v58 = vld [vmem:[#allocation5 + $0xc28] sm:$0xff]  ;;  %v296_v60 = vld [vmem:[#allocation5 + $0x430] sm:$0xff] }
 0x173   :  { %3645 = vmatprep.subr.bf16.mxu0 %v6641_v12  ;;  %v6697_v12 = vcombine.high %v244_v3, %v248_v5 }
 0x175   :  { %3564 = vmatpush1.bf16.msra.mxu1 %v6894_v14  ;;  %v6950_v14 = vcombine.low %v499_v1, %v503_v2  ;;  %v555_v2 = vld [vmem:[#allocation5 + $0xc48] sm:$0xff] }
 0x176   :  { %3646 = vmatpush1.bf16.msra.mxu0 %v6640_v15  ;;  %3565 = vmatprep.subr.bf16.mxu1 %v6903_v17  ;;  %v6696_v15 = vcombine.low %v244_v3, %v248_v5  ;;  %v6959_v17 = vcombine.high %v507_v9, %v511_v10  ;;  %v559_v3 = vld [vmem:[#allocation5 + $0xc68] sm:$0xff]  ;;  %v304_v5 = vld [vmem:[#allocation5 + $0x470] sm:$0xff] }
 0x177   :  { %3647 = vmatprep.subr.bf16.mxu0 %v6649_v22  ;;  %v6705_v22 = vcombine.high %v252_v11, %v256_v13 }
 0x179   :  { %3566 = vmatpush1.bf16.msra.mxu1 %v6902_v24  ;;  %v6958_v24 = vcombine.low %v507_v9, %v511_v10  ;;  %v563_v10 = vld [vmem:[#allocation5 + $0xc88] sm:$0xff] }
 0x17a   :  { %3648 = vmatpush1.bf16.msra.mxu0 %v6648_v25  ;;  %3567 = vmatprep.subr.bf16.mxu1 %v6911_v26  ;;  %v6704_v25 = vcombine.low %v252_v11, %v256_v13  ;;  %v6967_v26 = vcombine.high %v515_v18, %v519_v19  ;;  %v567_v11 = vld [vmem:[#allocation5 + $0xca8] sm:$0xff]  ;;  %v312_v13 = vld [vmem:[#allocation5 + $0x4b0] sm:$0xff] }
 0x17b   :  { %3649 = vmatprep.subr.bf16.mxu0 %v6657_v31  ;;  %v6713_v31 = vcombine.high %v260_v20, %v264_v23 }
 0x17d   :  { %3568 = vmatpush1.bf16.msra.mxu1 %v6910_v33  ;;  %v6966_v33 = vcombine.low %v515_v18, %v519_v19  ;;  %v571_v19 = vld [vmem:[#allocation5 + $0xcc8] sm:$0xff] }
 0x17e   :  { %3650 = vmatpush1.bf16.msra.mxu0 %v6656_v34  ;;  %3569 = vmatprep.subr.bf16.mxu1 %v6919_v36  ;;  %v6712_v34 = vcombine.low %v260_v20, %v264_v23  ;;  %v6975_v36 = vcombine.high %v523_v28, %v527_v29  ;;  %v575_v20 = vld [vmem:[#allocation5 + $0xce8] sm:$0xff]  ;;  %v320_v23 = vld [vmem:[#allocation5 + $0x4f0] sm:$0xff] }
 0x17f   :  { %3651 = vmatprep.subr.bf16.mxu0 %v6665_v40  ;;  %v6721_v40 = vcombine.high %v268_v30, %v272_v32 }
 0x181   :  { %3570 = vmatpush1.bf16.msra.mxu1 %v6918_v42  ;;  %v6974_v42 = vcombine.low %v523_v28, %v527_v29  ;;  %v579_v29 = vld [vmem:[#allocation5 + $0xd08] sm:$0xff] }
 0x182   :  { %3652 = vmatpush1.bf16.msra.mxu0 %v6664_v44  ;;  %3571 = vmatprep.subr.bf16.mxu1 %v6927_v45  ;;  %v6720_v44 = vcombine.low %v268_v30, %v272_v32  ;;  %v6983_v45 = vcombine.high %v531_v37, %v535_v38  ;;  %v583_v30 = vld [vmem:[#allocation5 + $0xd28] sm:$0xff]  ;;  %v328_v32 = vld [vmem:[#allocation5 + $0x530] sm:$0xff] }
 0x183   :  { %3653 = vmatprep.subr.bf16.mxu0 %v6673_v49  ;;  %v284_v49 = vld [vmem:[#allocation5 + $0x3d0] sm:$0xff] }
 0x184   :  { %v6737_v55 = vcombine.high %v284_v49, %v288_v50 }
 0x185   :  { %3572 = vmatpush1.bf16.msra.mxu1 %v6926_v52  ;;  %v6982_v52 = vcombine.low %v531_v37, %v535_v38  ;;  %v587_v38 = vld [vmem:[#allocation5 + $0xd48] sm:$0xff] }
 0x186   :  { %3654 = vmatpush1.bf16.msra.mxu0 %v6672_v53  ;;  %3573 = vmatprep.subr.bf16.mxu1 %v6935_v54  ;;  %v6728_v53 = vcombine.low %v276_v39, %v280_v41  ;;  %v6991_v54 = vcombine.high %v539_v47, %v543_v48  ;;  %v591_v39 = vld [vmem:[#allocation5 + $0xd68] sm:$0xff]  ;;  %v336_v41 = vld [vmem:[#allocation5 + $0x570] sm:$0xff] }
 0x187   :  { %3655 = vmatprep.subr.bf16.mxu0 %v6681_v59  ;;  %v292_v59 = vld [vmem:[#allocation5 + $0x410] sm:$0xff] }
 0x188   :  { %v6745_v1 = vcombine.high %v292_v59, %v296_v60 }
 0x189   :  { %3574 = vmatpush1.bf16.msra.mxu1 %v6934_v62  ;;  %v6990_v62 = vcombine.low %v539_v47, %v543_v48  ;;  %v595_v47 = vld [vmem:[#allocation5 + $0xd88] sm:$0xff] }
 0x18a   :  { %3656 = vmatpush1.bf16.msra.mxu0 %v6680_v63  ;;  %3575 = vmatprep.subr.bf16.mxu1 %v6943_v0  ;;  %v6736_v63 = vcombine.low %v284_v49, %v288_v50  ;;  %v6999_v0 = vcombine.high %v547_v56, %v551_v58  ;;  %v599_v48 = vld [vmem:[#allocation5 + $0xda8] sm:$0xff]  ;;  %v340_v49 = vld [vmem:[#allocation5 + $0x590] sm:$0xff] }
 0x18b   :  { %3657 = vmatprep.subr.bf16.mxu0 %v6689_v4  ;;  %v300_v4 = vld [vmem:[#allocation5 + $0x450] sm:$0xff] }
 0x18c   :  { %v6753_v9 = vcombine.high %v300_v4, %v304_v5  ;;  %v344_v50 = vld [vmem:[#allocation5 + $0x5b0] sm:$0xff] }
 0x18d   :  { %3576 = vmatpush1.bf16.msra.mxu1 %v6942_v6  ;;  %v6998_v6 = vcombine.low %v547_v56, %v551_v58  ;;  %v6793_v56 = vcombine.high %v340_v49, %v344_v50  ;;  %v603_v58 = vld [vmem:[#allocation5 + $0xdc8] sm:$0xff] }
 0x18e   :  { %3658 = vmatpush1.bf16.msra.mxu0 %v6688_v7  ;;  %3577 = vmatprep.subr.bf16.mxu1 %v6951_v8  ;;  %v6744_v7 = vcombine.low %v292_v59, %v296_v60  ;;  %v7007_v8 = vcombine.high %v555_v2, %v559_v3  ;;  %v607_v59 = vld [vmem:[#allocation5 + $0xde8] sm:$0xff] }
 0x18f   :  { %3659 = vmatprep.subr.bf16.mxu0 %v6697_v12  ;;  %v308_v12 = vld [vmem:[#allocation5 + $0x490] sm:$0xff] }
 0x190   :  { %v6761_v18 = vcombine.high %v308_v12, %v312_v13 }
 0x191   :  { %3578 = vmatpush1.bf16.msra.mxu1 %v6950_v14  ;;  %v7006_v14 = vcombine.low %v555_v2, %v559_v3  ;;  %v6792_v3 = vcombine.low %v340_v49, %v344_v50 }
 0x192   :  { %3660 = vmatpush1.bf16.msra.mxu0 %v6696_v15  ;;  %3579 = vmatprep.subr.bf16.mxu1 %v6959_v17  ;;  %v6752_v15 = vcombine.low %v300_v4, %v304_v5  ;;  %v7015_v17 = vcombine.high %v563_v10, %v567_v11  ;;  %v7055_v4 = vcombine.high %v603_v58, %v607_v59 }
 0x193   :  { %3661 = vmatprep.subr.bf16.mxu0 %v6705_v22  ;;  %v316_v22 = vld [vmem:[#allocation5 + $0x4d0] sm:$0xff] }
 0x194   :  { %v6769_v28 = vcombine.high %v316_v22, %v320_v23 }
 0x195   :  { %3580 = vmatpush1.bf16.msra.mxu1 %v6958_v24  ;;  %v7014_v24 = vcombine.low %v563_v10, %v567_v11  ;;  %v7054_v10 = vcombine.low %v603_v58, %v607_v59 }
 0x196   :  { %3662 = vmatpush1.bf16.msra.mxu0 %v6704_v25  ;;  %3581 = vmatprep.subr.bf16.mxu1 %v6967_v26  ;;  %v6760_v25 = vcombine.low %v308_v12, %v312_v13  ;;  %v7023_v26 = vcombine.high %v571_v19, %v575_v20 }
 0x197   :  { %3663 = vmatprep.subr.bf16.mxu0 %v6713_v31  ;;  %v324_v31 = vld [vmem:[#allocation5 + $0x510] sm:$0xff] }
 0x198   :  { %v6777_v37 = vcombine.high %v324_v31, %v328_v32 }
 0x199   :  { %3582 = vmatpush1.bf16.msra.mxu1 %v6966_v33  ;;  %v7022_v33 = vcombine.low %v571_v19, %v575_v20 }
 0x19a   :  { %3664 = vmatpush1.bf16.msra.mxu0 %v6712_v34  ;;  %3583 = vmatprep.subr.bf16.mxu1 %v6975_v36  ;;  %v6768_v34 = vcombine.low %v316_v22, %v320_v23  ;;  %v7031_v36 = vcombine.high %v579_v29, %v583_v30 }
 0x19b   :  { %3665 = vmatprep.subr.bf16.mxu0 %v6721_v40  ;;  %v332_v40 = vld [vmem:[#allocation5 + $0x550] sm:$0xff] }
 0x19d   :  { %3584 = vmatpush1.bf16.msra.mxu1 %v6974_v42  ;;  %v7030_v42 = vcombine.low %v579_v29, %v583_v30 }
 0x19e   :  { %3666 = vmatpush1.bf16.msra.mxu0 %v6720_v44  ;;  %3585 = vmatprep.subr.bf16.mxu1 %v6983_v45  ;;  %v6776_v44 = vcombine.low %v324_v31, %v328_v32  ;;  %v7039_v45 = vcombine.high %v587_v38, %v591_v39 }
 0x19f   :  { %3667 = vmatprep.subr.bf16.mxu0 %v6729_v46  ;;  %v6785_v46 = vcombine.high %v332_v40, %v336_v41 }
 0x1a1   :  { %3586 = vmatpush1.bf16.msra.mxu1 %v6982_v52  ;;  %v7038_v52 = vcombine.low %v587_v38, %v591_v39 }
 0x1a2   :  { %3668 = vmatpush1.bf16.msra.mxu0 %v6728_v53  ;;  %3587 = vmatprep.subr.bf16.mxu1 %v6991_v54  ;;  %v6784_v53 = vcombine.low %v332_v40, %v336_v41  ;;  %v7047_v54 = vcombine.high %v595_v47, %v599_v48 }
 0x1a3   :  { %3669 = vmatprep.subr.bf16.mxu0 %v6737_v55 }
 0x1a5   :  { %3588 = vmatpush1.bf16.msra.mxu1 %v6990_v62  ;;  %v348_v62 = vld [vmem:[#allocation5 + $0x5d0] sm:$0xff] }
 0x1a6   :  { %3670 = vmatpush1.bf16.msra.mxu0 %v6736_v63  ;;  %3598 = vmatprep.subr.bf16.mxu1 %v6999_v0  ;;  %v352_v63 = vld [vmem:[#allocation5 + $0x5f0] sm:$0xff] }
 0x1a7   :  { %3680 = vmatprep.subr.bf16.mxu0 %v6745_v1  ;;  %v7046_v1 = vcombine.low %v595_v47, %v599_v48  ;;  %v6801_v5 = vcombine.high %v348_v62, %v352_v63  ;;  %v6800_v11 = vcombine.low %v348_v62, %v352_v63 }
 0x1a8   :  { %3590 = vmatmul.mubr.bf16.vlgmr.msra.gmra.mrb[4].mxu1 %v8513_v35 }
 0x1a9   :  { %3599 = vmatpush1.bf16.msra.mxu1 %v6998_v6  ;;  %3672 = vmatmul.mubr.bf16.vlgmr.msra.gmra.mrb[4].mxu0 %v8503_v16  ;;  %v611_v6 = vld [vmem:[#allocation5 + $0xe08] sm:$0xff] }
 0x1aa   :  { %3681 = vmatpush1.bf16.msra.mxu0 %v6744_v7  ;;  %3600 = vmatprep.subr.bf16.mxu1 %v7007_v8  ;;  %v615_v7 = vld [vmem:[#allocation5 + $0xe28] sm:$0xff]  ;;  %v356_v8 = vld [vmem:[#allocation5 + $0x610] sm:$0xff] }
 0x1ab   :  { %3682 = vmatprep.subr.bf16.mxu0 %v6753_v9  ;;  %3630 = vmatprep.mubr.bf16.mxu1 %v8515_v43  ;;  %v360_v9 = vld [vmem:[#allocation5 + $0x630] sm:$0xff]  ;;  %v7063_v12 = vcombine.high %v611_v6, %v615_v7  ;;  %v7062_v19 = vcombine.low %v611_v6, %v615_v7 }
 0x1ac   :  { %3712 = vmatprep.mubr.bf16.mxu0 %v8499_v61  ;;  %v6809_v13 = vcombine.high %v356_v8, %v360_v9  ;;  %v6808_v20 = vcombine.low %v356_v8, %v360_v9  ;;  %v667_v8 = vld [vmem:[#allocation5 + $0xfc8] sm:$0xff] }
 0x1ad   :  { %3601 = vmatpush1.bf16.msra.mxu1 %v7006_v14  ;;  %v619_v14 = vld [vmem:[#allocation5 + $0xe48] sm:$0xff] }
 0x1ae   :  { %3683 = vmatpush1.bf16.msra.mxu0 %v6752_v15  ;;  %3602 = vmatprep.subr.bf16.mxu1 %v7015_v17  ;;  %v623_v15 = vld [vmem:[#allocation5 + $0xe68] sm:$0xff]  ;;  %v364_v17 = vld [vmem:[#allocation5 + $0x650] sm:$0xff] }
 0x1af   :  { %3684 = vmatprep.subr.bf16.mxu0 %v6761_v18  ;;  %v368_v18 = vld [vmem:[#allocation5 + $0x670] sm:$0xff]  ;;  %v7071_v22 = vcombine.high %v619_v14, %v623_v15  ;;  %v7070_v29 = vcombine.low %v619_v14, %v623_v15  ;;  %v671_v9 = vld [vmem:[#allocation5 + $0xfe8] sm:$0xff] }
 0x1b0   :  { %v6817_v23 = vcombine.high %v364_v17, %v368_v18  ;;  %v6816_v30 = vcombine.low %v364_v17, %v368_v18  ;;  %v7119_v14 = vcombine.high %v667_v8, %v671_v9  ;;  %v165_v17 = vld [vmem:[#allocation5 + $0x18] sm:$0xff] }
 0x1b1   :  { %3603 = vmatpush1.bf16.msra.mxu1 %v7014_v24  ;;  %v627_v24 = vld [vmem:[#allocation5 + $0xe88] sm:$0xff]  ;;  %v169_v18 = vld [vmem:[#allocation5 + $0x38] sm:$0xff] }
 0x1b2   :  { %3685 = vmatpush1.bf16.msra.mxu0 %v6760_v25  ;;  %3604 = vmatprep.subr.bf16.mxu1 %v7023_v26  ;;  %v631_v25 = vld [vmem:[#allocation5 + $0xea8] sm:$0xff]  ;;  %v372_v26 = vld [vmem:[#allocation5 + $0x690] sm:$0xff] }
 0x1b3   :  { %3686 = vmatprep.subr.bf16.mxu0 %v6769_v28  ;;  %v376_v28 = vld [vmem:[#allocation5 + $0x6b0] sm:$0xff]  ;;  %v7079_v31 = vcombine.high %v627_v24, %v631_v25  ;;  %v7078_v38 = vcombine.low %v627_v24, %v631_v25  ;;  %v6619_v24 = vcombine.high %v165_v17, %v169_v18 }
 0x1b4   :  { %v6825_v32 = vcombine.high %v372_v26, %v376_v28  ;;  %v6824_v39 = vcombine.low %v372_v26, %v376_v28  ;;  %v173_v26 = vld [vmem:[#allocation5 + $0x58] sm:$0xff] }
 0x1b5   :  { %3605 = vmatpush1.bf16.msra.mxu1 %v7022_v33  ;;  %v635_v33 = vld [vmem:[#allocation5 + $0xec8] sm:$0xff]  ;;  %v177_v28 = vld [vmem:[#allocation5 + $0x78] sm:$0xff] }
 0x1b6   :  { %3687 = vmatpush1.bf16.msra.mxu0 %v6768_v34  ;;  %3606 = vmatprep.subr.bf16.mxu1 %v7031_v36  ;;  %v639_v34 = vld [vmem:[#allocation5 + $0xee8] sm:$0xff]  ;;  %v380_v36 = vld [vmem:[#allocation5 + $0x6d0] sm:$0xff] }
 0x1b7   :  { %3688 = vmatprep.subr.bf16.mxu0 %v6777_v37  ;;  %v384_v37 = vld [vmem:[#allocation5 + $0x6f0] sm:$0xff]  ;;  %v7087_v40 = vcombine.high %v635_v33, %v639_v34  ;;  %v7086_v47 = vcombine.low %v635_v33, %v639_v34  ;;  %v6627_v33 = vcombine.high %v173_v26, %v177_v28 }
 0x1b8   :  { %v6833_v41 = vcombine.high %v380_v36, %v384_v37  ;;  %v6832_v48 = vcombine.low %v380_v36, %v384_v37  ;;  %v181_v36 = vld [vmem:[#allocation5 + $0x98] sm:$0xff] }
 0x1b9   :  { %3607 = vmatpush1.bf16.msra.mxu1 %v7030_v42  ;;  %v643_v42 = vld [vmem:[#allocation5 + $0xf08] sm:$0xff]  ;;  %v185_v37 = vld [vmem:[#allocation5 + $0xb8] sm:$0xff] }
 0x1ba   :  { %3689 = vmatpush1.bf16.msra.mxu0 %v6776_v44  ;;  %3608 = vmatprep.subr.bf16.mxu1 %v7039_v45  ;;  %v647_v44 = vld [vmem:[#allocation5 + $0xf28] sm:$0xff]  ;;  %v388_v45 = vld [vmem:[#allocation5 + $0x710] sm:$0xff] }
 0x1bb   :  { %v8531_v55 = vpop.f32.mrb[0].mxu1  ;;  %3690 = vmatprep.subr.bf16.mxu0 %v6785_v46  ;;  %v392_v46 = vld [vmem:[#allocation5 + $0x730] sm:$0xff]  ;;  %v7095_v49 = vcombine.high %v643_v42, %v647_v44  ;;  %v7094_v58 = vcombine.low %v643_v42, %v647_v44  ;;  %v6635_v42 = vcombine.high %v181_v36, %v185_v37 }
 0x1bc   :  { %v8533_v60 = vpop.f32.mrb[1].mxu1  ;;  %v6841_v50 = vcombine.high %v388_v45, %v392_v46  ;;  %v6840_v59 = vcombine.low %v388_v45, %v392_v46  ;;  %v189_v45 = vld [vmem:[#allocation5 + $0xd8] sm:$0xff] }
 0x1bd   :  { %v3349_v0 = vpop.f32.mrb[2].mxu1  ;;  %3609 = vmatpush1.bf16.msra.mxu1 %v7038_v52  ;;  %v651_v52 = vld [vmem:[#allocation5 + $0xf48] sm:$0xff]  ;;  %v193_v46 = vld [vmem:[#allocation5 + $0xf8] sm:$0xff] }
 0x1be   :  { %3691 = vmatpush1.bf16.msra.mxu0 %v6784_v53  ;;  %v3350_v2 = vpop.f32.mrb[3].mxu1  ;;  %3610 = vmatprep.subr.bf16.mxu1 %v7047_v54  ;;  %v655_v53 = vld [vmem:[#allocation5 + $0xf68] sm:$0xff]  ;;  %v396_v54 = vld [vmem:[#allocation5 + $0x750] sm:$0xff] }
 0x1bf   :  { %3692 = vmatprep.subr.bf16.mxu0 %v6793_v56  ;;  %v400_v56 = vld [vmem:[#allocation5 + $0x770] sm:$0xff]  ;;  %v7103_v62 = vcombine.high %v651_v52, %v655_v53  ;;  %v659_v0 = vld [vmem:[#allocation5 + $0xf88] sm:$0xff] }
 0x1c0   :  { %v6849_v63 = vcombine.high %v396_v54, %v400_v56  ;;  %v404_v2 = vld [vmem:[#allocation5 + $0x790] sm:$0xff] }
 0x1c1   :  { %3611 = vmatpush1.bf16.msra.mxu1 %v7046_v1  ;;  %v663_v1 = vld [vmem:[#allocation5 + $0xfa8] sm:$0xff] }
 0x1c2   :  { %3693 = vmatpush1.bf16.msra.mxu0 %v6792_v3  ;;  %3612 = vmatprep.subr.bf16.mxu1 %v7055_v4  ;;  %v408_v3 = vld [vmem:[#allocation5 + $0x7b0] sm:$0xff]  ;;  %v7102_v4 = vcombine.low %v651_v52, %v655_v53  ;;  %v7111_v6 = vcombine.high %v659_v0, %v663_v1  ;;  %v6643_v52 = vcombine.high %v189_v45, %v193_v46 }
 0x1c3   :  { %3694 = vmatprep.subr.bf16.mxu0 %v6801_v5  ;;  %v6848_v5 = vcombine.low %v396_v54, %v400_v56  ;;  %v6857_v7 = vcombine.high %v404_v2, %v408_v3  ;;  %v197_v54 = vld [vmem:[#allocation5 + $0x118] sm:$0xff] }
 0x1c4   :  { %v201_v56 = vld [vmem:[#allocation5 + $0x138] sm:$0xff] }
 0x1c5   :  { %3613 = vmatpush1.bf16.msra.mxu1 %v7054_v10  ;;  %v412_v10 = vld [vmem:[#allocation5 + $0x7d0] sm:$0xff] }
 0x1c6   :  { %3695 = vmatpush1.bf16.msra.mxu0 %v6800_v11  ;;  %3614 = vmatprep.subr.bf16.mxu1 %v7063_v12  ;;  %v416_v11 = vld [vmem:[#allocation5 + $0x7f0] sm:$0xff]  ;;  %v7110_v12 = vcombine.low %v659_v0, %v663_v1  ;;  %v6651_v0 = vcombine.high %v197_v54, %v201_v56  ;;  %v205_v1 = vld [vmem:[#allocation5 + $0x158] sm:$0xff] }
 0x1c7   :  { %3696 = vmatprep.subr.bf16.mxu0 %v6809_v13  ;;  %v6856_v13 = vcombine.low %v404_v2, %v408_v3  ;;  %v6865_v15 = vcombine.high %v412_v10, %v416_v11  ;;  %v209_v2 = vld [vmem:[#allocation5 + $0x178] sm:$0xff]  ;;  %v460_v3 = vld [vmem:[#allocation5 + $0x950] sm:$0xff] }
 0x1c9   :  { %3615 = vmatpush1.bf16.msra.mxu1 %v7062_v19  ;;  %v420_v19 = vld [vmem:[#allocation5 + $0x810] sm:$0xff] }
 0x1ca   :  { %3697 = vmatpush1.bf16.msra.mxu0 %v6808_v20  ;;  %3616 = vmatprep.subr.bf16.mxu1 %v7071_v22  ;;  %v424_v20 = vld [vmem:[#allocation5 + $0x830] sm:$0xff]  ;;  %v7118_v22 = vcombine.low %v667_v8, %v671_v9  ;;  %v213_v9 = vld [vmem:[#allocation5 + $0x198] sm:$0xff] }
 0x1cb   :  { %3698 = vmatprep.subr.bf16.mxu0 %v6817_v23  ;;  %v6864_v23 = vcombine.low %v412_v10, %v416_v11  ;;  %v6873_v25 = vcombine.high %v420_v19, %v424_v20  ;;  %v217_v10 = vld [vmem:[#allocation5 + $0x1b8] sm:$0xff]  ;;  %v468_v11 = vld [vmem:[#allocation5 + $0x990] sm:$0xff] }
 0x1cd   :  { %3617 = vmatpush1.bf16.msra.mxu1 %v7070_v29  ;;  %v428_v29 = vld [vmem:[#allocation5 + $0x850] sm:$0xff] }
 0x1ce   :  { %3699 = vmatpush1.bf16.msra.mxu0 %v6816_v30  ;;  %3618 = vmatprep.subr.bf16.mxu1 %v7079_v31  ;;  %v432_v30 = vld [vmem:[#allocation5 + $0x870] sm:$0xff]  ;;  %v6618_v31 = vcombine.low %v165_v17, %v169_v18  ;;  %v221_v18 = vld [vmem:[#allocation5 + $0x1d8] sm:$0xff] }
 0x1cf   :  { %3700 = vmatprep.subr.bf16.mxu0 %v6825_v32  ;;  %v6872_v32 = vcombine.low %v420_v19, %v424_v20  ;;  %v6881_v34 = vcombine.high %v428_v29, %v432_v30  ;;  %v225_v19 = vld [vmem:[#allocation5 + $0x1f8] sm:$0xff]  ;;  %v476_v20 = vld [vmem:[#allocation5 + $0x9d0] sm:$0xff] }
 0x1d1   :  { %3619 = vmatpush1.bf16.msra.mxu1 %v7078_v38  ;;  %v436_v38 = vld [vmem:[#allocation5 + $0x890] sm:$0xff] }
 0x1d2   :  { %3701 = vmatpush1.bf16.msra.mxu0 %v6824_v39  ;;  %3620 = vmatprep.subr.bf16.mxu1 %v7087_v40  ;;  %v440_v39 = vld [vmem:[#allocation5 + $0x8b0] sm:$0xff]  ;;  %v6626_v40 = vcombine.low %v173_v26, %v177_v28  ;;  %v229_v28 = vld [vmem:[#allocation5 + $0x218] sm:$0xff] }
 0x1d3   :  { %3702 = vmatprep.subr.bf16.mxu0 %v6833_v41  ;;  %v6880_v41 = vcombine.low %v428_v29, %v432_v30  ;;  %v6889_v44 = vcombine.high %v436_v38, %v440_v39  ;;  %v233_v29 = vld [vmem:[#allocation5 + $0x238] sm:$0xff]  ;;  %v484_v30 = vld [vmem:[#allocation5 + $0xa10] sm:$0xff] }
 0x1d5   :  { %3621 = vmatpush1.bf16.msra.mxu1 %v7086_v47  ;;  %v444_v47 = vld [vmem:[#allocation5 + $0x8d0] sm:$0xff] }
 0x1d6   :  { %3703 = vmatpush1.bf16.msra.mxu0 %v6832_v48  ;;  %3622 = vmatprep.subr.bf16.mxu1 %v7095_v49  ;;  %v448_v48 = vld [vmem:[#allocation5 + $0x8f0] sm:$0xff]  ;;  %v6634_v49 = vcombine.low %v181_v36, %v185_v37  ;;  %v237_v37 = vld [vmem:[#allocation5 + $0x258] sm:$0xff] }
 0x1d7   :  { %3704 = vmatprep.subr.bf16.mxu0 %v6841_v50  ;;  %v6888_v50 = vcombine.low %v436_v38, %v440_v39  ;;  %v6897_v53 = vcombine.high %v444_v47, %v448_v48  ;;  %v241_v38 = vld [vmem:[#allocation5 + $0x278] sm:$0xff]  ;;  %v492_v39 = vld [vmem:[#allocation5 + $0xa50] sm:$0xff] }
 0x1d9   :  { %3623 = vmatpush1.bf16.msra.mxu1 %v7094_v58  ;;  %v452_v58 = vld [vmem:[#allocation5 + $0x910] sm:$0xff] }
 0x1da   :  { %3705 = vmatpush1.bf16.msra.mxu0 %v6840_v59  ;;  %3624 = vmatprep.subr.bf16.mxu1 %v7103_v62  ;;  %v456_v59 = vld [vmem:[#allocation5 + $0x930] sm:$0xff]  ;;  %v6642_v62 = vcombine.low %v189_v45, %v193_v46  ;;  %v245_v46 = vld [vmem:[#allocation5 + $0x298] sm:$0xff] }
 0x1db   :  { %3706 = vmatprep.subr.bf16.mxu0 %v6849_v63  ;;  %v6896_v63 = vcombine.low %v444_v47, %v448_v48  ;;  %v249_v47 = vld [vmem:[#allocation5 + $0x2b8] sm:$0xff]  ;;  %v500_v48 = vld [vmem:[#allocation5 + $0xa90] sm:$0xff] }
 0x1dd   :  { %3625 = vmatpush1.bf16.msra.mxu1 %v7102_v4  ;;  %v464_v4 = vld [vmem:[#allocation5 + $0x970] sm:$0xff] }
 0x1de   :  { %3707 = vmatpush1.bf16.msra.mxu0 %v6848_v5  ;;  %3626 = vmatprep.subr.bf16.mxu1 %v7111_v6  ;;  %v6650_v5 = vcombine.low %v197_v54, %v201_v56  ;;  %v6904_v6 = vcombine.low %v452_v58, %v456_v59  ;;  %v6913_v8 = vcombine.high %v460_v3, %v464_v4  ;;  %v253_v56 = vld [vmem:[#allocation5 + $0x2d8] sm:$0xff] }
 0x1df   :  { %3708 = vmatprep.subr.bf16.mxu0 %v6857_v7  ;;  %v6659_v7 = vcombine.high %v205_v1, %v209_v2 }
 0x1e1   :  { %3627 = vmatpush1.bf16.msra.mxu1 %v7110_v12  ;;  %v472_v12 = vld [vmem:[#allocation5 + $0x9b0] sm:$0xff] }
 0x1e2   :  { %3709 = vmatpush1.bf16.msra.mxu0 %v6856_v13  ;;  %3628 = vmatprep.subr.bf16.mxu1 %v7119_v14  ;;  %v6658_v13 = vcombine.low %v205_v1, %v209_v2  ;;  %v6912_v14 = vcombine.low %v460_v3, %v464_v4  ;;  %v6921_v17 = vcombine.high %v468_v11, %v472_v12  ;;  %v261_v2 = vld [vmem:[#allocation5 + $0x318] sm:$0xff]  ;;  %v516_v4 = vld [vmem:[#allocation5 + $0xb10] sm:$0xff] }
 0x1e3   :  { %3710 = vmatprep.subr.bf16.mxu0 %v6865_v15  ;;  %v6667_v15 = vcombine.high %v213_v9, %v217_v10  ;;  %v265_v3 = vld [vmem:[#allocation5 + $0x338] sm:$0xff] }
 0x1e5   :  { %3629 = vmatpush1.bf16.msra.mxu1 %v7118_v22  ;;  %v480_v22 = vld [vmem:[#allocation5 + $0x9f0] sm:$0xff] }
 0x1e6   :  { %3711 = vmatpush1.bf16.msra.mxu0 %v6864_v23  ;;  %3803 = vmatprep.subr.bf16.mxu1 %v6619_v24  ;;  %v6666_v23 = vcombine.low %v213_v9, %v217_v10  ;;  %v6920_v24 = vcombine.low %v468_v11, %v472_v12  ;;  %v6929_v26 = vcombine.high %v476_v20, %v480_v22  ;;  %v269_v10 = vld [vmem:[#allocation5 + $0x358] sm:$0xff]  ;;  %v524_v12 = vld [vmem:[#allocation5 + $0xb50] sm:$0xff] }
 0x1e7   :  { %3721 = vmatprep.subr.bf16.mxu0 %v6873_v25  ;;  %v6675_v25 = vcombine.high %v221_v18, %v225_v19  ;;  %v273_v11 = vld [vmem:[#allocation5 + $0x378] sm:$0xff] }
 0x1e8   :  { %3631 = vmatmul.mubr.bf16.vlgmr.msra.gmra.mrb[4].mxu1 %v8521_v51 }
 0x1e9   :  { %3713 = vmatmul.mubr.bf16.vlgmr.msra.gmra.mrb[4].mxu0 %v8505_v21  ;;  %3804 = vmatpush1.bf16.msra.mxu1 %v6618_v31  ;;  %v488_v31 = vld [vmem:[#allocation5 + $0xa30] sm:$0xff] }
 0x1ea   :  { %3722 = vmatpush1.bf16.msra.mxu0 %v6872_v32  ;;  %3805 = vmatprep.subr.bf16.mxu1 %v6627_v33  ;;  %v6674_v32 = vcombine.low %v221_v18, %v225_v19  ;;  %v6928_v33 = vcombine.low %v476_v20, %v480_v22  ;;  %v6937_v36 = vcombine.high %v484_v30, %v488_v31  ;;  %v277_v19 = vld [vmem:[#allocation5 + $0x398] sm:$0xff]  ;;  %v532_v22 = vld [vmem:[#allocation5 + $0xb90] sm:$0xff] }
 0x1eb   :  { %3723 = vmatprep.subr.bf16.mxu0 %v6881_v34  ;;  %3753 = vmatprep.mubr.bf16.mxu0 %v8507_v27  ;;  %v6683_v34 = vcombine.high %v229_v28, %v233_v29  ;;  %v281_v20 = vld [vmem:[#allocation5 + $0x3b8] sm:$0xff] }
 0x1ec   :  { %3835 = vmatprep.mubr.bf16.mxu1 %v8497_v57  ;;  %v6905_v57 = vcombine.high %v452_v58, %v456_v59  ;;  %v257_v58 = vld [vmem:[#allocation5 + $0x2f8] sm:$0xff]  ;;  %v508_v59 = vld [vmem:[#allocation5 + $0xad0] sm:$0xff] }
 0x1ed   :  { %3806 = vmatpush1.bf16.msra.mxu1 %v6626_v40  ;;  %v496_v40 = vld [vmem:[#allocation5 + $0xa70] sm:$0xff] }
 0x1ee   :  { %3724 = vmatpush1.bf16.msra.mxu0 %v6880_v41  ;;  %3807 = vmatprep.subr.bf16.mxu1 %v6635_v42  ;;  %v6682_v41 = vcombine.low %v229_v28, %v233_v29  ;;  %v6936_v42 = vcombine.low %v484_v30, %v488_v31  ;;  %v6945_v45 = vcombine.high %v492_v39, %v496_v40  ;;  %v285_v29 = vld [vmem:[#allocation5 + $0x3d8] sm:$0xff]  ;;  %v540_v31 = vld [vmem:[#allocation5 + $0xbd0] sm:$0xff] }
 0x1ef   :  { %3725 = vmatprep.subr.bf16.mxu0 %v6889_v44  ;;  %v6691_v44 = vcombine.high %v237_v37, %v241_v38  ;;  %v289_v30 = vld [vmem:[#allocation5 + $0x3f8] sm:$0xff] }
 0x1f1   :  { %3808 = vmatpush1.bf16.msra.mxu1 %v6634_v49  ;;  %v504_v49 = vld [vmem:[#allocation5 + $0xab0] sm:$0xff] }
 0x1f2   :  { %3726 = vmatpush1.bf16.msra.mxu0 %v6888_v50  ;;  %3809 = vmatprep.subr.bf16.mxu1 %v6643_v52  ;;  %v6690_v50 = vcombine.low %v237_v37, %v241_v38  ;;  %v6944_v52 = vcombine.low %v492_v39, %v496_v40  ;;  %v6953_v54 = vcombine.high %v500_v48, %v504_v49  ;;  %v293_v38 = vld [vmem:[#allocation5 + $0x418] sm:$0xff]  ;;  %v548_v40 = vld [vmem:[#allocation5 + $0xc10] sm:$0xff] }
 0x1f3   :  { %3727 = vmatprep.subr.bf16.mxu0 %v6897_v53  ;;  %v6699_v53 = vcombine.high %v245_v46, %v249_v47  ;;  %v297_v39 = vld [vmem:[#allocation5 + $0x438] sm:$0xff] }
 0x1f5   :  { %3810 = vmatpush1.bf16.msra.mxu1 %v6642_v62  ;;  %v512_v62 = vld [vmem:[#allocation5 + $0xaf0] sm:$0xff] }
 0x1f6   :  { %3728 = vmatpush1.bf16.msra.mxu0 %v6896_v63  ;;  %3811 = vmatprep.subr.bf16.mxu1 %v6651_v0  ;;  %v6698_v63 = vcombine.low %v245_v46, %v249_v47  ;;  %v6952_v0 = vcombine.low %v500_v48, %v504_v49  ;;  %v6961_v1 = vcombine.high %v508_v59, %v512_v62  ;;  %v301_v47 = vld [vmem:[#allocation5 + $0x458] sm:$0xff]  ;;  %v556_v49 = vld [vmem:[#allocation5 + $0xc50] sm:$0xff] }
 0x1f7   :  { %3729 = vmatprep.subr.bf16.mxu0 %v6905_v57  ;;  %v6707_v57 = vcombine.high %v253_v56, %v257_v58  ;;  %v305_v48 = vld [vmem:[#allocation5 + $0x478] sm:$0xff] }
 0x1f9   :  { %3812 = vmatpush1.bf16.msra.mxu1 %v6650_v5  ;;  %v520_v5 = vld [vmem:[#allocation5 + $0xb30] sm:$0xff] }
 0x1fa   :  { %3730 = vmatpush1.bf16.msra.mxu0 %v6904_v6  ;;  %3813 = vmatprep.subr.bf16.mxu1 %v6659_v7  ;;  %v6706_v6 = vcombine.low %v253_v56, %v257_v58  ;;  %v6960_v7 = vcombine.low %v508_v59, %v512_v62  ;;  %v6969_v9 = vcombine.high %v516_v4, %v520_v5  ;;  %v679_v56 = vlaneseq  ;;  %v309_v59 = vld [vmem:[#allocation5 + $0x498] sm:$0xff] }
 0x1fb   :  { %3731 = vmatprep.subr.bf16.mxu0 %v6913_v8  ;;  %v6715_v8 = vcombine.high %v261_v2, %v265_v3  ;;  %v313_v62 = vld [vmem:[#allocation5 + $0x4b8] sm:$0xff] }
 0x1fd   :  { %3814 = vmatpush1.bf16.msra.mxu1 %v6658_v13  ;;  %v528_v13 = vld [vmem:[#allocation5 + $0xb70] sm:$0xff] }
 0x1fe   :  { %3732 = vmatpush1.bf16.msra.mxu0 %v6912_v14  ;;  %3815 = vmatprep.subr.bf16.mxu1 %v6667_v15  ;;  %v6714_v14 = vcombine.low %v261_v2, %v265_v3  ;;  %v6968_v15 = vcombine.low %v516_v4, %v520_v5  ;;  %v6977_v18 = vcombine.high %v524_v12, %v528_v13  ;;  %v8541_v3 = vshrl.u32 %v679_v56, 7  ;;  %v317_v5 = vld [vmem:[#allocation5 + $0x4d8] sm:$0xff]  ;;  %v608_v56 = vld [vmem:[#allocation5 + $0xdf0] sm:$0xff] }
 0x1ff   :  { %3733 = vmatprep.subr.bf16.mxu0 %v6921_v17  ;;  %v6723_v17 = vcombine.high %v269_v10, %v273_v11  ;;  %v6763_v2 = vcombine.high %v309_v59, %v313_v62 }
 0x201   :  { %3816 = vmatpush1.bf16.msra.mxu1 %v6666_v23  ;;  %v536_v23 = vld [vmem:[#allocation5 + $0xbb0] sm:$0xff] }
 0x202   :  { %3734 = vmatpush1.bf16.msra.mxu0 %v6920_v24  ;;  %3817 = vmatprep.subr.bf16.mxu1 %v6675_v25  ;;  %v6722_v24 = vcombine.low %v269_v10, %v273_v11  ;;  %v6976_v25 = vcombine.low %v524_v12, %v528_v13  ;;  %v6985_v28 = vcombine.high %v532_v22, %v536_v23  ;;  %v8548_v13 = vsub.s32 0, %v8541_v3 }
 0x203   :  { %3735 = vmatprep.subr.bf16.mxu0 %v6929_v26  ;;  %v6731_v26 = vcombine.high %v277_v19, %v281_v20 }
 0x205   :  { %3818 = vmatpush1.bf16.msra.mxu1 %v6674_v32  ;;  %v544_v32 = vld [vmem:[#allocation5 + $0xbf0] sm:$0xff] }
 0x206   :  { %3736 = vmatpush1.bf16.msra.mxu0 %v6928_v33  ;;  %3819 = vmatprep.subr.bf16.mxu1 %v6683_v34  ;;  %v6730_v33 = vcombine.low %v277_v19, %v281_v20  ;;  %v6984_v34 = vcombine.low %v532_v22, %v536_v23  ;;  %v6993_v37 = vcombine.high %v540_v31, %v544_v32  ;;  %v580_v19 = vld [vmem:[#allocation5 + $0xd10] sm:$0xff] }
 0x207   :  { %3737 = vmatprep.subr.bf16.mxu0 %v6937_v36  ;;  %v6739_v36 = vcombine.high %v285_v29, %v289_v30 }
 0x209   :  { %3820 = vmatpush1.bf16.msra.mxu1 %v6682_v41  ;;  %v552_v41 = vld [vmem:[#allocation5 + $0xc30] sm:$0xff] }
 0x20a   :  { %3738 = vmatpush1.bf16.msra.mxu0 %v6936_v42  ;;  %3821 = vmatprep.subr.bf16.mxu1 %v6691_v44  ;;  %v6738_v42 = vcombine.low %v285_v29, %v289_v30  ;;  %v6992_v44 = vcombine.low %v540_v31, %v544_v32  ;;  %v7001_v46 = vcombine.high %v548_v40, %v552_v41  ;;  %v588_v30 = vld [vmem:[#allocation5 + $0xd50] sm:$0xff] }
 0x20b   :  { %3739 = vmatprep.subr.bf16.mxu0 %v6945_v45  ;;  %v6747_v45 = vcombine.high %v293_v38, %v297_v39  ;;  %v592_v31 = vld [vmem:[#allocation5 + $0xd70] sm:$0xff] }
 0x20d   :  { %3822 = vmatpush1.bf16.msra.mxu1 %v6690_v50  ;;  %v560_v50 = vld [vmem:[#allocation5 + $0xc70] sm:$0xff] }
 0x20e   :  { %3740 = vmatpush1.bf16.msra.mxu0 %v6944_v52  ;;  %3823 = vmatprep.subr.bf16.mxu1 %v6699_v53  ;;  %v6746_v52 = vcombine.low %v293_v38, %v297_v39  ;;  %v7000_v53 = vcombine.low %v548_v40, %v552_v41  ;;  %v7009_v58 = vcombine.high %v556_v49, %v560_v50  ;;  %v341_v38 = vld [vmem:[#allocation5 + $0x598] sm:$0xff]  ;;  %v596_v41 = vld [vmem:[#allocation5 + $0xd90] sm:$0xff] }
 0x20f   :  { %3741 = vmatprep.subr.bf16.mxu0 %v6953_v54  ;;  %v6755_v54 = vcombine.high %v301_v47, %v305_v48  ;;  %v345_v39 = vld [vmem:[#allocation5 + $0x5b8] sm:$0xff] }
 0x211   :  { %3824 = vmatpush1.bf16.msra.mxu1 %v6698_v63  ;;  %v564_v63 = vld [vmem:[#allocation5 + $0xc90] sm:$0xff] }
 0x212   :  { %3742 = vmatpush1.bf16.msra.mxu0 %v6952_v0  ;;  %3825 = vmatprep.subr.bf16.mxu1 %v6707_v57  ;;  %v568_v0 = vld [vmem:[#allocation5 + $0xcb0] sm:$0xff]  ;;  %v6754_v57 = vcombine.low %v301_v47, %v305_v48 }
 0x213   :  { %3743 = vmatprep.subr.bf16.mxu0 %v6961_v1  ;;  %v7008_v1 = vcombine.low %v556_v49, %v560_v50  ;;  %v7017_v4 = vcombine.high %v564_v63, %v568_v0  ;;  %v7016_v10 = vcombine.low %v564_v63, %v568_v0  ;;  %v349_v49 = vld [vmem:[#allocation5 + $0x5d8] sm:$0xff] }
 0x214   :  { %v353_v50 = vld [vmem:[#allocation5 + $0x5f8] sm:$0xff] }
 0x215   :  { %3826 = vmatpush1.bf16.msra.mxu1 %v6706_v6  ;;  %v321_v6 = vld [vmem:[#allocation5 + $0x4f8] sm:$0xff] }
 0x216   :  { %3744 = vmatpush1.bf16.msra.mxu0 %v6960_v7  ;;  %3827 = vmatprep.subr.bf16.mxu1 %v6715_v8  ;;  %v674_v7 = vld [vmem:[#allocation7] sm:$0xff]  ;;  %v576_v8 = vld [vmem:[#allocation5 + $0xcf0] sm:$0xff]  ;;  %v6771_v11 = vcombine.high %v317_v5, %v321_v6  ;;  %v6770_v20 = vcombine.low %v317_v5, %v321_v6 }
 0x217   :  { %3745 = vmatprep.subr.bf16.mxu0 %v6969_v9  ;;  %v6762_v9 = vcombine.low %v309_v59, %v313_v62  ;;  %v8545_v12 = vunpack.c.l.bf16 %v674_v7  ;;  %v6794_v62 = vcombine.low %v341_v38, %v345_v39  ;;  %v612_v5 = vld [vmem:[#allocation5 + $0xe10] sm:$0xff]  ;;  %v6802_v7 = vcombine.low %v349_v49, %v353_v50 }
 0x218   :  { %v616_v6 = vld [vmem:[#allocation5 + $0xe30] sm:$0xff] }
 0x219   :  { %3828 = vmatpush1.bf16.msra.mxu1 %v6714_v14 }
 0x21a   :  { %3746 = vmatpush1.bf16.msra.mxu0 %v6968_v15  ;;  %3829 = vmatprep.subr.bf16.mxu1 %v6723_v17  ;;  %v325_v15 = vld [vmem:[#allocation5 + $0x518] sm:$0xff] }
 0x21b   :  { %3747 = vmatprep.subr.bf16.mxu0 %v6977_v18  ;;  %v329_v17 = vld [vmem:[#allocation5 + $0x538] sm:$0xff]  ;;  %v8551_v18 = vsub.s32 2, %v8541_v3 }
 0x21c   :  { %v6779_v23 = vcombine.high %v325_v15, %v329_v17  ;;  %v6778_v32 = vcombine.low %v325_v15, %v329_v17  ;;  %v624_v15 = vld [vmem:[#allocation5 + $0xe70] sm:$0xff] }
 0x21d   :  { %3830 = vmatpush1.bf16.msra.mxu1 %v6722_v24  ;;  %v682_v24 = vrot.slane %v8545_v12, %v8548_v13  ;;  %v686_v29 = vrot.slane %v8545_v12, %v8551_v18 }
 0x21e   :  { %3748 = vmatpush1.bf16.msra.mxu0 %v6976_v25  ;;  %3831 = vmatprep.subr.bf16.mxu1 %v6731_v26  ;;  %v333_v26 = vld [vmem:[#allocation5 + $0x558] sm:$0xff] }
 0x21f   :  { %3749 = vmatprep.subr.bf16.mxu0 %v6985_v28  ;;  %v337_v28 = vld [vmem:[#allocation5 + $0x578] sm:$0xff]  ;;  %v726_v40 = vrot.slane %v686_v29, %v8548_v13 }
 0x221   :  { %3832 = vmatpush1.bf16.msra.mxu1 %v6730_v33 }
 0x222   :  { %3750 = vmatpush1.bf16.msra.mxu0 %v6984_v34  ;;  %3833 = vmatprep.subr.bf16.mxu1 %v6739_v36  ;;  %v6787_v34 = vcombine.high %v333_v26, %v337_v28  ;;  %v722_v36 = vrot.slane %v682_v24, %v8548_v13  ;;  %v628_v24 = vld [vmem:[#allocation5 + $0xe90] sm:$0xff] }
 0x223   :  { %3751 = vmatprep.subr.bf16.mxu0 %v6993_v37  ;;  %v7041_v37 = vcombine.high %v588_v30, %v592_v31 }
 0x224   :  { %v3346_v47 = vadd.f32 %v8531_v55, %v722_v36  ;;  %v6803_v55 = vcombine.high %v349_v49, %v353_v50  ;;  %v397_v49 = vld [vmem:[#allocation5 + $0x758] sm:$0xff] }
 0x225   :  { %3834 = vmatpush1.bf16.msra.mxu1 %v6738_v42  ;;  %v600_v42 = vld [vmem:[#allocation5 + $0xdb0] sm:$0xff]  ;;  %v401_v50 = vld [vmem:[#allocation5 + $0x778] sm:$0xff] }
 0x226   :  { %3752 = vmatpush1.bf16.msra.mxu0 %v6992_v44  ;;  %3844 = vmatprep.subr.bf16.mxu1 %v6747_v45  ;;  %v6786_v44 = vcombine.low %v333_v26, %v337_v28  ;;  %v7040_v45 = vcombine.low %v588_v30, %v592_v31  ;;  %v7049_v48 = vcombine.high %v596_v41, %v600_v42  ;;  %v381_v31 = vld [vmem:[#allocation5 + $0x6d8] sm:$0xff] }
 0x227   :  { %3762 = vmatprep.subr.bf16.mxu0 %v7001_v46  ;;  %v6795_v46 = vcombine.high %v341_v38, %v345_v39 }
 0x228   :  { %3836 = vmatmul.mubr.bf16.vlgmr.msra.gmra.mrb[8].mxu1 %v8503_v16  ;;  %v572_v16 = vld [vmem:[#allocation5 + $0xcd0] sm:$0xff] }
 0x229   :  { %3754 = vmatmul.mubr.bf16.vlgmr.msra.gmra.mrb[4].mxu0 %v8513_v35  ;;  %3845 = vmatpush1.bf16.msra.mxu1 %v6746_v52  ;;  %v7025_v14 = vcombine.high %v572_v16, %v576_v8  ;;  %v7024_v22 = vcombine.low %v572_v16, %v576_v8  ;;  %v3348_v52 = vadd.f32 %v8533_v60, %v726_v40  ;;  %v361_v60 = vld [vmem:[#allocation5 + $0x638] sm:$0xff] }
 0x22a   :  { %3763 = vmatpush1.bf16.msra.mxu0 %v7000_v53  ;;  %3846 = vmatprep.subr.bf16.mxu1 %v6755_v54  ;;  %v604_v54 = vld [vmem:[#allocation5 + $0xdd0] sm:$0xff]  ;;  %v389_v40 = vld [vmem:[#allocation5 + $0x718] sm:$0xff] }
 0x22b   :  { %3764 = vmatprep.subr.bf16.mxu0 %v7009_v58  ;;  %3794 = vmatprep.mubr.bf16.mxu0 %v8515_v43  ;;  %v7056_v16 = vcombine.low %v604_v54, %v608_v56 }
 0x22c   :  { %3876 = vmatprep.mubr.bf16.mxu1 %v8499_v61  ;;  %v584_v61 = vld [vmem:[#allocation5 + $0xd30] sm:$0xff] }
 0x22d   :  { %3847 = vmatpush1.bf16.msra.mxu1 %v6754_v57  ;;  %v7033_v25 = vcombine.high %v580_v19, %v584_v61  ;;  %v7032_v33 = vcombine.low %v580_v19, %v584_v61  ;;  %v7048_v57 = vcombine.low %v596_v41, %v600_v42  ;;  %v7064_v19 = vcombine.low %v612_v5, %v616_v6  ;;  %v393_v41 = vld [vmem:[#allocation5 + $0x738] sm:$0xff]  ;;  %v644_v42 = vld [vmem:[#allocation5 + $0xf10] sm:$0xff] }
 0x22e   :  { %3765 = vmatpush1.bf16.msra.mxu0 %v7008_v1  ;;  %3848 = vmatprep.subr.bf16.mxu1 %v6763_v2  ;;  %v7057_v2 = vcombine.high %v604_v54, %v608_v56  ;;  %v6842_v54 = vcombine.low %v389_v40, %v393_v41 }
 0x22f   :  { %3766 = vmatprep.subr.bf16.mxu0 %v7017_v4  ;;  %v357_v4 = vld [vmem:[#allocation5 + $0x618] sm:$0xff] }
 0x230   :  { %v6811_v8 = vcombine.high %v357_v4, %v361_v60  ;;  %v6810_v17 = vcombine.low %v357_v4, %v361_v60 }
 0x231   :  { %3849 = vmatpush1.bf16.msra.mxu1 %v6762_v9  ;;  %v7065_v9 = vcombine.high %v612_v5, %v616_v6  ;;  %v413_v6 = vld [vmem:[#allocation5 + $0x7d8] sm:$0xff] }
 0x232   :  { %3767 = vmatpush1.bf16.msra.mxu0 %v7016_v10  ;;  %3850 = vmatprep.subr.bf16.mxu1 %v6771_v11  ;;  %v365_v10 = vld [vmem:[#allocation5 + $0x658] sm:$0xff] }
 0x233   :  { %3768 = vmatprep.subr.bf16.mxu0 %v7025_v14  ;;  %v369_v11 = vld [vmem:[#allocation5 + $0x678] sm:$0xff]  ;;  %v620_v14 = vld [vmem:[#allocation5 + $0xe50] sm:$0xff] }
 0x234   :  { %v6819_v61 = vcombine.high %v365_v10, %v369_v11  ;;  %v6818_v26 = vcombine.low %v365_v10, %v369_v11  ;;  %v7072_v28 = vcombine.low %v620_v14, %v624_v15 }
 0x235   :  { %3851 = vmatpush1.bf16.msra.mxu1 %v6770_v20  ;;  %v7073_v20 = vcombine.high %v620_v14, %v624_v15  ;;  %v421_v15 = vld [vmem:[#allocation5 + $0x818] sm:$0xff] }
 0x236   :  { %3769 = vmatpush1.bf16.msra.mxu0 %v7024_v22  ;;  %3852 = vmatprep.subr.bf16.mxu1 %v6779_v23  ;;  %v373_v22 = vld [vmem:[#allocation5 + $0x698] sm:$0xff] }
 0x237   :  { %3770 = vmatprep.subr.bf16.mxu0 %v7033_v25  ;;  %v377_v23 = vld [vmem:[#allocation5 + $0x6b8] sm:$0xff]  ;;  %v632_v25 = vld [vmem:[#allocation5 + $0xeb0] sm:$0xff] }
 0x238   :  { %v6827_v29 = vcombine.high %v373_v22, %v377_v23  ;;  %v7081_v30 = vcombine.high %v628_v24, %v632_v25  ;;  %v6826_v36 = vcombine.low %v373_v22, %v377_v23  ;;  %v7590_v23 = vld [vmem:[#allocation8 + $0x4] ss:$16 sps:$4 sm:$0xff]  }
 0x239   :  { %3853 = vmatpush1.bf16.msra.mxu1 %v6778_v32  ;;  %v385_v32 = vld [vmem:[#allocation5 + $0x6f8] sm:$0xff] }
 0x23a   :  { %3771 = vmatpush1.bf16.msra.mxu0 %v7032_v33  ;;  %3854 = vmatprep.subr.bf16.mxu1 %v6787_v34  ;;  %v636_v33 = vld [vmem:[#allocation5 + $0xed0] sm:$0xff]  ;;  %v6835_v38 = vcombine.high %v381_v31, %v385_v32 }
 0x23b   :  { %3772 = vmatprep.subr.bf16.mxu0 %v7041_v37  ;;  %v640_v34 = vld [vmem:[#allocation5 + $0xef0] sm:$0xff]  ;;  %v7080_v37 = vcombine.low %v628_v24, %v632_v25  ;;  %v429_v24 = vld [vmem:[#allocation5 + $0x858] sm:$0xff] }
 0x23c   :  { %v3468_v53 = vpop.f32.mrb[0].mxu0  ;;  %v7089_v39 = vcombine.high %v636_v33, %v640_v34  ;;  %v433_v25 = vld [vmem:[#allocation5 + $0x878] sm:$0xff] }
 0x23d   :  { %v8561_v58 = vadd.f32 %v3468_v53, %v3346_v47  ;;  %v3470_v59 = vpop.f32.mrb[1].mxu0  ;;  %3855 = vmatpush1.bf16.msra.mxu1 %v6786_v44  ;;  %v648_v44 = vld [vmem:[#allocation5 + $0xf30] sm:$0xff]  ;;  %v6843_v47 = vcombine.high %v389_v40, %v393_v41  ;;  %v449_v40 = vld [vmem:[#allocation5 + $0x8f8] sm:$0xff] }
 0x23e   :  { %v8563_v63 = vadd.f32 %v3470_v59, %v3348_v52  ;;  %v3472_v0 = vpop.f32.mrb[2].mxu0  ;;  %3773 = vmatpush1.bf16.msra.mxu0 %v7040_v45  ;;  %3856 = vmatprep.subr.bf16.mxu1 %v6795_v46  ;;  %v6834_v45 = vcombine.low %v381_v31, %v385_v32  ;;  %v7088_v46 = vcombine.low %v636_v33, %v640_v34  ;;  %v652_v52 = vld [vmem:[#allocation5 + $0xf50] sm:$0xff]  ;;  %v7593_v31 = vld [vmem:[#allocation8 + $0x24] ss:$16 sps:$4 sm:$0xff]   ;;  %v7594_v41 = vld [vmem:[#allocation8 + $0x40] ss:$16 sps:$4 sm:$0xff]  }
 0x23f   :  { %v3473_v1 = vpop.f32.mrb[3].mxu0  ;;  %3774 = vmatprep.subr.bf16.mxu0 %v7049_v48  ;;  %v7097_v48 = vcombine.high %v644_v42, %v648_v44  ;;  %v656_v53 = vld [vmem:[#allocation5 + $0xf70] sm:$0xff]  ;;  %v7096_v56 = vcombine.low %v644_v42, %v648_v44  ;;  %v6851_v59 = vcombine.high %v397_v49, %v401_v50  ;;  %v405_v0 = vld [vmem:[#allocation5 + $0x798] sm:$0xff]  ;;  %vm3967_vm1 = vcmp.ge.f32.partialorder %v8561_v58, 0.0 }
 0x240   :  { %v664_v1 = vld [vmem:[#allocation5 + $0xfb0] sm:$0xff]  ;;  %v7104_v4 = vcombine.low %v652_v52, %v656_v53  ;;  %vm3968_vm0 = vcmp.ge.f32.partialorder %v8563_v63, 0.0  ;;  %v437_v32 = vld [vmem:[#allocation5 + $0x898] sm:$0xff] }
 0x241   :  { %3857 = vmatpush1.bf16.msra.mxu1 %v6794_v62  ;;  %v7105_v62 = vcombine.high %v652_v52, %v656_v53  ;;  %v441_v33 = vld [vmem:[#allocation5 + $0x8b8] sm:$0xff] }
 0x242   :  { %3775 = vmatpush1.bf16.msra.mxu0 %v7048_v57  ;;  %3858 = vmatprep.subr.bf16.mxu1 %v6803_v55  ;;  %v409_v57 = vld [vmem:[#allocation5 + $0x7b8] sm:$0xff]  ;;  %v660_v55 = vld [vmem:[#allocation5 + $0xf90] sm:$0xff] }
 0x243   :  { %3776 = vmatprep.subr.bf16.mxu0 %v7057_v2  ;;  %v6850_v2 = vcombine.low %v397_v49, %v401_v50  ;;  %v6859_v60 = vcombine.high %v405_v0, %v409_v57  ;;  %v7113_v5 = vcombine.high %v660_v55, %v664_v1  ;;  %v7112_v10 = vcombine.low %v660_v55, %v664_v1  ;;  %v7599_v44 = vld [vmem:[#allocation8 + $0x64] ss:$16 sps:$4 sm:$0xff]   ;;  %v7603_v55 = vld [vmem:[#allocation8 + $0xa0] ss:$16 sps:$4 sm:$0xff]  }
 0x244   :  { %v7602_v50 = vld [vmem:[#allocation8 + $0x84] ss:$16 sps:$4 sm:$0xff]  }
 0x245   :  { %3859 = vmatpush1.bf16.msra.mxu1 %v6802_v7  ;;  %v417_v7 = vld [vmem:[#allocation5 + $0x7f8] sm:$0xff] }
 0x246   :  { %3777 = vmatpush1.bf16.msra.mxu0 %v7056_v16  ;;  %3860 = vmatprep.subr.bf16.mxu1 %v6811_v8  ;;  %v668_v16 = vld [vmem:[#allocation5 + $0xfd0] sm:$0xff]  ;;  %v6867_v11 = vcombine.high %v413_v6, %v417_v7  ;;  %v461_v52 = vld [vmem:[#allocation5 + $0x958] sm:$0xff] }
 0x247   :  { %3778 = vmatprep.subr.bf16.mxu0 %v7065_v9  ;;  %v672_v8 = vld [vmem:[#allocation5 + $0xff0] sm:$0xff]  ;;  %v6858_v9 = vcombine.low %v405_v0, %v409_v57  ;;  %v473_v0 = vld [vmem:[#allocation5 + $0x9b8] sm:$0xff] }
 0x248   :  { %v7121_v14 = vcombine.high %v668_v16, %v672_v8 }
 0x249   :  { %3861 = vmatpush1.bf16.msra.mxu1 %v6810_v17  ;;  %v425_v17 = vld [vmem:[#allocation5 + $0x838] sm:$0xff] }
 0x24a   :  { %3779 = vmatpush1.bf16.msra.mxu0 %v7064_v19  ;;  %3862 = vmatprep.subr.bf16.mxu1 %v6819_v61  ;;  %v3976_v19 = vmul.f32 0.2, %v8563_v63  ;;  %v6866_v61 = vcombine.low %v413_v6, %v417_v7  ;;  %v6875_v22 = vcombine.high %v421_v15, %v425_v17  ;;  %v7606_v6 = vld [vmem:[#allocation8 + $0xc0] ss:$16 sps:$4 sm:$0xff]  }
 0x24b   :  { %3780 = vmatprep.subr.bf16.mxu0 %v7073_v20  ;;  %v7120_v20 = vcombine.low %v668_v16, %v672_v8  ;;  %v7611_v16 = vld [vmem:[#allocation8 + $0xe4] ss:$16 sps:$4 sm:$0xff]  }
 0x24c   :  { %v485_v8 = vld [vmem:[#allocation5 + $0xa18] sm:$0xff] }
 0x24d   :  { %3863 = vmatpush1.bf16.msra.mxu1 %v6818_v26  ;;  %v6874_v26 = vcombine.low %v421_v15, %v425_v17  ;;  %v7614_v15 = vld [vmem:[#allocation8 + $0x104] ss:$16 sps:$4 sm:$0xff]  }
 0x24e   :  { %3781 = vmatpush1.bf16.msra.mxu0 %v7072_v28  ;;  %3864 = vmatprep.subr.bf16.mxu1 %v6827_v29  ;;  %v3984_v28 = vsel %vm3968_vm0, %v8563_v63, %v3976_v19  ;;  %v7588_v29 = vld [vmem:[#allocation8] ss:$16 sps:$4 sm:$0xff]  }
 0x24f   :  { %3782 = vmatprep.subr.bf16.mxu0 %v7081_v30  ;;  %v6883_v30 = vcombine.high %v429_v24, %v433_v25  ;;  %v8569_v34 = vpack.c.bf16 %v3984_v28, %v3984_v28  ;;  %v7591_v63 = vld [vmem:[#allocation8 + $0x20] ss:$16 sps:$4 sm:$0xff]  }
 0x250   :  { %v493_v17 = vld [vmem:[#allocation5 + $0xa58] sm:$0xff] }
 0x251   :  { %3865 = vmatpush1.bf16.msra.mxu1 %v6826_v36  ;;  %v6882_v36 = vcombine.low %v429_v24, %v433_v25  ;;  %v497_v19 = vld [vmem:[#allocation5 + $0xa78] sm:$0xff] }
 0x252   :  { %3783 = vmatpush1.bf16.msra.mxu0 %v7080_v37  ;;  %3866 = vmatprep.subr.bf16.mxu1 %v6835_v38  ;;  %v6891_v37 = vcombine.high %v437_v32, %v441_v33  ;;  %v7596_v38 = vld [vmem:[#allocation8 + $0x44] ss:$16 sps:$4 sm:$0xff]   ;;  %v7615_v28 = vld [vmem:[#allocation8 + $0x120] ss:$16 sps:$4 sm:$0xff]  }
 0x253   :  { %3784 = vmatprep.subr.bf16.mxu0 %v7089_v39  ;;  %v445_v39 = vld [vmem:[#allocation5 + $0x8d8] sm:$0xff] }
 0x254   :  { %v6899_v42 = vcombine.high %v445_v39, %v449_v40  ;;  %v501_v24 = vld [vmem:[#allocation5 + $0xa98] sm:$0xff] }
 0x255   :  { %3867 = vmatpush1.bf16.msra.mxu1 %v6834_v45  ;;  %v453_v45 = vld [vmem:[#allocation5 + $0x918] sm:$0xff] }
 0x256   :  { %3785 = vmatpush1.bf16.msra.mxu0 %v7088_v46  ;;  %3868 = vmatprep.subr.bf16.mxu1 %v6843_v47  ;;  %v457_v46 = vld [vmem:[#allocation5 + $0x938] sm:$0xff]  ;;  %v6898_v47 = vcombine.low %v445_v39, %v449_v40 }
 0x257   :  { %3786 = vmatprep.subr.bf16.mxu0 %v7097_v48  ;;  %v7597_v48 = vld [vmem:[#allocation8 + $0x60] ss:$16 sps:$4 sm:$0xff]   ;;  %v6907_v49 = vcombine.high %v453_v45, %v457_v46  ;;  %v6906_v53 = vcombine.low %v453_v45, %v457_v46 }
 0x258   :  { %v505_v25 = vld [vmem:[#allocation5 + $0xab8] sm:$0xff] }
 0x259   :  { %3869 = vmatpush1.bf16.msra.mxu1 %v6842_v54  ;;  %v7600_v54 = vld [vmem:[#allocation8 + $0x80] ss:$16 sps:$4 sm:$0xff]  }
 0x25a   :  { %3787 = vmatpush1.bf16.msra.mxu0 %v7096_v56  ;;  %3870 = vmatprep.subr.bf16.mxu1 %v6851_v59  ;;  %v7605_v59 = vld [vmem:[#allocation8 + $0xa4] ss:$16 sps:$4 sm:$0xff]  }
 0x25b   :  { %3788 = vmatprep.subr.bf16.mxu0 %v7105_v62  ;;  %v469_v62 = vld [vmem:[#allocation5 + $0x998] sm:$0xff] }
 0x25c   :  { %v6923_v1 = vcombine.high %v469_v62, %v473_v0  ;;  %v521_v39 = vld [vmem:[#allocation5 + $0xb38] sm:$0xff] }
 0x25d   :  { %3871 = vmatpush1.bf16.msra.mxu1 %v6850_v2  ;;  %v7608_v2 = vld [vmem:[#allocation8 + $0xc4] ss:$16 sps:$4 sm:$0xff]  }
 0x25e   :  { %3789 = vmatpush1.bf16.msra.mxu0 %v7104_v4  ;;  %3872 = vmatprep.subr.bf16.mxu1 %v6859_v60  ;;  %v477_v4 = vld [vmem:[#allocation5 + $0x9d8] sm:$0xff] }
 0x25f   :  { %3790 = vmatprep.subr.bf16.mxu0 %v7113_v5  ;;  %v481_v60 = vld [vmem:[#allocation5 + $0x9f8] sm:$0xff]  ;;  %v6922_v5 = vcombine.low %v469_v62, %v473_v0 }
 0x260   :  { %v6931_v7 = vcombine.high %v477_v4, %v481_v60  ;;  %v529_v45 = vld [vmem:[#allocation5 + $0xb78] sm:$0xff] }
 0x261   :  { %3873 = vmatpush1.bf16.msra.mxu1 %v6858_v9  ;;  %v489_v9 = vld [vmem:[#allocation5 + $0xa38] sm:$0xff] }
 0x262   :  { %3791 = vmatpush1.bf16.msra.mxu0 %v7112_v10  ;;  %3874 = vmatprep.subr.bf16.mxu1 %v6867_v11  ;;  %v6930_v10 = vcombine.low %v477_v4, %v481_v60  ;;  %v7609_v11 = vld [vmem:[#allocation8 + $0xe0] ss:$16 sps:$4 sm:$0xff]   ;;  %v3975_v60 = vmul.f32 0.2, %v8561_v58 }
 0x263   :  { %3792 = vmatprep.subr.bf16.mxu0 %v7121_v14  ;;  %v6939_v14 = vcombine.high %v485_v8, %v489_v9  ;;  %v545_v62 = vld [vmem:[#allocation5 + $0xbf8] sm:$0xff] }
 0x264   :  { %v553_v4 = vld [vmem:[#allocation5 + $0xc38] sm:$0xff] }
 0x265   :  { %3875 = vmatpush1.bf16.msra.mxu1 %v6866_v61  ;;  %v6938_v61 = vcombine.low %v485_v8, %v489_v9  ;;  %v557_v8 = vld [vmem:[#allocation5 + $0xc58] sm:$0xff] }
 0x266   :  { %3793 = vmatpush1.bf16.msra.mxu0 %v7120_v20  ;;  %3885 = vmatprep.subr.bf16.mxu1 %v6875_v22  ;;  %v7612_v20 = vld [vmem:[#allocation8 + $0x100] ss:$16 sps:$4 sm:$0xff]   ;;  %v6947_v22 = vcombine.high %v493_v17, %v497_v19 }
 0x267   :  { %5574 = vmatprep.subr.bf16.mxu0 %v7590_v23  ;;  %v7617_v23 = vld [vmem:[#allocation8 + $0x124] ss:$16 sps:$4 sm:$0xff]  }
 0x268   :  { %3877 = vmatmul.mubr.bf16.vlgmr.msra.gmra.mrb[8].mxu1 %v8505_v21  ;;  %v6890_v21 = vcombine.low %v437_v32, %v441_v33  ;;  %v513_v32 = vld [vmem:[#allocation5 + $0xaf8] sm:$0xff]  ;;  %v6954_v33 = vcombine.low %v501_v24, %v505_v25 }
 0x269   :  { %3795 = vmatmul.mubr.bf16.vlgmr.msra.gmra.mrb[4].mxu0 %v8521_v51  ;;  %3886 = vmatpush1.bf16.msra.mxu1 %v6874_v26  ;;  %v6946_v26 = vcombine.low %v493_v17, %v497_v19  ;;  %v561_v9 = vld [vmem:[#allocation5 + $0xc78] sm:$0xff] }
 0x26a   :  { %5575 = vmatpush1.bf16.msra.mxu0 %v7588_v29  ;;  %5606 = vmatprep.mubr.bf16.mxu0 %v8569_v34  ;;  %v6955_v29 = vcombine.high %v501_v24, %v505_v25  ;;  %v7641_v19 = vld [vmem:[#allocation8 + $0x224] ss:$16 sps:$4 sm:$0xff]  }
 0x26b   :  { %3887 = vmatprep.subr.bf16.mxu1 %v6883_v30  ;;  %5576 = vmatprep.subr.bf16.mxu0 %v7593_v31  ;;  %v7620_v30 = vld [vmem:[#allocation8 + $0x144] ss:$16 sps:$4 sm:$0xff]  }
 0x26c   :  { %3917 = vmatprep.mubr.bf16.mxu1 %v8507_v27  ;;  %v465_v27 = vld [vmem:[#allocation5 + $0x978] sm:$0xff] }
 0x26d   :  { %3888 = vmatpush1.bf16.msra.mxu1 %v6882_v36  ;;  %v6915_v56 = vcombine.high %v461_v52, %v465_v27  ;;  %v6914_v57 = vcombine.low %v461_v52, %v465_v27  ;;  %v509_v31 = vld [vmem:[#allocation5 + $0xad8] sm:$0xff] }
 0x26e   :  { %5577 = vmatpush1.bf16.msra.mxu0 %v7591_v63  ;;  %3889 = vmatprep.subr.bf16.mxu1 %v6891_v37  ;;  %v7618_v36 = vld [vmem:[#allocation8 + $0x140] ss:$16 sps:$4 sm:$0xff]   ;;  %v6963_v63 = vcombine.high %v509_v31, %v513_v32  ;;  %v7623_v37 = vld [vmem:[#allocation8 + $0x164] ss:$16 sps:$4 sm:$0xff]   ;;  %v6962_v40 = vcombine.low %v509_v31, %v513_v32 }
 0x26f   :  { %5578 = vmatprep.subr.bf16.mxu0 %v7596_v38  ;;  %v517_v38 = vld [vmem:[#allocation5 + $0xb18] sm:$0xff] }
 0x270   :  { %v6970_v46 = vcombine.low %v517_v38, %v521_v39  ;;  %v537_v52 = vld [vmem:[#allocation5 + $0xbb8] sm:$0xff] }
 0x271   :  { %3890 = vmatpush1.bf16.msra.mxu1 %v6890_v21  ;;  %v7621_v21 = vld [vmem:[#allocation8 + $0x160] ss:$16 sps:$4 sm:$0xff]   ;;  %v7644_v24 = vld [vmem:[#allocation8 + $0x244] ss:$16 sps:$4 sm:$0xff]  }
 0x272   :  { %5579 = vmatpush1.bf16.msra.mxu0 %v7594_v41  ;;  %3891 = vmatprep.subr.bf16.mxu1 %v6899_v42  ;;  %v6971_v41 = vcombine.high %v517_v38, %v521_v39  ;;  %v7626_v42 = vld [vmem:[#allocation8 + $0x184] ss:$16 sps:$4 sm:$0xff]  }
 0x273   :  { %5580 = vmatprep.subr.bf16.mxu0 %v7599_v44  ;;  %v525_v44 = vld [vmem:[#allocation5 + $0xb58] sm:$0xff] }
 0x274   :  { %v6978_v27 = vcombine.low %v525_v44, %v529_v45  ;;  %v573_v25 = vld [vmem:[#allocation5 + $0xcd8] sm:$0xff] }
 0x275   :  { %3892 = vmatpush1.bf16.msra.mxu1 %v6898_v47  ;;  %v7624_v47 = vld [vmem:[#allocation8 + $0x180] ss:$16 sps:$4 sm:$0xff]  }
 0x276   :  { %5581 = vmatpush1.bf16.msra.mxu0 %v7597_v48  ;;  %3893 = vmatprep.subr.bf16.mxu1 %v6907_v49  ;;  %v6979_v48 = vcombine.high %v525_v44, %v529_v45  ;;  %v7629_v49 = vld [vmem:[#allocation8 + $0x1a4] ss:$16 sps:$4 sm:$0xff]  }
 0x277   :  { %5582 = vmatprep.subr.bf16.mxu0 %v7602_v50  ;;  %v533_v50 = vld [vmem:[#allocation5 + $0xb98] sm:$0xff] }
 0x278   :  { %v6986_v0 = vcombine.low %v533_v50, %v537_v52  ;;  %v581_v31 = vld [vmem:[#allocation5 + $0xd18] sm:$0xff] }
 0x279   :  { %3894 = vmatpush1.bf16.msra.mxu1 %v6906_v53  ;;  %v7627_v53 = vld [vmem:[#allocation8 + $0x1a0] ss:$16 sps:$4 sm:$0xff]   ;;  %v7653_v44 = vld [vmem:[#allocation8 + $0x2a4] ss:$16 sps:$4 sm:$0xff]  }
 0x27a   :  { %5583 = vmatpush1.bf16.msra.mxu0 %v7600_v54  ;;  %3895 = vmatprep.subr.bf16.mxu1 %v6915_v56  ;;  %v6987_v54 = vcombine.high %v533_v50, %v537_v52  ;;  %v7632_v56 = vld [vmem:[#allocation8 + $0x1c4] ss:$16 sps:$4 sm:$0xff]  }
 0x27b   :  { %5584 = vmatprep.subr.bf16.mxu0 %v7605_v59  ;;  %v541_v59 = vld [vmem:[#allocation5 + $0xbd8] sm:$0xff] }
 0x27c   :  { %v585_v32 = vld [vmem:[#allocation5 + $0xd38] sm:$0xff] }
 0x27d   :  { %3896 = vmatpush1.bf16.msra.mxu1 %v6914_v57  ;;  %v7630_v57 = vld [vmem:[#allocation8 + $0x1c0] ss:$16 sps:$4 sm:$0xff]  }
 0x27e   :  { %5585 = vmatpush1.bf16.msra.mxu0 %v7603_v55  ;;  %3897 = vmatprep.subr.bf16.mxu1 %v6923_v1  ;;  %v6995_v55 = vcombine.high %v541_v59, %v545_v62  ;;  %v7635_v1 = vld [vmem:[#allocation8 + $0x1e4] ss:$16 sps:$4 sm:$0xff]  }
 0x27f   :  { %5586 = vmatprep.subr.bf16.mxu0 %v7608_v2  ;;  %v549_v2 = vld [vmem:[#allocation5 + $0xc18] sm:$0xff] }
 0x280   :  { %v589_v38 = vld [vmem:[#allocation5 + $0xd58] sm:$0xff] }
 0x281   :  { %3898 = vmatpush1.bf16.msra.mxu1 %v6922_v5  ;;  %v6994_v5 = vcombine.low %v541_v59, %v545_v62  ;;  %v593_v39 = vld [vmem:[#allocation5 + $0xd78] sm:$0xff] }
 0x282   :  { %5587 = vmatpush1.bf16.msra.mxu0 %v7606_v6  ;;  %3899 = vmatprep.subr.bf16.mxu1 %v6931_v7  ;;  %v7633_v6 = vld [vmem:[#allocation8 + $0x1e0] ss:$16 sps:$4 sm:$0xff]   ;;  %v7003_v7 = vcombine.high %v549_v2, %v553_v4 }
 0x283   :  { %5588 = vmatprep.subr.bf16.mxu0 %v7611_v16  ;;  %v7638_v16 = vld [vmem:[#allocation8 + $0x204] ss:$16 sps:$4 sm:$0xff]  }
 0x284   :  { %v597_v45 = vld [vmem:[#allocation5 + $0xd98] sm:$0xff] }
 0x285   :  { %3900 = vmatpush1.bf16.msra.mxu1 %v6930_v10  ;;  %v3983_v10 = vsel %vm3967_vm1, %v8561_v58, %v3975_v60  ;;  %v7639_v58 = vld [vmem:[#allocation8 + $0x220] ss:$16 sps:$4 sm:$0xff]  }
 0x286   :  { %5589 = vmatpush1.bf16.msra.mxu0 %v7609_v11  ;;  %3901 = vmatprep.subr.bf16.mxu1 %v6939_v14  ;;  %v7002_v11 = vcombine.low %v549_v2, %v553_v4  ;;  %v7636_v14 = vld [vmem:[#allocation8 + $0x200] ss:$16 sps:$4 sm:$0xff]   ;;  %v8577_v17 = vpack.c.bf16 %v3983_v10, %v3983_v10  ;;  %v7659_v2 = vld [vmem:[#allocation8 + $0x2e4] ss:$16 sps:$4 sm:$0xff]  }
 0x287   :  { %5590 = vmatprep.subr.bf16.mxu0 %v7614_v15  ;;  %v7011_v15 = vcombine.high %v557_v8, %v561_v9  ;;  %v613_v60 = vld [vmem:[#allocation5 + $0xe18] sm:$0xff] }
 0x288   :  { %v7662_v10 = vld [vmem:[#allocation8 + $0x304] ss:$16 sps:$4 sm:$0xff]  }
 0x289   :  { %3902 = vmatpush1.bf16.msra.mxu1 %v6938_v61  ;;  %v565_v61 = vld [vmem:[#allocation5 + $0xc98] sm:$0xff] }
 0x28a   :  { %5591 = vmatpush1.bf16.msra.mxu0 %v7612_v20  ;;  %3903 = vmatprep.subr.bf16.mxu1 %v6947_v22  ;;  %v569_v20 = vld [vmem:[#allocation5 + $0xcb8] sm:$0xff]  ;;  %v7010_v22 = vcombine.low %v557_v8, %v561_v9 }
 0x28b   :  { %5592 = vmatprep.subr.bf16.mxu0 %v7617_v23  ;;  %v7019_v23 = vcombine.high %v565_v61, %v569_v20 }
 0x28d   :  { %3904 = vmatpush1.bf16.msra.mxu1 %v6946_v26  ;;  %v577_v26 = vld [vmem:[#allocation5 + $0xcf8] sm:$0xff] }
 0x28e   :  { %5593 = vmatpush1.bf16.msra.mxu0 %v7615_v28  ;;  %3905 = vmatprep.subr.bf16.mxu1 %v6955_v29  ;;  %v7018_v28 = vcombine.low %v565_v61, %v569_v20  ;;  %v7642_v29 = vld [vmem:[#allocation8 + $0x240] ss:$16 sps:$4 sm:$0xff]   ;;  %v7665_v20 = vld [vmem:[#allocation8 + $0x324] ss:$16 sps:$4 sm:$0xff]  }
 0x28f   :  { %5594 = vmatprep.subr.bf16.mxu0 %v7620_v30  ;;  %v7647_v30 = vld [vmem:[#allocation8 + $0x264] ss:$16 sps:$4 sm:$0xff]  }
 0x291   :  { %3906 = vmatpush1.bf16.msra.mxu1 %v6954_v33  ;;  %v7026_v33 = vcombine.low %v573_v25, %v577_v26 }
 0x292   :  { %5595 = vmatpush1.bf16.msra.mxu0 %v7618_v36  ;;  %3907 = vmatprep.subr.bf16.mxu1 %v6963_v63  ;;  %v8583_v36 = vsub.s32 6, %v8541_v3  ;;  %v7645_v63 = vld [vmem:[#allocation8 + $0x260] ss:$16 sps:$4 sm:$0xff]  }
 0x293   :  { %5596 = vmatprep.subr.bf16.mxu0 %v7623_v37  ;;  %v7035_v37 = vcombine.high %v581_v31, %v585_v32 }
 0x295   :  { %3908 = vmatpush1.bf16.msra.mxu1 %v6962_v40  ;;  %v7034_v40 = vcombine.low %v581_v31, %v585_v32  ;;  %v7671_v32 = vld [vmem:[#allocation8 + $0x364] ss:$16 sps:$4 sm:$0xff]  }
 0x296   :  { %5597 = vmatpush1.bf16.msra.mxu0 %v7621_v21  ;;  %3909 = vmatprep.subr.bf16.mxu1 %v6971_v41  ;;  %v694_v21 = vrot.slane %v8545_v12, %v8583_v36  ;;  %v7648_v41 = vld [vmem:[#allocation8 + $0x280] ss:$16 sps:$4 sm:$0xff]  }
 0x297   :  { %5598 = vmatprep.subr.bf16.mxu0 %v7626_v42  ;;  %v7043_v42 = vcombine.high %v589_v38, %v593_v39 }
 0x299   :  { %3910 = vmatpush1.bf16.msra.mxu1 %v6970_v46  ;;  %v601_v46 = vld [vmem:[#allocation5 + $0xdb8] sm:$0xff] }
 0x29a   :  { %5599 = vmatpush1.bf16.msra.mxu0 %v7624_v47  ;;  %3911 = vmatprep.subr.bf16.mxu1 %v6979_v48  ;;  %v734_v47 = vrot.slane %v694_v21, %v8548_v13  ;;  %v7042_v48 = vcombine.low %v589_v38, %v593_v39  ;;  %v7051_v50 = vcombine.high %v597_v45, %v601_v46  ;;  %v7669_v38 = vld [vmem:[#allocation8 + $0x360] ss:$16 sps:$4 sm:$0xff]  }
 0x29b   :  { %5600 = vmatprep.subr.bf16.mxu0 %v7629_v49  ;;  %v7651_v49 = vld [vmem:[#allocation8 + $0x2a0] ss:$16 sps:$4 sm:$0xff]  }
 0x29c   :  { %v653_v21 = vld [vmem:[#allocation5 + $0xf58] sm:$0xff] }
 0x29d   :  { %3912 = vmatpush1.bf16.msra.mxu1 %v6978_v27  ;;  %v7656_v27 = vld [vmem:[#allocation8 + $0x2c4] ss:$16 sps:$4 sm:$0xff]  }
 0x29e   :  { %5601 = vmatpush1.bf16.msra.mxu0 %v7627_v53  ;;  %3913 = vmatprep.subr.bf16.mxu1 %v6987_v54  ;;  %v605_v53 = vld [vmem:[#allocation5 + $0xdd8] sm:$0xff] }
 0x29f   :  { %5602 = vmatprep.subr.bf16.mxu0 %v7632_v56  ;;  %v609_v54 = vld [vmem:[#allocation5 + $0xdf8] sm:$0xff] }
 0x2a1   :  { %3914 = vmatpush1.bf16.msra.mxu1 %v6986_v0  ;;  %v7050_v0 = vcombine.low %v597_v45, %v601_v46  ;;  %v7672_v45 = vld [vmem:[#allocation8 + $0x380] ss:$16 sps:$4 sm:$0xff]   ;;  %v7677_v46 = vld [vmem:[#allocation8 + $0x3a4] ss:$16 sps:$4 sm:$0xff]  }
 0x2a2   :  { %5603 = vmatpush1.bf16.msra.mxu0 %v7630_v57  ;;  %3915 = vmatprep.subr.bf16.mxu1 %v6995_v55  ;;  %v7654_v55 = vld [vmem:[#allocation8 + $0x2c0] ss:$16 sps:$4 sm:$0xff]  }
 0x2a3   :  { %5604 = vmatprep.subr.bf16.mxu0 %v7635_v1  ;;  %v7059_v1 = vcombine.high %v605_v53, %v609_v54 }
 0x2a5   :  { %3916 = vmatpush1.bf16.msra.mxu1 %v6994_v5  ;;  %v617_v5 = vld [vmem:[#allocation5 + $0xe38] sm:$0xff] }
 0x2a6   :  { %5605 = vmatpush1.bf16.msra.mxu0 %v7633_v6  ;;  %3926 = vmatprep.subr.bf16.mxu1 %v7003_v7  ;;  %v7058_v6 = vcombine.low %v605_v53, %v609_v54  ;;  %v7067_v9 = vcombine.high %v613_v60, %v617_v5  ;;  %v669_v54 = vld [vmem:[#allocation5 + $0xfd8] sm:$0xff] }
 0x2a7   :  { %5615 = vmatprep.subr.bf16.mxu0 %v7638_v16  ;;  %v7657_v16 = vld [vmem:[#allocation8 + $0x2e0] ss:$16 sps:$4 sm:$0xff]  }
 0x2a8   :  { %3918 = vmatmul.mubr.bf16.vlgmr.msra.gmra.mrb[8].mxu1 %v8513_v35  ;;  %v7027_v35 = vcombine.high %v573_v25, %v577_v26  ;;  %v7668_v26 = vld [vmem:[#allocation8 + $0x344] ss:$16 sps:$4 sm:$0xff]  }
 0x2a9   :  { %5607 = vmatmul.mubr.bf16.vlgmr.msra.gmra.mrb[8].mxu0 %v8577_v17  ;;  %3927 = vmatpush1.bf16.msra.mxu1 %v7002_v11  ;;  %v621_v11 = vld [vmem:[#allocation5 + $0xe58] sm:$0xff] }
 0x2aa   :  { %5616 = vmatpush1.bf16.msra.mxu0 %v7636_v14  ;;  %3928 = vmatprep.subr.bf16.mxu1 %v7011_v15  ;;  %v625_v14 = vld [vmem:[#allocation5 + $0xe78] sm:$0xff]  ;;  %v7066_v15 = vcombine.low %v613_v60, %v617_v5  ;;  %v7686_v60 = vld [vmem:[#allocation8 + $0xc] ss:$16 sps:$4 sm:$0xff]  }
 0x2ab   :  { %5617 = vmatprep.subr.bf16.mxu0 %v7641_v19  ;;  %3958 = vmatprep.mubr.bf16.mxu1 %v8515_v43  ;;  %v7650_v43 = vld [vmem:[#allocation8 + $0x284] ss:$16 sps:$4 sm:$0xff]   ;;  %v7660_v19 = vld [vmem:[#allocation8 + $0x300] ss:$16 sps:$4 sm:$0xff]   ;;  %v7075_v61 = vcombine.high %v621_v11, %v625_v14 }
 0x2ac   :  { %v7710_v5 = vld [vmem:[#allocation8 + $0x404] ss:$16 sps:$4 sm:$0xff]  }
 0x2ad   :  { %3929 = vmatpush1.bf16.msra.mxu1 %v7010_v22  ;;  %v629_v22 = vld [vmem:[#allocation5 + $0xe98] sm:$0xff] }
 0x2ae   :  { %5618 = vmatpush1.bf16.msra.mxu0 %v7639_v58  ;;  %3930 = vmatprep.subr.bf16.mxu1 %v7019_v23  ;;  %v633_v58 = vld [vmem:[#allocation5 + $0xeb8] sm:$0xff]  ;;  %v7074_v23 = vcombine.low %v621_v11, %v625_v14  ;;  %v7687_v11 = vld [vmem:[#allocation8 + $0x28] ss:$16 sps:$4 sm:$0xff]   ;;  %v7692_v14 = vld [vmem:[#allocation8 + $0x4c] ss:$16 sps:$4 sm:$0xff]  }
 0x2af   :  { %5619 = vmatprep.subr.bf16.mxu0 %v7644_v24  ;;  %v7663_v24 = vld [vmem:[#allocation8 + $0x320] ss:$16 sps:$4 sm:$0xff]   ;;  %v7083_v25 = vcombine.high %v629_v22, %v633_v58 }
 0x2b1   :  { %3931 = vmatpush1.bf16.msra.mxu1 %v7018_v28  ;;  %v637_v28 = vld [vmem:[#allocation5 + $0xed8] sm:$0xff] }
 0x2b2   :  { %5620 = vmatpush1.bf16.msra.mxu0 %v7642_v29  ;;  %3932 = vmatprep.subr.bf16.mxu1 %v7027_v35  ;;  %v641_v29 = vld [vmem:[#allocation5 + $0xef8] sm:$0xff]  ;;  %v7082_v35 = vcombine.low %v629_v22, %v633_v58  ;;  %v7693_v58 = vld [vmem:[#allocation8 + $0x68] ss:$16 sps:$4 sm:$0xff]  }
 0x2b3   :  { %5621 = vmatprep.subr.bf16.mxu0 %v7647_v30  ;;  %v7666_v30 = vld [vmem:[#allocation8 + $0x340] ss:$16 sps:$4 sm:$0xff]   ;;  %v7091_v31 = vcombine.high %v637_v28, %v641_v29 }
 0x2b4   :  { %v7720_v22 = vld [vmem:[#allocation8 + $0x440] ss:$16 sps:$4 sm:$0xff]  }
 0x2b5   :  { %3933 = vmatpush1.bf16.msra.mxu1 %v7026_v33  ;;  %v645_v33 = vld [vmem:[#allocation5 + $0xf18] sm:$0xff] }
 0x2b6   :  { %5622 = vmatpush1.bf16.msra.mxu0 %v7645_v63  ;;  %3934 = vmatprep.subr.bf16.mxu1 %v7035_v37  ;;  %v649_v63 = vld [vmem:[#allocation5 + $0xf38] sm:$0xff]  ;;  %v8594_v37 = vsub.s32 4, %v8541_v3 }
 0x2b7   :  { %5623 = vmatprep.subr.bf16.mxu0 %v7650_v43  ;;  %v7090_v43 = vcombine.low %v637_v28, %v641_v29  ;;  %v7099_v39 = vcombine.high %v645_v33, %v649_v63  ;;  %v7732_v28 = vld [vmem:[#allocation8 + $0x480] ss:$16 sps:$4 sm:$0xff]   ;;  %v7740_v29 = vld [vmem:[#allocation8 + $0x4a4] ss:$16 sps:$4 sm:$0xff]  }
 0x2b9   :  { %3935 = vmatpush1.bf16.msra.mxu1 %v7034_v40  ;;  %v7674_v40 = vld [vmem:[#allocation8 + $0x384] ss:$16 sps:$4 sm:$0xff]  }
 0x2ba   :  { %5624 = vmatpush1.bf16.msra.mxu0 %v7648_v41  ;;  %3936 = vmatprep.subr.bf16.mxu1 %v7043_v42  ;;  %v657_v41 = vld [vmem:[#allocation5 + $0xf78] sm:$0xff]  ;;  %v690_v42 = vrot.slane %v8545_v12, %v8594_v37 }
 0x2bb   :  { %v8588_v52 = vpop.f32.mrb[4].mxu1  ;;  %5625 = vmatprep.subr.bf16.mxu0 %v7653_v44  ;;  %v7098_v44 = vcombine.low %v645_v33, %v649_v63  ;;  %v7107_v3 = vcombine.high %v653_v21, %v657_v41  ;;  %v7680_v12 = vld [vmem:[#allocation8 + $0x3c4] ss:$16 sps:$4 sm:$0xff]   ;;  %v7702_v33 = vld [vmem:[#allocation8 + $0xc8] ss:$16 sps:$4 sm:$0xff]  }
 0x2bc   :  { %v3634_v56 = vpop.f32.mrb[5].mxu1  ;;  %v7707_v63 = vld [vmem:[#allocation8 + $0xec] ss:$16 sps:$4 sm:$0xff]  }
 0x2bd   :  { %v7487_v59 = vadd.f32 %v3634_v56, %v734_v47  ;;  %v3636_v62 = vpop.f32.mrb[6].mxu1  ;;  %3937 = vmatpush1.bf16.msra.mxu1 %v7042_v48  ;;  %v661_v47 = vld [vmem:[#allocation5 + $0xf98] sm:$0xff] }
 0x2be   :  { %5626 = vmatpush1.bf16.msra.mxu0 %v7651_v49  ;;  %v3637_v57 = vpop.f32.mrb[7].mxu1  ;;  %3938 = vmatprep.subr.bf16.mxu1 %v7051_v50  ;;  %v665_v48 = vld [vmem:[#allocation5 + $0xfb8] sm:$0xff]  ;;  %v730_v49 = vrot.slane %v690_v42, %v8548_v13  ;;  %v7106_v50 = vcombine.low %v653_v21, %v657_v41  ;;  %v7711_v42 = vld [vmem:[#allocation8 + $0x108] ss:$16 sps:$4 sm:$0xff]  }
 0x2bf   :  { %vm3970_vm2 = vcmp.ge.f32.partialorder %v7487_v59, 0.0  ;;  %v3978_v4 = vmul.f32 0.2, %v7487_v59  ;;  %5627 = vmatprep.subr.bf16.mxu0 %v7656_v27  ;;  %v7675_v27 = vld [vmem:[#allocation8 + $0x3a0] ss:$16 sps:$4 sm:$0xff]   ;;  %v7115_v53 = vcombine.high %v661_v47, %v665_v48  ;;  %v7114_v62 = vcombine.low %v661_v47, %v665_v48 }
 0x2c0   :  { %v673_v56 = vld [vmem:[#allocation5 + $0xff8] sm:$0xff]  ;;  %v7725_v47 = vld [vmem:[#allocation8 + $0x14c] ss:$16 sps:$4 sm:$0xff]  }
 0x2c1   :  { %3939 = vmatpush1.bf16.msra.mxu1 %v7050_v0  ;;  %v3986_v7 = vsel %vm3970_vm2, %v7487_v59, %v3978_v4  ;;  %v7486_v59 = vadd.f32 %v8588_v52, %v730_v49  ;;  %v7678_v0 = vld [vmem:[#allocation8 + $0x3c0] ss:$16 sps:$4 sm:$0xff]   ;;  %v7123_v57 = vcombine.high %v669_v54, %v673_v56  ;;  %v7684_v52 = vld [vmem:[#allocation8 + $0x8] ss:$16 sps:$4 sm:$0xff]   ;;  %v7758_v41 = vld [vmem:[#allocation8 + $0x504] ss:$16 sps:$4 sm:$0xff]  }
 0x2c2   :  { %5628 = vmatpush1.bf16.msra.mxu0 %v7654_v55  ;;  %3940 = vmatprep.subr.bf16.mxu1 %v7059_v1  ;;  %v8590_v8 = vpack.c.bf16 %v3986_v7, %v3986_v7  ;;  %v7683_v55 = vld [vmem:[#allocation8 + $0x3e4] ss:$16 sps:$4 sm:$0xff]   ;;  %v7681_v4 = vld [vmem:[#allocation8 + $0x3e0] ss:$16 sps:$4 sm:$0xff]   ;;  %v7689_v7 = vld [vmem:[#allocation8 + $0x2c] ss:$16 sps:$4 sm:$0xff]  }
 0x2c3   :  { %5629 = vmatprep.subr.bf16.mxu0 %v7659_v2  ;;  %v3977_v1 = vmul.f32 0.2, %v7486_v59  ;;  %vm3969_vm3 = vcmp.ge.f32.partialorder %v7486_v59, 0.0  ;;  %v7122_v2 = vcombine.low %v669_v54, %v673_v56  ;;  %v7750_v21 = vld [vmem:[#allocation8 + $0x4e0] ss:$16 sps:$4 sm:$0xff]  }
 0x2c4   :  { %5647 = vmatprep.mubr.bf16.mxu0 %v8590_v8  ;;  %v7762_v48 = vld [vmem:[#allocation8 + $0x520] ss:$16 sps:$4 sm:$0xff]   ;;  %v7770_v49 = vld [vmem:[#allocation8 + $0x544] ss:$16 sps:$4 sm:$0xff]   ;;  %v7729_v54 = vld [vmem:[#allocation8 + $0x168] ss:$16 sps:$4 sm:$0xff]  }
 0x2c5   :  { %3941 = vmatpush1.bf16.msra.mxu1 %v7058_v6  ;;  %v3985_v6 = vsel %vm3969_vm3, %v7486_v59, %v3977_v1  ;;  %v7737_v56 = vld [vmem:[#allocation8 + $0x18c] ss:$16 sps:$4 sm:$0xff]   ;;  %v7774_v59 = vld [vmem:[#allocation8 + $0x560] ss:$16 sps:$4 sm:$0xff]   ;;  %v7788_v1 = vld [vmem:[#allocation8 + $0x5a4] ss:$16 sps:$4 sm:$0xff]  }
 0x2c6   :  { %5630 = vmatpush1.bf16.msra.mxu0 %v7657_v16  ;;  %3942 = vmatprep.subr.bf16.mxu1 %v7067_v9  ;;  %v8600_v16 = vpack.c.bf16 %v3985_v6, %v3985_v6  ;;  %v7708_v9 = vld [vmem:[#allocation8 + $0x400] ss:$16 sps:$4 sm:$0xff]   ;;  %v7747_v6 = vld [vmem:[#allocation8 + $0x1c8] ss:$16 sps:$4 sm:$0xff]  }
 0x2c7   :  { %5631 = vmatprep.subr.bf16.mxu0 %v7662_v10  ;;  %v7716_v10 = vld [vmem:[#allocation8 + $0x424] ss:$16 sps:$4 sm:$0xff]  }
 0x2c9   :  { %3943 = vmatpush1.bf16.msra.mxu1 %v7066_v15  ;;  %v7714_v15 = vld [vmem:[#allocation8 + $0x420] ss:$16 sps:$4 sm:$0xff]  }
 0x2ca   :  { %5632 = vmatpush1.bf16.msra.mxu0 %v7660_v19  ;;  %3944 = vmatprep.subr.bf16.mxu1 %v7075_v61  ;;  %v7722_v19 = vld [vmem:[#allocation8 + $0x444] ss:$16 sps:$4 sm:$0xff]   ;;  %v7690_v61 = vld [vmem:[#allocation8 + $0x48] ss:$16 sps:$4 sm:$0xff]  }
 0x2cb   :  { %5633 = vmatprep.subr.bf16.mxu0 %v7665_v20  ;;  %v7695_v20 = vld [vmem:[#allocation8 + $0x6c] ss:$16 sps:$4 sm:$0xff]  }
 0x2cd   :  { %3945 = vmatpush1.bf16.msra.mxu1 %v7074_v23  ;;  %v7698_v23 = vld [vmem:[#allocation8 + $0x8c] ss:$16 sps:$4 sm:$0xff]  }
 0x2ce   :  { %5634 = vmatpush1.bf16.msra.mxu0 %v7663_v24  ;;  %3946 = vmatprep.subr.bf16.mxu1 %v7083_v25  ;;  %v7734_v24 = vld [vmem:[#allocation8 + $0x484] ss:$16 sps:$4 sm:$0xff]   ;;  %v7696_v25 = vld [vmem:[#allocation8 + $0x88] ss:$16 sps:$4 sm:$0xff]  }
 0x2cf   :  { %5635 = vmatprep.subr.bf16.mxu0 %v7668_v26  ;;  %v7701_v26 = vld [vmem:[#allocation8 + $0xac] ss:$16 sps:$4 sm:$0xff]  }
 0x2d1   :  { %3947 = vmatpush1.bf16.msra.mxu1 %v7082_v35  ;;  %v7699_v35 = vld [vmem:[#allocation8 + $0xa8] ss:$16 sps:$4 sm:$0xff]  }
 0x2d2   :  { %5636 = vmatpush1.bf16.msra.mxu0 %v7666_v30  ;;  %3948 = vmatprep.subr.bf16.mxu1 %v7091_v31  ;;  %v7704_v30 = vld [vmem:[#allocation8 + $0xcc] ss:$16 sps:$4 sm:$0xff]   ;;  %v7738_v31 = vld [vmem:[#allocation8 + $0x4a0] ss:$16 sps:$4 sm:$0xff]  }
 0x2d3   :  { %5637 = vmatprep.subr.bf16.mxu0 %v7671_v32  ;;  %v7746_v32 = vld [vmem:[#allocation8 + $0x4c4] ss:$16 sps:$4 sm:$0xff]  }
 0x2d5   :  { %3949 = vmatpush1.bf16.msra.mxu1 %v7090_v43  ;;  %v7744_v43 = vld [vmem:[#allocation8 + $0x4c0] ss:$16 sps:$4 sm:$0xff]  }
 0x2d6   :  { %5638 = vmatpush1.bf16.msra.mxu0 %v7669_v38  ;;  %3950 = vmatprep.subr.bf16.mxu1 %v7099_v39  ;;  %v7752_v38 = vld [vmem:[#allocation8 + $0x4e4] ss:$16 sps:$4 sm:$0xff]   ;;  %v7705_v39 = vld [vmem:[#allocation8 + $0xe8] ss:$16 sps:$4 sm:$0xff]  }
 0x2d7   :  { %5639 = vmatprep.subr.bf16.mxu0 %v7674_v40  ;;  %v7713_v40 = vld [vmem:[#allocation8 + $0x10c] ss:$16 sps:$4 sm:$0xff]  }
 0x2d9   :  { %3951 = vmatpush1.bf16.msra.mxu1 %v7098_v44  ;;  %v7719_v44 = vld [vmem:[#allocation8 + $0x12c] ss:$16 sps:$4 sm:$0xff]  }
 0x2da   :  { %5640 = vmatpush1.bf16.msra.mxu0 %v7672_v45  ;;  %3952 = vmatprep.subr.bf16.mxu1 %v7107_v3  ;;  %v7756_v45 = vld [vmem:[#allocation8 + $0x500] ss:$16 sps:$4 sm:$0xff]   ;;  %v7764_v3 = vld [vmem:[#allocation8 + $0x524] ss:$16 sps:$4 sm:$0xff]  }
 0x2db   :  { %5641 = vmatprep.subr.bf16.mxu0 %v7677_v46  ;;  %v7717_v46 = vld [vmem:[#allocation8 + $0x128] ss:$16 sps:$4 sm:$0xff]  }
 0x2dd   :  { %3953 = vmatpush1.bf16.msra.mxu1 %v7106_v50  ;;  %v7723_v50 = vld [vmem:[#allocation8 + $0x148] ss:$16 sps:$4 sm:$0xff]  }
 0x2de   :  { %5642 = vmatpush1.bf16.msra.mxu0 %v7675_v27  ;;  %3954 = vmatprep.subr.bf16.mxu1 %v7115_v53  ;;  %v7731_v27 = vld [vmem:[#allocation8 + $0x16c] ss:$16 sps:$4 sm:$0xff]   ;;  %v7768_v53 = vld [vmem:[#allocation8 + $0x540] ss:$16 sps:$4 sm:$0xff]  }
 0x2df   :  { %5643 = vmatprep.subr.bf16.mxu0 %v7680_v12  ;;  %v7776_v12 = vld [vmem:[#allocation8 + $0x564] ss:$16 sps:$4 sm:$0xff]  }
 0x2e1   :  { %3955 = vmatpush1.bf16.msra.mxu1 %v7114_v62  ;;  %v7782_v62 = vld [vmem:[#allocation8 + $0x584] ss:$16 sps:$4 sm:$0xff]  }
 0x2e2   :  { %5644 = vmatpush1.bf16.msra.mxu0 %v7678_v0  ;;  %3956 = vmatprep.subr.bf16.mxu1 %v7123_v57  ;;  %v7735_v0 = vld [vmem:[#allocation8 + $0x188] ss:$16 sps:$4 sm:$0xff]   ;;  %v7743_v57 = vld [vmem:[#allocation8 + $0x1ac] ss:$16 sps:$4 sm:$0xff]  }
 0x2e3   :  { %5645 = vmatprep.subr.bf16.mxu0 %v7683_v55  ;;  %v7780_v55 = vld [vmem:[#allocation8 + $0x580] ss:$16 sps:$4 sm:$0xff]  }
 0x2e5   :  { %3957 = vmatpush1.bf16.msra.mxu1 %v7122_v2  ;;  %v7741_v2 = vld [vmem:[#allocation8 + $0x1a8] ss:$16 sps:$4 sm:$0xff]  }
 0x2e6   :  { %5646 = vmatpush1.bf16.msra.mxu0 %v7681_v4  ;;  %5738 = vmatprep.subr.bf16.mxu1 %v7686_v60  ;;  %v7749_v4 = vld [vmem:[#allocation8 + $0x1cc] ss:$16 sps:$4 sm:$0xff]   ;;  %v7786_v60 = vld [vmem:[#allocation8 + $0x5a0] ss:$16 sps:$4 sm:$0xff]  }
 0x2e7   :  { %5656 = vmatprep.subr.bf16.mxu0 %v7710_v5  ;;  %v7794_v5 = vld [vmem:[#allocation8 + $0x5c4] ss:$16 sps:$4 sm:$0xff]  }
 0x2e8   :  { %3959 = vmatmul.mubr.bf16.vlgmr.msra.gmra.mrb[8].mxu1 %v8521_v51  ;;  %v7728_v51 = vld [vmem:[#allocation8 + $0x464] ss:$16 sps:$4 sm:$0xff]  }
 0x2e9   :  { %5648 = vmatmul.mubr.bf16.vlgmr.msra.gmra.mrb[8].mxu0 %v8600_v16  ;;  %5739 = vmatpush1.bf16.msra.mxu1 %v7684_v52  ;;  %v7755_v52 = vld [vmem:[#allocation8 + $0x1ec] ss:$16 sps:$4 sm:$0xff]  }
 0x2ea   :  { %5770 = vmatprep.mubr.bf16.mxu1 %v8569_v34  ;;  %5740 = vmatprep.subr.bf16.mxu1 %v7689_v7  ;;  %v7726_v34 = vld [vmem:[#allocation8 + $0x460] ss:$16 sps:$4 sm:$0xff]  }
 0x2eb   :  { %5657 = vmatpush1.bf16.msra.mxu0 %v7708_v9  ;;  %v7792_v7 = vld [vmem:[#allocation8 + $0x5c0] ss:$16 sps:$4 sm:$0xff]   ;;  %v7800_v9 = vld [vmem:[#allocation8 + $0x5e4] ss:$16 sps:$4 sm:$0xff]  }
 0x2ec   :  { %5658 = vmatprep.subr.bf16.mxu0 %v7716_v10  ;;  %v7753_v10 = vld [vmem:[#allocation8 + $0x1e8] ss:$16 sps:$4 sm:$0xff]  }
 0x2ed   :  { %5741 = vmatpush1.bf16.msra.mxu1 %v7687_v11  ;;  %v7761_v11 = vld [vmem:[#allocation8 + $0x20c] ss:$16 sps:$4 sm:$0xff]  }
 0x2ee   :  { %5742 = vmatprep.subr.bf16.mxu1 %v7692_v14  ;;  %v7798_v14 = vld [vmem:[#allocation8 + $0x5e0] ss:$16 sps:$4 sm:$0xff]  }
 0x2ef   :  { %5659 = vmatpush1.bf16.msra.mxu0 %v7714_v15  ;;  %v7854_v15 = vld [vmem:[#allocation8 + $0x604] ss:$16 sps:$4 sm:$0xff]  }
 0x2f0   :  { %5660 = vmatprep.subr.bf16.mxu0 %v7722_v19  ;;  %v7759_v19 = vld [vmem:[#allocation8 + $0x208] ss:$16 sps:$4 sm:$0xff]  }
 0x2f1   :  { %5743 = vmatpush1.bf16.msra.mxu1 %v7690_v61  ;;  %v7767_v61 = vld [vmem:[#allocation8 + $0x22c] ss:$16 sps:$4 sm:$0xff]  }
 0x2f2   :  { %5744 = vmatprep.subr.bf16.mxu1 %v7695_v20  ;;  %v7765_v20 = vld [vmem:[#allocation8 + $0x228] ss:$16 sps:$4 sm:$0xff]  }
 0x2f3   :  { %5661 = vmatpush1.bf16.msra.mxu0 %v7720_v22  ;;  %v7773_v22 = vld [vmem:[#allocation8 + $0x24c] ss:$16 sps:$4 sm:$0xff]  }
 0x2f4   :  { %5662 = vmatprep.subr.bf16.mxu0 %v7728_v51  ;;  %v7771_v51 = vld [vmem:[#allocation8 + $0x248] ss:$16 sps:$4 sm:$0xff]  }
 0x2f5   :  { %5745 = vmatpush1.bf16.msra.mxu1 %v7693_v58  ;;  %v7779_v58 = vld [vmem:[#allocation8 + $0x26c] ss:$16 sps:$4 sm:$0xff]  }
 0x2f6   :  { %5746 = vmatprep.subr.bf16.mxu1 %v7698_v23  ;;  %v7777_v23 = vld [vmem:[#allocation8 + $0x268] ss:$16 sps:$4 sm:$0xff]  }
 0x2f7   :  { %5663 = vmatpush1.bf16.msra.mxu0 %v7726_v34  ;;  %v8088_v34 = vld [vmem:[#allocation7] sm:$0xff] }
 0x2f8   :  { %5664 = vmatprep.subr.bf16.mxu0 %v7734_v24  ;;  %v8607_v24 = vunpack.c.h.bf16 %v8088_v34  ;;  %v7900_v34 = vld [vmem:[#allocation8 + $0x700] ss:$16 sps:$4 sm:$0xff]  }
 0x2f9   :  { %5747 = vmatpush1.bf16.msra.mxu1 %v7696_v25  ;;  %v7785_v25 = vld [vmem:[#allocation8 + $0x28c] ss:$16 sps:$4 sm:$0xff]  }
 0x2fa   :  { %5748 = vmatprep.subr.bf16.mxu1 %v7701_v26  ;;  %v698_v26 = vrot.slane %v8607_v24, %v8548_v13 }
 0x2fb   :  { %5665 = vmatpush1.bf16.msra.mxu0 %v7732_v28  ;;  %v7791_v28 = vld [vmem:[#allocation8 + $0x2ac] ss:$16 sps:$4 sm:$0xff]  }
 0x2fc   :  { %5666 = vmatprep.subr.bf16.mxu0 %v7740_v29  ;;  %v738_v29 = vrot.slane %v698_v26, %v8548_v13  ;;  %v7833_v26 = vld [vmem:[#allocation8 + $0x42c] ss:$16 sps:$4 sm:$0xff]  }
 0x2fd   :  { %5749 = vmatpush1.bf16.msra.mxu1 %v7699_v35  ;;  %v7789_v35 = vld [vmem:[#allocation8 + $0x2a8] ss:$16 sps:$4 sm:$0xff]  }
 0x2fe   :  { %5750 = vmatprep.subr.bf16.mxu1 %v7704_v30 }
 0x2ff   :  { %5667 = vmatpush1.bf16.msra.mxu0 %v7738_v31  ;;  %v7797_v31 = vld [vmem:[#allocation8 + $0x2cc] ss:$16 sps:$4 sm:$0xff]  }
 0x300   :  { %5668 = vmatprep.subr.bf16.mxu0 %v7746_v32 }
 0x301   :  { %5751 = vmatpush1.bf16.msra.mxu1 %v7702_v33 }
 0x302   :  { %5752 = vmatprep.subr.bf16.mxu1 %v7707_v63 }
 0x303   :  { %5669 = vmatpush1.bf16.msra.mxu0 %v7744_v43  ;;  %v7795_v43 = vld [vmem:[#allocation8 + $0x2c8] ss:$16 sps:$4 sm:$0xff]  }
 0x304   :  { %5670 = vmatprep.subr.bf16.mxu0 %v7752_v38 }
 0x305   :  { %5753 = vmatpush1.bf16.msra.mxu1 %v7705_v39 }
 0x306   :  { %5754 = vmatprep.subr.bf16.mxu1 %v7713_v40  ;;  %v7803_v40 = vld [vmem:[#allocation8 + $0x2ec] ss:$16 sps:$4 sm:$0xff]  }
 0x307   :  { %5671 = vmatpush1.bf16.msra.mxu0 %v7750_v21 }
 0x308   :  { %5672 = vmatprep.subr.bf16.mxu0 %v7758_v41 }
 0x309   :  { %5755 = vmatpush1.bf16.msra.mxu1 %v7711_v42 }
 0x30a   :  { %5756 = vmatprep.subr.bf16.mxu1 %v7719_v44 }
 0x30b   :  { %5673 = vmatpush1.bf16.msra.mxu0 %v7756_v45  ;;  %v7801_v45 = vld [vmem:[#allocation8 + $0x2e8] ss:$16 sps:$4 sm:$0xff]  }
 0x30c   :  { %5674 = vmatprep.subr.bf16.mxu0 %v7764_v3 }
 0x30d   :  { %5757 = vmatpush1.bf16.msra.mxu1 %v7717_v46  ;;  %v7806_v46 = vld [vmem:[#allocation8 + $0x30c] ss:$16 sps:$4 sm:$0xff]  }
 0x30e   :  { %5758 = vmatprep.subr.bf16.mxu1 %v7725_v47 }
 0x30f   :  { %5675 = vmatpush1.bf16.msra.mxu0 %v7762_v48  ;;  %v7852_v48 = vld [vmem:[#allocation8 + $0x600] ss:$16 sps:$4 sm:$0xff]  }
 0x310   :  { %5676 = vmatprep.subr.bf16.mxu0 %v7770_v49 }
 0x311   :  { %5759 = vmatpush1.bf16.msra.mxu1 %v7723_v50  ;;  %v7860_v50 = vld [vmem:[#allocation8 + $0x624] ss:$16 sps:$4 sm:$0xff]  }
 0x312   :  { %5760 = vmatprep.subr.bf16.mxu1 %v7731_v27  ;;  %v7804_v27 = vld [vmem:[#allocation8 + $0x308] ss:$16 sps:$4 sm:$0xff]  }
 0x313   :  { %5677 = vmatpush1.bf16.msra.mxu0 %v7768_v53  ;;  %v7809_v53 = vld [vmem:[#allocation8 + $0x32c] ss:$16 sps:$4 sm:$0xff]  }
 0x314   :  { %5678 = vmatprep.subr.bf16.mxu0 %v7776_v12  ;;  %v7858_v12 = vld [vmem:[#allocation8 + $0x620] ss:$16 sps:$4 sm:$0xff]  }
 0x315   :  { %5761 = vmatpush1.bf16.msra.mxu1 %v7729_v54  ;;  %v7866_v54 = vld [vmem:[#allocation8 + $0x644] ss:$16 sps:$4 sm:$0xff]  }
 0x316   :  { %5762 = vmatprep.subr.bf16.mxu1 %v7737_v56  ;;  %v7807_v56 = vld [vmem:[#allocation8 + $0x328] ss:$16 sps:$4 sm:$0xff]  }
 0x317   :  { %5679 = vmatpush1.bf16.msra.mxu0 %v7774_v59  ;;  %v7812_v59 = vld [vmem:[#allocation8 + $0x34c] ss:$16 sps:$4 sm:$0xff]  }
 0x318   :  { %5680 = vmatprep.subr.bf16.mxu0 %v7782_v62  ;;  %v7864_v62 = vld [vmem:[#allocation8 + $0x640] ss:$16 sps:$4 sm:$0xff]  }
 0x319   :  { %5763 = vmatpush1.bf16.msra.mxu1 %v7735_v0  ;;  %v7872_v0 = vld [vmem:[#allocation8 + $0x664] ss:$16 sps:$4 sm:$0xff]  }
 0x31a   :  { %5764 = vmatprep.subr.bf16.mxu1 %v7743_v57  ;;  %v7810_v57 = vld [vmem:[#allocation8 + $0x348] ss:$16 sps:$4 sm:$0xff]  }
 0x31b   :  { %5681 = vmatpush1.bf16.msra.mxu0 %v7780_v55  ;;  %v7815_v55 = vld [vmem:[#allocation8 + $0x36c] ss:$16 sps:$4 sm:$0xff]  }
 0x31c   :  { %5682 = vmatprep.subr.bf16.mxu0 %v7788_v1  ;;  %v7870_v1 = vld [vmem:[#allocation8 + $0x660] ss:$16 sps:$4 sm:$0xff]  }
 0x31d   :  { %5765 = vmatpush1.bf16.msra.mxu1 %v7741_v2  ;;  %v7878_v2 = vld [vmem:[#allocation8 + $0x684] ss:$16 sps:$4 sm:$0xff]  }
 0x31e   :  { %5766 = vmatprep.subr.bf16.mxu1 %v7749_v4  ;;  %v7813_v4 = vld [vmem:[#allocation8 + $0x368] ss:$16 sps:$4 sm:$0xff]  }
 0x31f   :  { %5683 = vmatpush1.bf16.msra.mxu0 %v7786_v60  ;;  %v7818_v60 = vld [vmem:[#allocation8 + $0x38c] ss:$16 sps:$4 sm:$0xff]  }
 0x320   :  { %5684 = vmatprep.subr.bf16.mxu0 %v7794_v5  ;;  %v7876_v5 = vld [vmem:[#allocation8 + $0x680] ss:$16 sps:$4 sm:$0xff]  }
 0x321   :  { %5767 = vmatpush1.bf16.msra.mxu1 %v7747_v6  ;;  %v7884_v6 = vld [vmem:[#allocation8 + $0x6a4] ss:$16 sps:$4 sm:$0xff]  }
 0x322   :  { %5768 = vmatprep.subr.bf16.mxu1 %v7755_v52  ;;  %v7816_v52 = vld [vmem:[#allocation8 + $0x388] ss:$16 sps:$4 sm:$0xff]  }
 0x323   :  { %5685 = vmatpush1.bf16.msra.mxu0 %v7792_v7  ;;  %v7821_v7 = vld [vmem:[#allocation8 + $0x3ac] ss:$16 sps:$4 sm:$0xff]  }
 0x324   :  { %5686 = vmatprep.subr.bf16.mxu0 %v7800_v9  ;;  %v7882_v9 = vld [vmem:[#allocation8 + $0x6a0] ss:$16 sps:$4 sm:$0xff]  }
 0x325   :  { %5769 = vmatpush1.bf16.msra.mxu1 %v7753_v10  ;;  %v7890_v10 = vld [vmem:[#allocation8 + $0x6c4] ss:$16 sps:$4 sm:$0xff]  }
 0x326   :  { %5779 = vmatprep.subr.bf16.mxu1 %v7761_v11  ;;  %v7819_v11 = vld [vmem:[#allocation8 + $0x3a8] ss:$16 sps:$4 sm:$0xff]  }
 0x327   :  { %5687 = vmatpush1.bf16.msra.mxu0 %v7798_v14  ;;  %v7824_v14 = vld [vmem:[#allocation8 + $0x3cc] ss:$16 sps:$4 sm:$0xff]  }
 0x328   :  { %5771 = vmatmul.mubr.bf16.vlgmr.msra.gmra.mrb[12].mxu1 %v8577_v17  ;;  %5697 = vmatprep.subr.bf16.mxu0 %v7854_v15  ;;  %v7783_v17 = vld [vmem:[#allocation8 + $0x288] ss:$16 sps:$4 sm:$0xff]   ;;  %v7888_v15 = vld [vmem:[#allocation8 + $0x6c0] ss:$16 sps:$4 sm:$0xff]  }
 0x329   :  { %5780 = vmatpush1.bf16.msra.mxu1 %v7759_v19  ;;  %5811 = vmatprep.mubr.bf16.mxu1 %v8590_v8  ;;  %v702_v8 = vrot.slane %v8607_v24, %v8551_v18  ;;  %v7896_v19 = vld [vmem:[#allocation8 + $0x6e4] ss:$16 sps:$4 sm:$0xff]  }
 0x32a   :  { %5781 = vmatprep.subr.bf16.mxu1 %v7767_v61  ;;  %v7822_v61 = vld [vmem:[#allocation8 + $0x3c8] ss:$16 sps:$4 sm:$0xff]  }
 0x32b   :  { %v742_v30 = vrot.slane %v702_v8, %v8548_v13  ;;  %v7906_v8 = vld [vmem:[#allocation8 + $0x720] ss:$16 sps:$4 sm:$0xff]  }
 0x32d   :  { %5782 = vmatpush1.bf16.msra.mxu1 %v7765_v20  ;;  %v7827_v20 = vld [vmem:[#allocation8 + $0x3ec] ss:$16 sps:$4 sm:$0xff]  }
 0x32e   :  { %5783 = vmatprep.subr.bf16.mxu1 %v7773_v22  ;;  %v7894_v22 = vld [vmem:[#allocation8 + $0x6e0] ss:$16 sps:$4 sm:$0xff]  }
 0x331   :  { %5784 = vmatpush1.bf16.msra.mxu1 %v7771_v51  ;;  %v7902_v51 = vld [vmem:[#allocation8 + $0x704] ss:$16 sps:$4 sm:$0xff]  }
 0x332   :  { %5785 = vmatprep.subr.bf16.mxu1 %v7779_v58  ;;  %v7825_v58 = vld [vmem:[#allocation8 + $0x3e8] ss:$16 sps:$4 sm:$0xff]  }
 0x335   :  { %5786 = vmatpush1.bf16.msra.mxu1 %v7777_v23  ;;  %v7830_v23 = vld [vmem:[#allocation8 + $0x40c] ss:$16 sps:$4 sm:$0xff]  }
 0x336   :  { %5787 = vmatprep.subr.bf16.mxu1 %v7785_v25  ;;  %v7908_v25 = vld [vmem:[#allocation8 + $0x724] ss:$16 sps:$4 sm:$0xff]  }
 0x339   :  { %5788 = vmatpush1.bf16.msra.mxu1 %v7783_v17  ;;  %v7828_v17 = vld [vmem:[#allocation8 + $0x408] ss:$16 sps:$4 sm:$0xff]  }
 0x33a   :  { %5789 = vmatprep.subr.bf16.mxu1 %v7791_v28  ;;  %v7914_v28 = vld [vmem:[#allocation8 + $0x744] ss:$16 sps:$4 sm:$0xff]  }
 0x33c   :  { %v3796_v32 = vpop.f32.mrb[4].mxu0 }
 0x33d   :  { %v7488_v33 = vadd.f32 %v3796_v32, %v738_v29  ;;  %v3798_v63 = vpop.f32.mrb[5].mxu0  ;;  %5790 = vmatpush1.bf16.msra.mxu1 %v7789_v35  ;;  %v7831_v29 = vld [vmem:[#allocation8 + $0x428] ss:$16 sps:$4 sm:$0xff]   ;;  %v7836_v35 = vld [vmem:[#allocation8 + $0x44c] ss:$16 sps:$4 sm:$0xff]  }
 0x33e   :  { %v7489_v38 = vadd.f32 %v3798_v63, %v742_v30  ;;  %v3800_v39 = vpop.f32.mrb[6].mxu0  ;;  %5791 = vmatprep.subr.bf16.mxu1 %v7797_v31  ;;  %v7912_v30 = vld [vmem:[#allocation8 + $0x740] ss:$16 sps:$4 sm:$0xff]   ;;  %v7920_v31 = vld [vmem:[#allocation8 + $0x764] ss:$16 sps:$4 sm:$0xff]  }
 0x33f   :  { %vm3971_vm4 = vcmp.ge.f32.partialorder %v7488_v33, 0.0  ;;  %v3979_v21 = vmul.f32 0.2, %v7488_v33  ;;  %v3801_v41 = vpop.f32.mrb[7].mxu0  ;;  %v7834_v32 = vld [vmem:[#allocation8 + $0x448] ss:$16 sps:$4 sm:$0xff]  }
 0x340   :  { %vm3972_vm5 = vcmp.ge.f32.partialorder %v7489_v38, 0.0  ;;  %v3980_v42 = vmul.f32 0.2, %v7489_v38  ;;  %v7918_v63 = vld [vmem:[#allocation8 + $0x760] ss:$16 sps:$4 sm:$0xff]  }
 0x341   :  { %v3987_v44 = vsel %vm3971_vm4, %v7488_v33, %v3979_v21  ;;  %5792 = vmatpush1.bf16.msra.mxu1 %v7795_v43  ;;  %v7839_v33 = vld [vmem:[#allocation8 + $0x46c] ss:$16 sps:$4 sm:$0xff]   ;;  %v7837_v43 = vld [vmem:[#allocation8 + $0x468] ss:$16 sps:$4 sm:$0xff]   ;;  %v7924_v39 = vld [vmem:[#allocation8 + $0x780] ss:$16 sps:$4 sm:$0xff]  }
 0x342   :  { %v3988_v3 = vsel %vm3972_vm5, %v7489_v38, %v3980_v42  ;;  %5793 = vmatprep.subr.bf16.mxu1 %v7803_v40  ;;  %v8617_v49 = vpack.c.bf16 %v3987_v44, %v3987_v44  ;;  %v7842_v38 = vld [vmem:[#allocation8 + $0x48c] ss:$16 sps:$4 sm:$0xff]   ;;  %v7932_v40 = vld [vmem:[#allocation8 + $0x7a4] ss:$16 sps:$4 sm:$0xff]   ;;  %v7840_v21 = vld [vmem:[#allocation8 + $0x488] ss:$16 sps:$4 sm:$0xff]  }
 0x343   :  { %v8615_v47 = vpack.c.bf16 %v3988_v3, %v3988_v3  ;;  %v7845_v41 = vld [vmem:[#allocation8 + $0x4ac] ss:$16 sps:$4 sm:$0xff]   ;;  %v7930_v42 = vld [vmem:[#allocation8 + $0x7a0] ss:$16 sps:$4 sm:$0xff]   ;;  %v7938_v44 = vld [vmem:[#allocation8 + $0x7c4] ss:$16 sps:$4 sm:$0xff]  }
 0x344   :  { %v7848_v3 = vld [vmem:[#allocation8 + $0x4cc] ss:$16 sps:$4 sm:$0xff]  }
 0x345   :  { %5688 = vmatprep.mubr.bf16.mxu0 %v8615_v47  ;;  %5794 = vmatpush1.bf16.msra.mxu1 %v7801_v45  ;;  %v7843_v45 = vld [vmem:[#allocation8 + $0x4a8] ss:$16 sps:$4 sm:$0xff]  }
 0x346   :  { %5689 = vmatmul.mubr.bf16.vlgmr.msra.gmra.mrb[8].mxu0 %v8617_v49  ;;  %5795 = vmatprep.subr.bf16.mxu1 %v7806_v46  ;;  %v7936_v46 = vld [vmem:[#allocation8 + $0x7c0] ss:$16 sps:$4 sm:$0xff]  }
 0x347   :  { %5698 = vmatpush1.bf16.msra.mxu0 %v7852_v48  ;;  %v7846_v48 = vld [vmem:[#allocation8 + $0x4c8] ss:$16 sps:$4 sm:$0xff]  }
 0x348   :  { %5699 = vmatprep.subr.bf16.mxu0 %v7860_v50  ;;  %v7851_v50 = vld [vmem:[#allocation8 + $0x4ec] ss:$16 sps:$4 sm:$0xff]  }
 0x349   :  { %5796 = vmatpush1.bf16.msra.mxu1 %v7804_v27  ;;  %v7942_v27 = vld [vmem:[#allocation8 + $0x7e0] ss:$16 sps:$4 sm:$0xff]  }
 0x34a   :  { %5797 = vmatprep.subr.bf16.mxu1 %v7809_v53  ;;  %v7974_v53 = vld [vmem:[#allocation11 + $0x4] ss:$8 sps:$4 sm:$0xff]  }
 0x34b   :  { %5700 = vmatpush1.bf16.msra.mxu0 %v7858_v12  ;;  %v7849_v12 = vld [vmem:[#allocation8 + $0x4e8] ss:$16 sps:$4 sm:$0xff]  }
 0x34c   :  { %5701 = vmatprep.subr.bf16.mxu0 %v7866_v54  ;;  %v7857_v54 = vld [vmem:[#allocation8 + $0x50c] ss:$16 sps:$4 sm:$0xff]  }
 0x34d   :  { %5798 = vmatpush1.bf16.msra.mxu1 %v7807_v56  ;;  %v7855_v56 = vld [vmem:[#allocation8 + $0x508] ss:$16 sps:$4 sm:$0xff]  }
 0x34e   :  { %5799 = vmatprep.subr.bf16.mxu1 %v7812_v59  ;;  %v7863_v59 = vld [vmem:[#allocation8 + $0x52c] ss:$16 sps:$4 sm:$0xff]  }
 0x34f   :  { %5702 = vmatpush1.bf16.msra.mxu0 %v7864_v62  ;;  %v7861_v62 = vld [vmem:[#allocation8 + $0x528] ss:$16 sps:$4 sm:$0xff]  }
 0x350   :  { %5703 = vmatprep.subr.bf16.mxu0 %v7872_v0  ;;  %v7869_v0 = vld [vmem:[#allocation8 + $0x54c] ss:$16 sps:$4 sm:$0xff]  }
 0x351   :  { %5800 = vmatpush1.bf16.msra.mxu1 %v7810_v57  ;;  %v7867_v57 = vld [vmem:[#allocation8 + $0x548] ss:$16 sps:$4 sm:$0xff]  }
 0x352   :  { %5801 = vmatprep.subr.bf16.mxu1 %v7815_v55  ;;  %v7875_v55 = vld [vmem:[#allocation8 + $0x56c] ss:$16 sps:$4 sm:$0xff]  }
 0x353   :  { %5704 = vmatpush1.bf16.msra.mxu0 %v7870_v1  ;;  %v7873_v1 = vld [vmem:[#allocation8 + $0x568] ss:$16 sps:$4 sm:$0xff]  }
 0x354   :  { %5705 = vmatprep.subr.bf16.mxu0 %v7878_v2  ;;  %v7881_v2 = vld [vmem:[#allocation8 + $0x58c] ss:$16 sps:$4 sm:$0xff]  }
 0x355   :  { %5802 = vmatpush1.bf16.msra.mxu1 %v7813_v4  ;;  %v7879_v4 = vld [vmem:[#allocation8 + $0x588] ss:$16 sps:$4 sm:$0xff]  }
 0x356   :  { %5803 = vmatprep.subr.bf16.mxu1 %v7818_v60  ;;  %v7887_v60 = vld [vmem:[#allocation8 + $0x5ac] ss:$16 sps:$4 sm:$0xff]  }
 0x357   :  { %5706 = vmatpush1.bf16.msra.mxu0 %v7876_v5  ;;  %v7885_v5 = vld [vmem:[#allocation8 + $0x5a8] ss:$16 sps:$4 sm:$0xff]  }
 0x358   :  { %5707 = vmatprep.subr.bf16.mxu0 %v7884_v6  ;;  %v7893_v6 = vld [vmem:[#allocation8 + $0x5cc] ss:$16 sps:$4 sm:$0xff]  }
 0x359   :  { %5804 = vmatpush1.bf16.msra.mxu1 %v7816_v52  ;;  %v7891_v52 = vld [vmem:[#allocation8 + $0x5c8] ss:$16 sps:$4 sm:$0xff]  }
 0x35a   :  { %5805 = vmatprep.subr.bf16.mxu1 %v7821_v7  ;;  %v7899_v7 = vld [vmem:[#allocation8 + $0x5ec] ss:$16 sps:$4 sm:$0xff]  }
 0x35b   :  { %5708 = vmatpush1.bf16.msra.mxu0 %v7882_v9  ;;  %v7897_v9 = vld [vmem:[#allocation8 + $0x5e8] ss:$16 sps:$4 sm:$0xff]  }
 0x35c   :  { %5709 = vmatprep.subr.bf16.mxu0 %v7890_v10  ;;  %v7905_v10 = vld [vmem:[#allocation8 + $0x60c] ss:$16 sps:$4 sm:$0xff]  }
 0x35d   :  { %5806 = vmatpush1.bf16.msra.mxu1 %v7819_v11  ;;  %v7903_v11 = vld [vmem:[#allocation8 + $0x608] ss:$16 sps:$4 sm:$0xff]  }
 0x35e   :  { %5807 = vmatprep.subr.bf16.mxu1 %v7824_v14  ;;  %v7911_v14 = vld [vmem:[#allocation8 + $0x62c] ss:$16 sps:$4 sm:$0xff]  }
 0x35f   :  { %5710 = vmatpush1.bf16.msra.mxu0 %v7888_v15  ;;  %v7909_v15 = vld [vmem:[#allocation8 + $0x628] ss:$16 sps:$4 sm:$0xff]  }
 0x360   :  { %5711 = vmatprep.subr.bf16.mxu0 %v7896_v19  ;;  %v7917_v19 = vld [vmem:[#allocation8 + $0x64c] ss:$16 sps:$4 sm:$0xff]  }
 0x361   :  { %5808 = vmatpush1.bf16.msra.mxu1 %v7822_v61  ;;  %v7915_v61 = vld [vmem:[#allocation8 + $0x648] ss:$16 sps:$4 sm:$0xff]  }
 0x362   :  { %5809 = vmatprep.subr.bf16.mxu1 %v7827_v20  ;;  %v7923_v20 = vld [vmem:[#allocation8 + $0x66c] ss:$16 sps:$4 sm:$0xff]  }
 0x363   :  { %5712 = vmatpush1.bf16.msra.mxu0 %v7894_v22  ;;  %v7921_v22 = vld [vmem:[#allocation8 + $0x668] ss:$16 sps:$4 sm:$0xff]  }
 0x364   :  { %5713 = vmatprep.subr.bf16.mxu0 %v7902_v51  ;;  %v7929_v51 = vld [vmem:[#allocation8 + $0x68c] ss:$16 sps:$4 sm:$0xff]  }
 0x365   :  { %5810 = vmatpush1.bf16.msra.mxu1 %v7825_v58  ;;  %v706_v58 = vrot.slane %v8607_v24, %v8594_v37 }
 0x366   :  { %5820 = vmatprep.subr.bf16.mxu1 %v7830_v23  ;;  %v7927_v23 = vld [vmem:[#allocation8 + $0x688] ss:$16 sps:$4 sm:$0xff]  }
 0x367   :  { %5714 = vmatpush1.bf16.msra.mxu0 %v7900_v34  ;;  %v7935_v34 = vld [vmem:[#allocation8 + $0x6ac] ss:$16 sps:$4 sm:$0xff]  }
 0x368   :  { %5812 = vmatmul.mubr.bf16.vlgmr.msra.gmra.mrb[12].mxu1 %v8600_v16  ;;  %5715 = vmatprep.subr.bf16.mxu0 %v7908_v25  ;;  %v7926_v16 = vld [vmem:[#allocation8 + $0x784] ss:$16 sps:$4 sm:$0xff]   ;;  %v746_v25 = vrot.slane %v706_v58, %v8548_v13  ;;  %v8007_v58 = vld [vmem:[#allocation11 + $0xb4] ss:$8 sps:$4 sm:$0xff]  }
 0x369   :  { %5821 = vmatpush1.bf16.msra.mxu1 %v7828_v17  ;;  %5852 = vmatprep.mubr.bf16.mxu1 %v8615_v47  ;;  %v7944_v47 = vld [vmem:[#allocation8 + $0x7e4] ss:$16 sps:$4 sm:$0xff]  }
 0x36a   :  { %5822 = vmatprep.subr.bf16.mxu1 %v7833_v26  ;;  %v7933_v26 = vld [vmem:[#allocation8 + $0x6a8] ss:$16 sps:$4 sm:$0xff]  }
 0x36b   :  { %5716 = vmatpush1.bf16.msra.mxu0 %v7906_v8  ;;  %v7941_v8 = vld [vmem:[#allocation8 + $0x6cc] ss:$16 sps:$4 sm:$0xff]  }
 0x36c   :  { %5717 = vmatprep.subr.bf16.mxu0 %v7914_v28 }
 0x36d   :  { %5823 = vmatpush1.bf16.msra.mxu1 %v7831_v29 }
 0x36e   :  { %5824 = vmatprep.subr.bf16.mxu1 %v7836_v35 }
 0x36f   :  { %5718 = vmatpush1.bf16.msra.mxu0 %v7912_v30 }
 0x370   :  { %5719 = vmatprep.subr.bf16.mxu0 %v7920_v31 }
 0x371   :  { %5825 = vmatpush1.bf16.msra.mxu1 %v7834_v32  ;;  %v7939_v32 = vld [vmem:[#allocation8 + $0x6c8] ss:$16 sps:$4 sm:$0xff]  }
 0x372   :  { %5826 = vmatprep.subr.bf16.mxu1 %v7839_v33 }
 0x373   :  { %5720 = vmatpush1.bf16.msra.mxu0 %v7918_v63  ;;  %v7947_v63 = vld [vmem:[#allocation8 + $0x6ec] ss:$16 sps:$4 sm:$0xff]  }
 0x374   :  { %5721 = vmatprep.subr.bf16.mxu0 %v7926_v16 }
 0x375   :  { %5827 = vmatpush1.bf16.msra.mxu1 %v7837_v43 }
 0x376   :  { %5828 = vmatprep.subr.bf16.mxu1 %v7842_v38 }
 0x377   :  { %5722 = vmatpush1.bf16.msra.mxu0 %v7924_v39  ;;  %v7945_v39 = vld [vmem:[#allocation8 + $0x6e8] ss:$16 sps:$4 sm:$0xff]  }
 0x378   :  { %5723 = vmatprep.subr.bf16.mxu0 %v7932_v40 }
 0x379   :  { %5829 = vmatpush1.bf16.msra.mxu1 %v7840_v21  ;;  %v7950_v21 = vld [vmem:[#allocation8 + $0x70c] ss:$16 sps:$4 sm:$0xff]  }
 0x37a   :  { %5830 = vmatprep.subr.bf16.mxu1 %v7845_v41  ;;  %v7972_v41 = vld [vmem:[#allocation11] ss:$8 sps:$4 sm:$0xff]  }
 0x37b   :  { %5724 = vmatpush1.bf16.msra.mxu0 %v7930_v42 }
 0x37c   :  { %5725 = vmatprep.subr.bf16.mxu0 %v7938_v44  ;;  %v7977_v44 = vld [vmem:[#allocation11 + $0x14] ss:$8 sps:$4 sm:$0xff]  }
 0x37d   :  { %5831 = vmatpush1.bf16.msra.mxu1 %v7843_v45  ;;  %v7948_v45 = vld [vmem:[#allocation8 + $0x708] ss:$16 sps:$4 sm:$0xff]  }
 0x37e   :  { %5832 = vmatprep.subr.bf16.mxu1 %v7848_v3  ;;  %v7953_v3 = vld [vmem:[#allocation8 + $0x72c] ss:$16 sps:$4 sm:$0xff]  }
 0x37f   :  { %5726 = vmatpush1.bf16.msra.mxu0 %v7936_v46  ;;  %v7975_v46 = vld [vmem:[#allocation11 + $0x10] ss:$8 sps:$4 sm:$0xff]  }
 0x380   :  { %5727 = vmatprep.subr.bf16.mxu0 %v7944_v47  ;;  %v7980_v47 = vld [vmem:[#allocation11 + $0x24] ss:$8 sps:$4 sm:$0xff]  }
 0x381   :  { %5833 = vmatpush1.bf16.msra.mxu1 %v7846_v48  ;;  %v7951_v48 = vld [vmem:[#allocation8 + $0x728] ss:$16 sps:$4 sm:$0xff]  }
 0x382   :  { %5834 = vmatprep.subr.bf16.mxu1 %v7851_v50  ;;  %v7956_v50 = vld [vmem:[#allocation8 + $0x74c] ss:$16 sps:$4 sm:$0xff]  }
 0x383   :  { %5728 = vmatpush1.bf16.msra.mxu0 %v7942_v27  ;;  %v7978_v27 = vld [vmem:[#allocation11 + $0x20] ss:$8 sps:$4 sm:$0xff]  }
 0x384   :  { %6323 = vmatprep.subr.bf16.mxu0 %v7974_v53  ;;  %v7983_v53 = vld [vmem:[#allocation11 + $0x34] ss:$8 sps:$4 sm:$0xff]  }
 0x385   :  { %5835 = vmatpush1.bf16.msra.mxu1 %v7849_v12  ;;  %v7954_v12 = vld [vmem:[#allocation8 + $0x748] ss:$16 sps:$4 sm:$0xff]  }
 0x386   :  { %5836 = vmatprep.subr.bf16.mxu1 %v7857_v54  ;;  %v7959_v54 = vld [vmem:[#allocation8 + $0x76c] ss:$16 sps:$4 sm:$0xff]  }
 0x389   :  { %5837 = vmatpush1.bf16.msra.mxu1 %v7855_v56  ;;  %v7981_v56 = vld [vmem:[#allocation11 + $0x30] ss:$8 sps:$4 sm:$0xff]  }
 0x38a   :  { %5838 = vmatprep.subr.bf16.mxu1 %v7863_v59  ;;  %v7986_v59 = vld [vmem:[#allocation11 + $0x44] ss:$8 sps:$4 sm:$0xff]  }
 0x38d   :  { %5839 = vmatpush1.bf16.msra.mxu1 %v7861_v62  ;;  %v7957_v62 = vld [vmem:[#allocation8 + $0x768] ss:$16 sps:$4 sm:$0xff]  }
 0x38e   :  { %5840 = vmatprep.subr.bf16.mxu1 %v7869_v0  ;;  %v7962_v0 = vld [vmem:[#allocation8 + $0x78c] ss:$16 sps:$4 sm:$0xff]  }
 0x391   :  { %5841 = vmatpush1.bf16.msra.mxu1 %v7867_v57  ;;  %v7984_v57 = vld [vmem:[#allocation11 + $0x40] ss:$8 sps:$4 sm:$0xff]  }
 0x392   :  { %5842 = vmatprep.subr.bf16.mxu1 %v7875_v55  ;;  %v7989_v55 = vld [vmem:[#allocation11 + $0x54] ss:$8 sps:$4 sm:$0xff]  }
 0x395   :  { %5843 = vmatpush1.bf16.msra.mxu1 %v7873_v1  ;;  %v7960_v1 = vld [vmem:[#allocation8 + $0x788] ss:$16 sps:$4 sm:$0xff]  }
 0x396   :  { %5844 = vmatprep.subr.bf16.mxu1 %v7881_v2  ;;  %v7965_v2 = vld [vmem:[#allocation8 + $0x7ac] ss:$16 sps:$4 sm:$0xff]  }
 0x399   :  { %5845 = vmatpush1.bf16.msra.mxu1 %v7879_v4  ;;  %v7987_v4 = vld [vmem:[#allocation11 + $0x50] ss:$8 sps:$4 sm:$0xff]  }
 0x39a   :  { %5846 = vmatprep.subr.bf16.mxu1 %v7887_v60  ;;  %v7992_v60 = vld [vmem:[#allocation11 + $0x64] ss:$8 sps:$4 sm:$0xff]  }
 0x39d   :  { %5847 = vmatpush1.bf16.msra.mxu1 %v7885_v5  ;;  %v7963_v5 = vld [vmem:[#allocation8 + $0x7a8] ss:$16 sps:$4 sm:$0xff]  }
 0x39e   :  { %5848 = vmatprep.subr.bf16.mxu1 %v7893_v6  ;;  %v7968_v6 = vld [vmem:[#allocation8 + $0x7cc] ss:$16 sps:$4 sm:$0xff]  }
 0x3a1   :  { %5849 = vmatpush1.bf16.msra.mxu1 %v7891_v52  ;;  %v7990_v52 = vld [vmem:[#allocation11 + $0x60] ss:$8 sps:$4 sm:$0xff]  }
 0x3a2   :  { %5850 = vmatprep.subr.bf16.mxu1 %v7899_v7  ;;  %v7995_v7 = vld [vmem:[#allocation11 + $0x74] ss:$8 sps:$4 sm:$0xff]  }
 0x3a5   :  { %5851 = vmatpush1.bf16.msra.mxu1 %v7897_v9  ;;  %v7966_v9 = vld [vmem:[#allocation8 + $0x7c8] ss:$16 sps:$4 sm:$0xff]  }
 0x3a6   :  { %5861 = vmatprep.subr.bf16.mxu1 %v7905_v10  ;;  %v7971_v10 = vld [vmem:[#allocation8 + $0x7ec] ss:$16 sps:$4 sm:$0xff]  }
 0x3a8   :  { %5853 = vmatmul.mubr.bf16.vlgmr.msra.gmra.mrb[12].mxu1 %v8617_v49  ;;  %v710_v49 = vrot.slane %v8607_v24, %v8583_v36 }
 0x3a9   :  { %5862 = vmatpush1.bf16.msra.mxu1 %v7903_v11  ;;  %v7993_v11 = vld [vmem:[#allocation11 + $0x70] ss:$8 sps:$4 sm:$0xff]  }
 0x3aa   :  { %5863 = vmatprep.subr.bf16.mxu1 %v7911_v14  ;;  %v750_v17 = vrot.slane %v710_v49, %v8548_v13  ;;  %v7998_v14 = vld [vmem:[#allocation11 + $0x84] ss:$8 sps:$4 sm:$0xff]  }
 0x3ab   :  { %v8010_v49 = vld [vmem:[#allocation11 + $0xc4] ss:$8 sps:$4 sm:$0xff]  }
 0x3ad   :  { %5864 = vmatpush1.bf16.msra.mxu1 %v7909_v15  ;;  %v7969_v15 = vld [vmem:[#allocation8 + $0x7e8] ss:$16 sps:$4 sm:$0xff]  }
 0x3ae   :  { %5865 = vmatprep.subr.bf16.mxu1 %v7917_v19  ;;  %v7996_v19 = vld [vmem:[#allocation11 + $0x80] ss:$8 sps:$4 sm:$0xff]  }
 0x3b1   :  { %5866 = vmatpush1.bf16.msra.mxu1 %v7915_v61  ;;  %v8001_v61 = vld [vmem:[#allocation11 + $0x94] ss:$8 sps:$4 sm:$0xff]  }
 0x3b2   :  { %5867 = vmatprep.subr.bf16.mxu1 %v7923_v20  ;;  %v7999_v20 = vld [vmem:[#allocation11 + $0x90] ss:$8 sps:$4 sm:$0xff]  }
 0x3b5   :  { %5868 = vmatpush1.bf16.msra.mxu1 %v7921_v22  ;;  %v8004_v22 = vld [vmem:[#allocation11 + $0xa4] ss:$8 sps:$4 sm:$0xff]  }
 0x3b6   :  { %5869 = vmatprep.subr.bf16.mxu1 %v7929_v51  ;;  %v8002_v51 = vld [vmem:[#allocation11 + $0xa0] ss:$8 sps:$4 sm:$0xff]  }
 0x3b9   :  { %5870 = vmatpush1.bf16.msra.mxu1 %v7927_v23  ;;  %v8005_v23 = vld [vmem:[#allocation11 + $0xb0] ss:$8 sps:$4 sm:$0xff]  }
 0x3ba   :  { %5871 = vmatprep.subr.bf16.mxu1 %v7935_v34  ;;  %v8008_v34 = vld [vmem:[#allocation11 + $0xc0] ss:$8 sps:$4 sm:$0xff]  }
 0x3bb   :  { %v3960_v28 = vpop.f32.mrb[8].mxu1 }
 0x3bc   :  { %v7490_v29 = vadd.f32 %v3960_v28, %v746_v25  ;;  %v3962_v35 = vpop.f32.mrb[9].mxu1  ;;  %v8013_v25 = vld [vmem:[#allocation11 + $0xd4] ss:$8 sps:$4 sm:$0xff]  }
 0x3bd   :  { %v7491_v30 = vadd.f32 %v3962_v35, %v750_v17  ;;  %v3964_v31 = vpop.f32.mrb[10].mxu1  ;;  %5872 = vmatpush1.bf16.msra.mxu1 %v7933_v26  ;;  %v8011_v17 = vld [vmem:[#allocation11 + $0xd0] ss:$8 sps:$4 sm:$0xff]   ;;  %v8016_v26 = vld [vmem:[#allocation11 + $0xe4] ss:$8 sps:$4 sm:$0xff]  }
 0x3be   :  { %vm3973_vm6 = vcmp.ge.f32.partialorder %v7490_v29, 0.0  ;;  %v3981_v33 = vmul.f32 0.2, %v7490_v29  ;;  %v3965_v24 = vpop.f32.mrb[11].mxu1  ;;  %5873 = vmatprep.subr.bf16.mxu1 %v7941_v8  ;;  %v8014_v8 = vld [vmem:[#allocation11 + $0xe0] ss:$8 sps:$4 sm:$0xff]  }
 0x3bf   :  { %vm3974_vm7 = vcmp.ge.f32.partialorder %v7491_v30, 0.0  ;;  %v3982_v16 = vmul.f32 0.2, %v7491_v30  ;;  %v8019_v28 = vld [vmem:[#allocation11 + $0xf4] ss:$8 sps:$4 sm:$0xff]   ;;  %v8069_v31 = vld [vmem:[#allocation14] sm:$0xff]  }
 0x3c0   :  { %v3989_v43 = vsel %vm3973_vm6, %v7490_v29, %v3981_v33  ;;  %v8017_v29 = vld [vmem:[#allocation11 + $0xf0] ss:$8 sps:$4 sm:$0xff]   ;;  %v8022_v35 = vld [vmem:[#allocation11 + $0x104] ss:$8 sps:$4 sm:$0xff]  }
 0x3c1   :  { %5874 = vmatpush1.bf16.msra.mxu1 %v7939_v32  ;;  %v3990_v38 = vsel %vm3974_vm7, %v7491_v30, %v3982_v16  ;;  %v8630_v42 = vpack.c.bf16 %v3989_v43, %v3989_v43  ;;  %v8068_v30 = vld [vmem:[#allocation14 + $0x40] sm:$0xff]   ;;  %v8070_v32 = vld [vmem:[#allocation14 + $0x48] sm:$0xff]   ;;  %v8072_v24 = vld [vmem:[#allocation14 + $0x50] sm:$0xff]  }
 0x3c2   :  { %v3998_v40 = vpack.c.bf16 %v3990_v38, %v3990_v38  ;;  %5875 = vmatprep.subr.bf16.mxu1 %v7947_v63  ;;  %v8071_v33 = vld [vmem:[#allocation14 + $0x8] sm:$0xff]   ;;  %v8073_v63 = vld [vmem:[#allocation14 + $0x10] sm:$0xff]   ;;  %v8074_v16 = vld [vmem:[#allocation14 + $0x58] sm:$0xff]  }
 0x3c3   :  { %v8075_v43 = vld [vmem:[#allocation14 + $0x18] sm:$0xff]   ;;  %v8076_v38 = vld [vmem:[#allocation14 + $0x60] sm:$0xff]  }
 0x3c4   :  { %5729 = vmatprep.mubr.bf16.mxu0 %v3998_v40  ;;  %5893 = vmatprep.mubr.bf16.mxu1 %v3998_v40  ;;  %v8078_v40 = vld [vmem:[#allocation14 + $0x68] sm:$0xff]  }
 0x3c5   :  { %5730 = vmatmul.mubr.bf16.vlgmr.msra.gmra.mrb[8].mxu0 %v8630_v42  ;;  %5876 = vmatpush1.bf16.msra.mxu1 %v7945_v39  ;;  %v8077_v39 = vld [vmem:[#allocation14 + $0x20] sm:$0xff]  }
 0x3c6   :  { %5877 = vmatprep.subr.bf16.mxu1 %v7950_v21  ;;  %6324 = vmatpush1.bf16.msra.mxu0 %v7972_v41  ;;  %v8079_v21 = vld [vmem:[#allocation14 + $0x28] sm:$0xff]   ;;  %v4255_v41 = vld [vmem:[#allocation10] sm:$0xf] }
 0x3c7   :  { %6325 = vmatprep.subr.bf16.mxu0 %v7977_v44 }
 0x3c9   :  { %5878 = vmatpush1.bf16.msra.mxu1 %v7948_v45 }
 0x3ca   :  { %5879 = vmatprep.subr.bf16.mxu1 %v7953_v3  ;;  %6326 = vmatpush1.bf16.msra.mxu0 %v7975_v46 }
 0x3cb   :  { %6327 = vmatprep.subr.bf16.mxu0 %v7980_v47 }
 0x3cd   :  { %5880 = vmatpush1.bf16.msra.mxu1 %v7951_v48 }
 0x3ce   :  { %5881 = vmatprep.subr.bf16.mxu1 %v7956_v50  ;;  %6328 = vmatpush1.bf16.msra.mxu0 %v7978_v27 }
 0x3cf   :  { %6329 = vmatprep.subr.bf16.mxu0 %v7983_v53 }
 0x3d1   :  { %5882 = vmatpush1.bf16.msra.mxu1 %v7954_v12 }
 0x3d2   :  { %5883 = vmatprep.subr.bf16.mxu1 %v7959_v54  ;;  %6330 = vmatpush1.bf16.msra.mxu0 %v7981_v56 }
 0x3d3   :  { %6331 = vmatprep.subr.bf16.mxu0 %v7986_v59 }
 0x3d5   :  { %5884 = vmatpush1.bf16.msra.mxu1 %v7957_v62 }
 0x3d6   :  { %5885 = vmatprep.subr.bf16.mxu1 %v7962_v0  ;;  %6332 = vmatpush1.bf16.msra.mxu0 %v7984_v57  ;;  %v8020_v57 = vld [vmem:[#allocation11 + $0x100] ss:$8 sps:$4 sm:$0xff]  }
 0x3d7   :  { %6333 = vmatprep.subr.bf16.mxu0 %v7989_v55 }
 0x3d9   :  { %5886 = vmatpush1.bf16.msra.mxu1 %v7960_v1  ;;  %v8025_v1 = vld [vmem:[#allocation11 + $0x114] ss:$8 sps:$4 sm:$0xff]  }
 0x3da   :  { %5887 = vmatprep.subr.bf16.mxu1 %v7965_v2  ;;  %6334 = vmatpush1.bf16.msra.mxu0 %v7987_v4  ;;  %v8023_v2 = vld [vmem:[#allocation11 + $0x110] ss:$8 sps:$4 sm:$0xff]   ;;  %v8028_v4 = vld [vmem:[#allocation11 + $0x124] ss:$8 sps:$4 sm:$0xff]  }
 0x3db   :  { %6335 = vmatprep.subr.bf16.mxu0 %v7992_v60  ;;  %v8026_v60 = vld [vmem:[#allocation11 + $0x120] ss:$8 sps:$4 sm:$0xff]  }
 0x3dd   :  { %5888 = vmatpush1.bf16.msra.mxu1 %v7963_v5  ;;  %v8031_v5 = vld [vmem:[#allocation11 + $0x134] ss:$8 sps:$4 sm:$0xff]  }
 0x3de   :  { %5889 = vmatprep.subr.bf16.mxu1 %v7968_v6  ;;  %6336 = vmatpush1.bf16.msra.mxu0 %v7990_v52  ;;  %v8029_v6 = vld [vmem:[#allocation11 + $0x130] ss:$8 sps:$4 sm:$0xff]   ;;  %v8034_v52 = vld [vmem:[#allocation11 + $0x144] ss:$8 sps:$4 sm:$0xff]  }
 0x3df   :  { %6337 = vmatprep.subr.bf16.mxu0 %v7995_v7  ;;  %v8032_v7 = vld [vmem:[#allocation11 + $0x140] ss:$8 sps:$4 sm:$0xff]  }
 0x3e1   :  { %5890 = vmatpush1.bf16.msra.mxu1 %v7966_v9  ;;  %v8037_v9 = vld [vmem:[#allocation11 + $0x154] ss:$8 sps:$4 sm:$0xff]  }
 0x3e2   :  { %5891 = vmatprep.subr.bf16.mxu1 %v7971_v10  ;;  %6338 = vmatpush1.bf16.msra.mxu0 %v7993_v11  ;;  %v8035_v10 = vld [vmem:[#allocation11 + $0x150] ss:$8 sps:$4 sm:$0xff]   ;;  %v8040_v11 = vld [vmem:[#allocation11 + $0x164] ss:$8 sps:$4 sm:$0xff]  }
 0x3e3   :  { %6339 = vmatprep.subr.bf16.mxu0 %v7998_v14 }
 0x3e5   :  { %5892 = vmatpush1.bf16.msra.mxu1 %v7969_v15  ;;  %v8038_v15 = vld [vmem:[#allocation11 + $0x160] ss:$8 sps:$4 sm:$0xff]  }
 0x3e6   :  { %6340 = vmatpush1.bf16.msra.mxu0 %v7996_v19  ;;  %7460 = vmatprep.subr.bf16.mxu1 %v8068_v30  ;;  %v8043_v19 = vld [vmem:[#allocation11 + $0x174] ss:$8 sps:$4 sm:$0xff]  }
 0x3e7   :  { %6341 = vmatprep.subr.bf16.mxu0 %v8001_v61  ;;  %v8055_v30 = vld [vmem:[#allocation11 + $0x1b4] ss:$8 sps:$4 sm:$0xff]  }
 0x3e8   :  { %5894 = vmatmul.mubr.bf16.vlgmr.msra.gmra.mrb[12].mxu1 %v8630_v42  ;;  %v8634_v42 = vunpack.c.l.bf16 %v4255_v41 }
 0x3e9   :  { %7461 = vmatpush3.bf16.msra.mxu1 %v8069_v31  ;;  %v8053_v31 = vld [vmem:[#allocation11 + $0x1b0] ss:$8 sps:$4 sm:$0xff]  }
 0x3ea   :  { %6342 = vmatpush1.bf16.msra.mxu0 %v7999_v20  ;;  %7462 = vmatprep.subr.bf16.mxu1 %v8070_v32  ;;  %v4261_v44 = vrot.slane %v8634_v42, %v8548_v13  ;;  %v4265_v45 = vrot.slane %v8634_v42, %v8551_v18  ;;  %v4273_v14 = vrot.slane %v8634_v42, %v8583_v36  ;;  %v8049_v36 = vld [vmem:[#allocation11 + $0x194] ss:$8 sps:$4 sm:$0xff]   ;;  %v8058_v32 = vld [vmem:[#allocation11 + $0x1c4] ss:$8 sps:$4 sm:$0xff]  }
 0x3eb   :  { %6343 = vmatprep.subr.bf16.mxu0 %v8004_v22  ;;  %v8041_v22 = vld [vmem:[#allocation11 + $0x170] ss:$8 sps:$4 sm:$0xff]  }
 0x3ec   :  { %v4281_v3 = vrot.slane %v4261_v44, %v8548_v13  ;;  %v4285_v46 = vrot.slane %v4265_v45, %v8548_v13  ;;  %v4293_v61 = vrot.slane %v4273_v14, %v8548_v13  ;;  %v8065_v44 = vld [vmem:[#allocation11 + $0x1f0] ss:$8 sps:$4 sm:$0xff]  }
 0x3ed   :  { %7463 = vmatpush3.bf16.msra.mxu1 %v8071_v33  ;;  %v4269_v33 = vrot.slane %v8634_v42, %v8594_v37  ;;  %v8080_v45 = vld [vmem:[#allocation14 + $0x70] sm:$0xff]  }
 0x3ee   :  { %6344 = vmatpush1.bf16.msra.mxu0 %v8002_v51  ;;  %7464 = vmatprep.subr.bf16.mxu1 %v8072_v24  ;;  %v8056_v24 = vld [vmem:[#allocation11 + $0x1c0] ss:$8 sps:$4 sm:$0xff]  }
 0x3ef   :  { %6345 = vmatprep.subr.bf16.mxu0 %v8007_v58  ;;  %v8046_v58 = vld [vmem:[#allocation11 + $0x184] ss:$8 sps:$4 sm:$0xff]  }
 0x3f1   :  { %7465 = vmatpush3.bf16.msra.mxu1 %v8073_v63  ;;  %v8061_v63 = vld [vmem:[#allocation11 + $0x1d4] ss:$8 sps:$4 sm:$0xff]  }
 0x3f2   :  { %6346 = vmatpush1.bf16.msra.mxu0 %v8005_v23  ;;  %7466 = vmatprep.subr.bf16.mxu1 %v8074_v16  ;;  %v4289_v16 = vrot.slane %v4269_v33, %v8548_v13 }
 0x3f3   :  { %6347 = vmatprep.subr.bf16.mxu0 %v8010_v49 }
 0x3f5   :  { %7467 = vmatpush3.bf16.msra.mxu1 %v8075_v43  ;;  %v8059_v43 = vld [vmem:[#allocation11 + $0x1d0] ss:$8 sps:$4 sm:$0xff]  }
 0x3f6   :  { %6348 = vmatpush1.bf16.msra.mxu0 %v8008_v34  ;;  %7468 = vmatprep.subr.bf16.mxu1 %v8076_v38  ;;  %v8064_v38 = vld [vmem:[#allocation11 + $0x1e4] ss:$8 sps:$4 sm:$0xff]  }
 0x3f7   :  { %6349 = vmatprep.subr.bf16.mxu0 %v8013_v25 }
 0x3f9   :  { %7469 = vmatpush3.bf16.msra.mxu1 %v8077_v39 }
 0x3fa   :  { %6350 = vmatpush1.bf16.msra.mxu0 %v8011_v17  ;;  %7470 = vmatprep.subr.bf16.mxu1 %v8078_v40  ;;  %v8044_v17 = vld [vmem:[#allocation11 + $0x180] ss:$8 sps:$4 sm:$0xff]  }
 0x3fb   :  { %6351 = vmatprep.subr.bf16.mxu0 %v8016_v26  ;;  %v8062_v40 = vld [vmem:[#allocation11 + $0x1e0] ss:$8 sps:$4 sm:$0xff]  }
 0x3fd   :  { %7471 = vmatpush3.bf16.msra.mxu1 %v8079_v21  ;;  %v8067_v21 = vld [vmem:[#allocation11 + $0x1f4] ss:$8 sps:$4 sm:$0xff]  }
 0x3fe   :  { %6352 = vmatpush1.bf16.msra.mxu0 %v8014_v8  ;;  %7472 = vmatprep.subr.bf16.mxu1 %v8080_v45 }
 0x3ff   :  { %6353 = vmatprep.subr.bf16.mxu0 %v8019_v28  ;;  %v8047_v28 = vld [vmem:[#allocation11 + $0x190] ss:$8 sps:$4 sm:$0xff]  }
 0x402   :  { %6354 = vmatpush1.bf16.msra.mxu0 %v8017_v29  ;;  %v8052_v29 = vld [vmem:[#allocation11 + $0x1a4] ss:$8 sps:$4 sm:$0xff]  }
 0x403   :  { %6364 = vmatprep.subr.bf16.mxu0 %v8022_v35  ;;  %v8050_v35 = vld [vmem:[#allocation11 + $0x1a0] ss:$8 sps:$4 sm:$0xff]  }
 0x498   :  { %v5731_v47 = vpop.f32.mrb[8].mxu0 }
 0x499   :  { %v7492_v48 = vadd.f32 %v5731_v47, %v4281_v3  ;;  %v5733_v50 = vpop.f32.mrb[9].mxu0  ;;  %v8081_v3 = vld [vmem:[#allocation14 + $0x30] sm:$0xff]   ;;  %v8083_v47 = vld [vmem:[#allocation14 + $0x38] sm:$0xff]  }
 0x49a   :  { %v7493_v27 = vadd.f32 %v5733_v50, %v4285_v46  ;;  %v5735_v53 = vpop.f32.mrb[10].mxu0  ;;  %7473 = vmatpush3.bf16.msra.mxu1 %v8081_v3  ;;  %v8082_v46 = vld [vmem:[#allocation14 + $0x78] sm:$0xff]  }
 0x49b   :  { %vm5902_vm8 = vcmp.ge.f32.partialorder %v7492_v48, 0.0  ;;  %v5906_v12 = vmul.f32 0.2, %v7492_v48  ;;  %v5736_v54 = vpop.f32.mrb[11].mxu0  ;;  %7474 = vmatprep.subr.bf16.mxu1 %v8082_v46 }
 0x49c   :  { %vm5903_vm9 = vcmp.ge.f32.partialorder %v7493_v27, 0.0  ;;  %v5907_v56 = vmul.f32 0.2, %v7493_v27 }
 0x49d   :  { %v5910_v59 = vsel %vm5902_vm8, %v7492_v48, %v5906_v12  ;;  %v5982_v48 = vld [vmem:[#allocation13] sm:$0x3] }
 0x49e   :  { %v5911_v62 = vsel %vm5903_vm9, %v7493_v27, %v5907_v56  ;;  %v5914_v55 = vpack.c.bf16 %v5910_v59, %v5910_v59  ;;  %7475 = vmatpush3.bf16.msra.mxu1 %v8083_v47  ;;  %v5983_v50 = vunpack.c.l.bf16 %v5982_v48 }
 0x49f   :  { %v5915_v0 = vpack.c.bf16 %v5911_v62, %v5911_v62 }
 0x4a0   :  { %v5988_v27 = vrot.slane %v5983_v50, %v8548_v13  ;;  %v5992_v53 = vrot.slane %v5983_v50, %v8551_v18  ;;  %v6445_v18 = vld [vmem:[#allocation16] sm:$0x1] }
 0x4a1   :  { %6355 = vmatprep.mubr.bf16.mxu0 %v5915_v0 }
 0x4a2   :  { %6356 = vmatmul.mubr.bf16.vlgmr.msra.gmra.mrb[12].mxu0 %v5914_v55  ;;  %v5998_v12 = vrot.slane %v5988_v27, %v8548_v13  ;;  %v6002_v54 = vrot.slane %v5992_v53, %v8548_v13 }
 0x4a3   :  { %6365 = vmatpush1.bf16.msra.mxu0 %v8020_v57 }
 0x4a4   :  { %6366 = vmatprep.subr.bf16.mxu0 %v8025_v1 }
 0x4a7   :  { %6367 = vmatpush1.bf16.msra.mxu0 %v8023_v2 }
 0x4a8   :  { %6368 = vmatprep.subr.bf16.mxu0 %v8028_v4 }
 0x4ab   :  { %6369 = vmatpush1.bf16.msra.mxu0 %v8026_v60 }
 0x4ac   :  { %6370 = vmatprep.subr.bf16.mxu0 %v8031_v5 }
 0x4af   :  { %6371 = vmatpush1.bf16.msra.mxu0 %v8029_v6 }
 0x4b0   :  { %6372 = vmatprep.subr.bf16.mxu0 %v8034_v52  ;;  %v6446_v52 = vunpack.c.l.bf16 %v6445_v18 }
 0x4b3   :  { %6373 = vmatpush1.bf16.msra.mxu0 %v8032_v7 }
 0x4b4   :  { %6374 = vmatprep.subr.bf16.mxu0 %v8037_v9  ;;  %v6450_v9 = vrot.slane %v6446_v52, %v8548_v13 }
 0x4b7   :  { %6375 = vmatpush1.bf16.msra.mxu0 %v8035_v10 }
 0x4b8   :  { %6376 = vmatprep.subr.bf16.mxu0 %v8040_v11 }
 0x4bb   :  { %6377 = vmatpush1.bf16.msra.mxu0 %v8038_v15  ;;  %v5895_v20 = vpop.f32.mrb[12].mxu1 }
 0x4bc   :  { %v5897_v51 = vpop.f32.mrb[13].mxu1  ;;  %6378 = vmatprep.subr.bf16.mxu0 %v8043_v19  ;;  %v7494_v39 = vadd.f32 %v5895_v20, %v4289_v16 }
 0x4bd   :  { %v7495_v23 = vadd.f32 %v5897_v51, %v4293_v61  ;;  %v5899_v49 = vpop.f32.mrb[14].mxu1 }
 0x4be   :  { %v5900_v34 = vpop.f32.mrb[15].mxu1  ;;  %v5908_v41 = vmul.f32 0.2, %v7494_v39  ;;  %vm5904_vm11 = vcmp.ge.f32.partialorder %v7494_v39, 0.0 }
 0x4bf   :  { %vm5905_vm10 = vcmp.ge.f32.partialorder %v7495_v23, 0.0  ;;  %v5909_v25 = vmul.f32 0.2, %v7495_v23  ;;  %6379 = vmatpush1.bf16.msra.mxu0 %v8041_v22 }
 0x4c0   :  { %6380 = vmatprep.subr.bf16.mxu0 %v8046_v58  ;;  %v5912_v37 = vsel %vm5904_vm11, %v7494_v39, %v5908_v41 }
 0x4c1   :  { %v5913_v26 = vsel %vm5905_vm10, %v7495_v23, %v5909_v25  ;;  %v5916_v42 = vpack.c.bf16 %v5912_v37, %v5912_v37 }
 0x4c2   :  { %v5917_v8 = vpack.c.bf16 %v5913_v26, %v5913_v26 }
 0x4c3   :  { %6381 = vmatpush1.bf16.msra.mxu0 %v8044_v17 }
 0x4c4   :  { %6396 = vmatprep.mubr.bf16.mxu0 %v5917_v8  ;;  %6382 = vmatprep.subr.bf16.mxu0 %v8049_v36 }
 0x4c7   :  { %6383 = vmatpush1.bf16.msra.mxu0 %v8047_v28 }
 0x4c8   :  { %6384 = vmatprep.subr.bf16.mxu0 %v8052_v29 }
 0x4cb   :  { %6385 = vmatpush1.bf16.msra.mxu0 %v8050_v35 }
 0x4cc   :  { %6386 = vmatprep.subr.bf16.mxu0 %v8055_v30 }
 0x4cf   :  { %6387 = vmatpush1.bf16.msra.mxu0 %v8053_v31 }
 0x4d0   :  { %6388 = vmatprep.subr.bf16.mxu0 %v8058_v32 }
 0x4d3   :  { %6389 = vmatpush1.bf16.msra.mxu0 %v8056_v24 }
 0x4d4   :  { %6390 = vmatprep.subr.bf16.mxu0 %v8061_v63 }
 0x4d7   :  { %6391 = vmatpush1.bf16.msra.mxu0 %v8059_v43 }
 0x4d8   :  { %6392 = vmatprep.subr.bf16.mxu0 %v8064_v38 }
 0x4db   :  { %6393 = vmatpush1.bf16.msra.mxu0 %v8062_v40 }
 0x4dc   :  { %6394 = vmatprep.subr.bf16.mxu0 %v8067_v21 }
 0x4df   :  { %6395 = vmatpush1.bf16.msra.mxu0 %v8065_v44 }
 0x4e2   :  { %6397 = vmatmul.mubr.bf16.vlgmr.msra.gmra.mrb[12].mxu0 %v5916_v42 }
 0x5b5   :  { %v6398_v56 = vpop.f32.mrb[12].mxu0 }
 0x5b6   :  { %v7496_v59 = vadd.f32 %v6398_v56, %v5998_v12  ;;  %v6400_v62 = vpop.f32.mrb[13].mxu0 }
 0x5b7   :  { %v7497_v0 = vadd.f32 %v6400_v62, %v6002_v54  ;;  %v6402_v57 = vpop.f32.mrb[14].mxu0 }
 0x5b8   :  { %vm6405_vm12 = vcmp.ge.f32.partialorder %v7496_v59, 0.0  ;;  %v6407_v55 = vmul.f32 0.2, %v7496_v59  ;;  %v6403_v1 = vpop.f32.mrb[15].mxu0 }
 0x5b9   :  { %vm6406_vm13 = vcmp.ge.f32.partialorder %v7497_v0, 0.0  ;;  %v6408_v2 = vmul.f32 0.2, %v7497_v0 }
 0x5ba   :  { %v6409_v4 = vsel %vm6405_vm12, %v7496_v59, %v6407_v55 }
 0x5bb   :  { %v6410_v60 = vsel %vm6406_vm13, %v7497_v0, %v6408_v2  ;;  %v6411_v6 = vpack.c.bf16 %v6409_v4, %v6409_v4 }
 0x5bc   :  { %v6412_v5 = vpack.c.bf16 %v6410_v60, %v6410_v60 }
 0x5be   :  { %6579 = vmatprep.mubr.bf16.mxu1 %v6412_v5 }
 0x5bf   :  { %6580 = vmatmul.mubr.bf16.vlgmr.msra.gmra.mrb[16].mxu1 %v6411_v6 }
 0x692   :  { %v7476_v7 = vpop.f32.mrb[16].mxu1 }
 0x693   :  { %v7477_v10 = vpop.f32.mrb[17].mxu1 }
 0x694   :  { %v7478_v11 = vadd.f32 %v7477_v10, %v7476_v7  ;;  %v7479_v14 = vpop.f32.mrb[18].mxu1 }
 0x695   :  { %v7480_v15 = vpop.f32.mrb[19].mxu1 }
 0x696   :  { %v6582_v19 = vadd.f32 %v7478_v11, %v6450_v9 }
 0x698   :  { %v6587_v61 = vsub.f32 0.0, %v6582_v19 }
 0x69a   :  { %v6588_v20 = vmul.f32 1.442695, %v6587_v61 }
 0x69c   :  { %8084 = vpow2.f32 %v6588_v20 }
 0x6a6   :  { %v8085_v22 = vpop.eup %8084 }
 0x6a7   :  { %v6590_v51 = vadd.f32 1.0, %v8085_v22 }
 0x6a9   :  { %8086 = vrcp.f32 %v6590_v51 }
 0x6b3   :  { %v8087_v58 = vpop.eup %8086 }
 0x6b4   :  { %6592 = vst [vmem:[#allocation17] sm:$0xff] %v8087_v58 }
 0x6b5   :  { %8298 = shalt.err (!%p8295_p6)
}
 0x6b6   :  { %s8299_s22 = scalar_lea.hbm %s8674_s9, 128 }
 0x6b7   :  { %p8300_p7 = scmp.ne.s32.totalorder %s8674_s9, %s8299_s22  ;;  %p8303_p8 = scmp.lt.u32.totalorder %s8299_s22, %s8674_s9 }
 0x6b9   :  { %p8305_p9 = pnand %p8303_p8, %p8300_p7 }
 0x6bb   :  { %8308 = shalt.err (!%p8305_p9)
}
 0x6bc   :  { %6602 = dma.vmem_to_hbm [thread:$0]  %s6600_s24, 128, %s8674_s9, [#allocation4]  }
 0x6bd   :  { %8319 = dma.done.wait [#allocation4], 128  }
 0x6be   :  { %8320 = vsyncadd [#allocation4], 4294967168 }
 0x6bf   :  { %6606 = vsyncpa [#allocation3], 1 }
 0x6c0   :  { %6607 = vsyncpa [#allocation6], 1 }
 0x6c1   :  { %6608 = vsyncpa [#allocation9], 1 }
 0x6c2   :  { %6609 = vsyncpa [#allocation12], 1 }
 0x6c3   :  { %6610 = vsyncpa [#allocation15], 1 }
 0x6c4   :  { %6611 = vsyncpa [#allocation4], 1 }

</bundles_post_ra>
